<compile_context>
chip_gen: v6e
topology: v6e:2x2x1
jax: 0.10.0
libtpu: 0.0.40
codegen_flags: <defaults>
</compile_context>

<pallas_src>
import jax
import jax.numpy as jnp
from jax.experimental import pallas as pl
from jax.experimental.pallas import tpu as pltpu

# ---------------- config (small, deterministic) ----------------
B, C, T, H, W = 2, 3, 8, 16, 16     # batch, channels, time, spatial
FEAT = 32                           # stand-in for resnet.fc.in_features (512)
HID = 32                            # stand-in for lstm_hidden_size (512)
LAYERS = 4                          # num_layers=4 as in the module
KH = KW = 3
CK = C * KH * KW                    # raw im2col patch width (27)
CKP = 32                            # padded: row 27 = ones (bias), 28..31 = 0
HW = H * W                          # 256
F = T * B                           # frames, time-major order (t*B + b) = 16
FHW = F * HW                        # 4096 (lane-dense)
G4 = 4 * HID                        # 128 (lane-dense gate width)

assert FEAT == HID, "layer-0 W_ih assumes input_size == hidden_size"


# ---------------- fused CNN + wavefront 4-layer LSTM kernel ----------------
def _lstm_cell(gates, c_prev):
    """Gate columns pre-ordered (i, f, o, g): 1 sigmoid + 1 tanh per cell."""
    sig = jax.nn.sigmoid(gates[:, :3 * HID])
    i_g = sig[:, 0 * HID:1 * HID]
    f_g = sig[:, 1 * HID:2 * HID]
    o_g = sig[:, 2 * HID:3 * HID]
    g_g = jnp.tanh(gates[:, 3 * HID:4 * HID])
    c_new = f_g * c_prev + i_g * g_g
    h_new = o_g * jnp.tanh(c_new)
    return h_new, c_new


def encoder_kernel(patches_ref, wconvT_ref, pool_ref,
                   wih_ref, whh_ref, bias_ref,
                   out_ref, hn_ref, cn_ref):
    # ---- CNN features ---------------------------------------------------
    # conv3x3(+bias) as one lane-dense matmul [FEAT,CKP] @ [CKP, F*HW], ReLU,
    # then global-average-pool as a second matmul against pool[F, F*HW].
    y = jnp.dot(wconvT_ref[...], patches_ref[...],
                preferred_element_type=jnp.float32)            # [FEAT, FHW]
    y = jnp.maximum(y, 0.0).astype(jnp.bfloat16)
    feats = jax.lax.dot_general(                               # [F, FEAT]
        pool_ref[...], y, (((1,), (1,)), ((), ())),
        preferred_element_type=jnp.float32)

    # ---- hoisted layer-0 input projection (whole sequence, one matmul) ---
    gx0 = jnp.dot(feats.astype(jnp.bfloat16), wih_ref[0],
                  preferred_element_type=jnp.float32) + bias_ref[0]  # [F, 4H]

    # ---- wavefront-scheduled LSTM: register-carried h/c, fully unrolled --
    zeros = jnp.zeros((B, HID), jnp.float32)
    h = [zeros] * LAYERS
    c = [zeros] * LAYERS

    # Two independent K=32 matmuls per interior node (x@Wih + h@Whh) keep the
    # dependent chain at one matmul; block-diagonal K=256 stacking is only
    # worthwhile at real HID=512 scale (see TODO above).
    for d in range(T + LAYERS - 1):          # diagonals d = layer + t
        h_prev = list(h)                     # snapshot: reads come from d-1
        for l in range(LAYERS):
            t = d - l
            if t < 0 or t >= T:
                continue
            if l == 0:
                gates = gx0[t * B:(t + 1) * B, :] + jnp.dot(
                    h_prev[0].astype(jnp.bfloat16), whh_ref[0],
                    preferred_element_type=jnp.float32)
            else:
                gates = (jnp.dot(h_prev[l - 1].astype(jnp.bfloat16), wih_ref[l],
                                 preferred_element_type=jnp.float32)
                         + jnp.dot(h_prev[l].astype(jnp.bfloat16), whh_ref[l],
                                   preferred_element_type=jnp.float32)
                         + bias_ref[l])
            h_new, c_new = _lstm_cell(gates, c[l])
            h[l] = h_new
            c[l] = c_new
            if l == LAYERS - 1:              # top-layer outputs (not re-read)
                out_ref[t * B:(t + 1) * B, :] = h_new
            if t == T - 1:                   # per-layer final states
                hn_ref[l] = h_new
                cn_ref[l] = c_new


def encoder_pallas(patches, wconvT, pool, wih, whh, bias):
    # Single invocation (no grid): every operand is a whole-array VMEM block,
    # total footprint ~1 MiB, far under the scoped-VMEM limit.
    return pl.pallas_call(
        encoder_kernel,
        out_shape=(
            jax.ShapeDtypeStruct((F, HID), jnp.float32),          # [T*B, HID]
            jax.ShapeDtypeStruct((LAYERS, B, HID), jnp.float32),  # h_n
            jax.ShapeDtypeStruct((LAYERS, B, HID), jnp.float32),  # c_n
        ),
        compiler_params=pltpu.CompilerParams(
            vmem_limit_bytes=32 * 1024 * 1024),
    )(patches, wconvT, pool, wih, whh, bias)


# ---------------- glue (plain JAX): im2col / layout plumbing ---------------
def im2col(frames):
    # frames: [F, C, H, W] (time-major frame order), 3x3 conv, SAME padding.
    xp = jnp.pad(frames, ((0, 0), (0, 0), (1, 1), (1, 1)))
    taps = []
    for dh in range(KH):
        for dw in range(KW):
            taps.append(xp[:, :, dh:dh + H, dw:dw + W])      # [F, C, H, W]
    p = jnp.stack(taps, axis=2).reshape(F, CK, HW)           # [F, 27, 256]
    p = jnp.transpose(p, (1, 0, 2)).reshape(CK, FHW)         # [27, 4096]
    ones = jnp.ones((1, FHW), p.dtype)                       # conv-bias channel
    zeros = jnp.zeros((CKP - CK - 1, FHW), p.dtype)
    return jnp.concatenate([p, ones, zeros], axis=0).astype(jnp.bfloat16)


def init_canonical_params(key):
    """PyTorch-layout parameters: conv [FEAT,CK]+[FEAT]; LSTM (i,f,g,o)."""
    ks = jax.random.split(key, 6)
    s = 1.0 / jnp.sqrt(HID)
    return {
        "wconv": jax.random.normal(ks[0], (FEAT, CK), jnp.float32)
                 / jnp.sqrt(CK),
        "bconv": jax.random.normal(ks[1], (FEAT,), jnp.float32) * 0.01,
        "w_ih": jax.random.uniform(ks[2], (LAYERS, G4, HID), jnp.float32, -s, s),
        "w_hh": jax.random.uniform(ks[3], (LAYERS, G4, HID), jnp.float32, -s, s),
        "b_ih": jax.random.uniform(ks[4], (LAYERS, G4), jnp.float32, -s, s),
        "b_hh": jax.random.uniform(ks[5], (LAYERS, G4), jnp.float32, -s, s),
    }


def pack_params(canon):
    """Kernel layout: transposed weights, (i,f,g,o) -> (i,f,o,g) columns,
    conv bias folded into the padded im2col 'ones' row, bf16 MXU operands."""
    wconvT = jnp.concatenate(
        [canon["wconv"], canon["bconv"][:, None],
         jnp.zeros((FEAT, CKP - CK - 1), jnp.float32)],
        axis=1).astype(jnp.bfloat16)                               # [FEAT,CKP]
    pool = (jnp.repeat(jnp.eye(F, dtype=jnp.float32), HW, axis=1)
            / HW).astype(jnp.bfloat16)                             # [F, FHW]
    perm = jnp.concatenate([jnp.arange(0, 2 * HID),                # i, f
                            jnp.arange(3 * HID, 4 * HID),          # o
                            jnp.arange(2 * HID, 3 * HID)])         # g
    wih = jnp.transpose(canon["w_ih"], (0, 2, 1))[:, :, perm].astype(jnp.bfloat16)
    whh = jnp.transpose(canon["w_hh"], (0, 2, 1))[:, :, perm].astype(jnp.bfloat16)
    bias = (canon["b_ih"] + canon["b_hh"])[:, perm][:, None, :]    # f32 [L,1,4H]
    return {"wconvT": wconvT, "pool": pool, "wih": wih, "whh": whh, "bias": bias}


def encoder_forward(x, packed):
    # x: [B, C, T, H, W]  (PyTorch NCTHW)
    frames = jnp.transpose(x, (2, 0, 1, 3, 4)).reshape(F, C, H, W)  # time-major
    patches = im2col(frames)                                        # [CKP, FHW]
    out_flat, h_n, c_n = encoder_pallas(
        patches, packed["wconvT"], packed["pool"],
        packed["wih"], packed["whh"], packed["bias"])
    out = jnp.transpose(out_flat.reshape(T, B, HID), (1, 0, 2))     # [B, T, HID]
    return out, (h_n, c_n)


# ---------------- pure-JAX reference (canonical weights, (i,f,g,o)) --------
def reference_forward(x, canon):
    frames = jnp.transpose(x, (2, 0, 1, 3, 4)).reshape(F, C, H, W)
    patches = im2col(frames)
    wconv = jnp.concatenate([canon["wconv"], canon["bconv"][:, None]],
                            axis=1).astype(jnp.bfloat16)            # [FEAT,28]
    y = jnp.dot(wconv, patches[:CK + 1], preferred_element_type=jnp.float32)
    y = jnp.maximum(y, 0.0).astype(jnp.bfloat16)
    pool = (jnp.repeat(jnp.eye(F, dtype=jnp.float32), HW, axis=1)
            / HW).astype(jnp.bfloat16)
    feats = jax.lax.dot_general(pool, y, (((1,), (1,)), ((), ())),
                                preferred_element_type=jnp.float32)  # [F, FEAT]
    x_seq = feats.reshape(T, B, FEAT)
    h_n, c_n = [], []
    for l in range(LAYERS):
        wih = canon["w_ih"][l].T.astype(jnp.bfloat16)
        whh = canon["w_hh"][l].T.astype(jnp.bfloat16)
        b = canon["b_ih"][l] + canon["b_hh"][l]
        h = jnp.zeros((B, HID), jnp.float32)
        c = jnp.zeros((B, HID), jnp.float32)
        ys = []
        for t in range(T):
            g = (jnp.dot(x_seq[t].astype(jnp.bfloat16), wih,
                         preferred_element_type=jnp.float32)
                 + jnp.dot(h.astype(jnp.bfloat16), whh,
                           preferred_element_type=jnp.float32) + b)
            i_g = jax.nn.sigmoid(g[:, 0 * HID:1 * HID])
            f_g = jax.nn.sigmoid(g[:, 1 * HID:2 * HID])
            g_g = jnp.tanh(g[:, 2 * HID:3 * HID])
            o_g = jax.nn.sigmoid(g[:, 3 * HID:4 * HID])
            c = f_g * c + i_g * g_g
            h = o_g * jnp.tanh(c)
            ys.append(h)
        x_seq = jnp.stack(ys, axis=0)
        h_n.append(h)
        c_n.append(c)
    out = jnp.transpose(x_seq, (1, 0, 2))
    return out, (jnp.stack(h_n), jnp.stack(c_n))


if __name__ == "__main__":
    key = jax.random.PRNGKey(0)
    k_x, k_p = jax.random.split(key)
    x = jax.random.normal(k_x, (B, C, T, H, W), jnp.float32)
    canon = init_canonical_params(k_p)
    packed = pack_params(canon)

    out, (h_n, c_n) = jax.jit(encoder_forward)(x, packed)
    jax.block_until_ready((out, h_n, c_n))

    assert out.shape == (B, T, HID)
    assert h_n.shape == (LAYERS, B, HID)
    assert c_n.shape == (LAYERS, B, HID)

    # Reference mirrors the kernel's precision policy (bf16 matmul operands,
    # f32 accumulation/gates); tolerance 2e-2 covers MXU-vs-XLA accumulation
    # order and EUP transcendental-approximation deltas compounded over
    # T=8 steps x 4 layers.
    ref_out, (ref_h, ref_c) = jax.jit(reference_forward)(x, canon)
    assert float(jnp.max(jnp.abs(out - ref_out))) < 2e-2
    assert float(jnp.max(jnp.abs(h_n - ref_h))) < 2e-2
    assert float(jnp.max(jnp.abs(c_n - ref_c))) < 2e-2

    print("KERNEL_OK")
</pallas_src>

<mosaic_0001>
module attributes {stable_mosaic.version = 11 : i64} {
  func.func @encoder_kernel(%arg0: memref<32x4096xbf16, #tpu.memory_space<vmem>>, %arg1: memref<32x32xbf16, #tpu.memory_space<vmem>>, %arg2: memref<16x4096xbf16, #tpu.memory_space<vmem>>, %arg3: memref<4x32x128xbf16, #tpu.memory_space<vmem>>, %arg4: memref<4x32x128xbf16, #tpu.memory_space<vmem>>, %arg5: memref<4x1x128xf32, #tpu.memory_space<vmem>>, %arg6: memref<16x32xf32, #tpu.memory_space<vmem>>, %arg7: memref<4x2x32xf32, #tpu.memory_space<vmem>>, %arg8: memref<4x2x32xf32, #tpu.memory_space<vmem>>) attributes {dimension_semantics = [], scalar_prefetch = 0 : i64, scratch_operands = 0 : i64, tpu.core_type = #tpu.core_type<tc>} {
    %c0 = arith.constant 0 : index
    %c0_0 = arith.constant 0 : index
    %0 = vector.load %arg1[%c0, %c0_0] : memref<32x32xbf16, #tpu.memory_space<vmem>>, vector<32x32xbf16>
    %c0_1 = arith.constant 0 : index
    %c0_2 = arith.constant 0 : index
    %1 = vector.load %arg0[%c0_1, %c0_2] : memref<32x4096xbf16, #tpu.memory_space<vmem>>, vector<32x4096xbf16>
    %cst = arith.constant dense<0.000000e+00> : vector<32x4096xf32>
    %2 = tpu.matmul %0, %1, %cst {dimension_numbers = #tpu.dot_dimension_numbers<[1], [0], [0], [1], [0, 0, 1, 1], [], []>} : vector<32x32xbf16>, vector<32x4096xbf16>, vector<32x4096xf32> -> vector<32x4096xf32>
    %cst_3 = arith.constant 0.000000e+00 : f32
    %3 = vector.broadcast %cst_3 : f32 to vector<32x4096xf32>
    %4 = arith.maximumf %2, %3 : vector<32x4096xf32>
    %5 = arith.truncf %4 : vector<32x4096xf32> to vector<32x4096xbf16>
    %c0_4 = arith.constant 0 : index
    %c0_5 = arith.constant 0 : index
    %6 = vector.load %arg2[%c0_4, %c0_5] : memref<16x4096xbf16, #tpu.memory_space<vmem>>, vector<16x4096xbf16>
    %cst_6 = arith.constant dense<0.000000e+00> : vector<16x32xf32>
    %7 = tpu.matmul %6, %5, %cst_6 {dimension_numbers = #tpu.dot_dimension_numbers<[1], [1], [0], [0], [0, 0, 1, 0], [], []>} : vector<16x4096xbf16>, vector<32x4096xbf16>, vector<16x32xf32> -> vector<16x32xf32>
    %8 = arith.truncf %7 : vector<16x32xf32> to vector<16x32xbf16>
    %c0_7 = arith.constant 0 : index
    %c0_8 = arith.constant 0 : index
    %c0_9 = arith.constant 0 : index
    %9 = vector.load %arg3[%c0_7, %c0_8, %c0_9] : memref<4x32x128xbf16, #tpu.memory_space<vmem>>, vector<1x32x128xbf16>
    %10 = vector.shape_cast %9 : vector<1x32x128xbf16> to vector<32x128xbf16>
    %cst_10 = arith.constant dense<0.000000e+00> : vector<16x128xf32>
    %11 = tpu.matmul %8, %10, %cst_10 {dimension_numbers = #tpu.dot_dimension_numbers<[1], [0], [0], [1], [0, 0, 1, 1], [], []>} : vector<16x32xbf16>, vector<32x128xbf16>, vector<16x128xf32> -> vector<16x128xf32>
    %c0_11 = arith.constant 0 : index
    %c0_12 = arith.constant 0 : index
    %c0_13 = arith.constant 0 : index
    %12 = vector.load %arg5[%c0_11, %c0_12, %c0_13] : memref<4x1x128xf32, #tpu.memory_space<vmem>>, vector<1x1x128xf32>
    %13 = vector.shape_cast %12 : vector<1x1x128xf32> to vector<1x128xf32>
    %14 = vector.broadcast %13 : vector<1x128xf32> to vector<16x128xf32>
    %15 = arith.addf %11, %14 : vector<16x128xf32>
    %cst_14 = arith.constant 0.000000e+00 : f32
    %16 = vector.broadcast %cst_14 : f32 to vector<2x32xf32>
    %17 = vector.extract_strided_slice %15 {offsets = [0, 0], sizes = [2, 128], strides = [1, 1]} : vector<16x128xf32> to vector<2x128xf32>
    %18 = arith.truncf %16 : vector<2x32xf32> to vector<2x32xbf16>
    %c0_15 = arith.constant 0 : index
    %c0_16 = arith.constant 0 : index
    %c0_17 = arith.constant 0 : index
    %19 = vector.load %arg4[%c0_15, %c0_16, %c0_17] : memref<4x32x128xbf16, #tpu.memory_space<vmem>>, vector<1x32x128xbf16>
    %20 = vector.shape_cast %19 : vector<1x32x128xbf16> to vector<32x128xbf16>
    %cst_18 = arith.constant dense<0.000000e+00> : vector<2x128xf32>
    %21 = tpu.matmul %18, %20, %cst_18 {dimension_numbers = #tpu.dot_dimension_numbers<[1], [0], [0], [1], [0, 0, 1, 1], [], []>} : vector<2x32xbf16>, vector<32x128xbf16>, vector<2x128xf32> -> vector<2x128xf32>
    %22 = arith.addf %17, %21 : vector<2x128xf32>
    %23 = vector.extract_strided_slice %22 {offsets = [0, 0], sizes = [2, 96], strides = [1, 1]} : vector<2x128xf32> to vector<2x96xf32>
    %24 = arith.negf %23 : vector<2x96xf32>
    %25 = math.exp %24 : vector<2x96xf32>
    %cst_19 = arith.constant 1.000000e+00 : f32
    %26 = vector.broadcast %cst_19 : f32 to vector<2x96xf32>
    %27 = arith.addf %26, %25 : vector<2x96xf32>
    %28 = arith.divf %26, %27 : vector<2x96xf32>
    %29 = vector.extract_strided_slice %28 {offsets = [0, 0], sizes = [2, 32], strides = [1, 1]} : vector<2x96xf32> to vector<2x32xf32>
    %30 = vector.extract_strided_slice %28 {offsets = [0, 32], sizes = [2, 32], strides = [1, 1]} : vector<2x96xf32> to vector<2x32xf32>
    %31 = vector.extract_strided_slice %28 {offsets = [0, 64], sizes = [2, 32], strides = [1, 1]} : vector<2x96xf32> to vector<2x32xf32>
    %32 = vector.extract_strided_slice %22 {offsets = [0, 96], sizes = [2, 32], strides = [1, 1]} : vector<2x128xf32> to vector<2x32xf32>
    %33 = math.tanh %32 : vector<2x32xf32>
    %34 = arith.mulf %30, %16 : vector<2x32xf32>
    %35 = arith.mulf %29, %33 : vector<2x32xf32>
    %36 = arith.addf %34, %35 : vector<2x32xf32>
    %37 = math.tanh %36 : vector<2x32xf32>
    %38 = arith.mulf %31, %37 : vector<2x32xf32>
    %39 = vector.extract_strided_slice %15 {offsets = [2, 0], sizes = [2, 128], strides = [1, 1]} : vector<16x128xf32> to vector<2x128xf32>
    %40 = arith.truncf %38 : vector<2x32xf32> to vector<2x32xbf16>
    %c0_20 = arith.constant 0 : index
    %c0_21 = arith.constant 0 : index
    %c0_22 = arith.constant 0 : index
    %41 = vector.load %arg4[%c0_20, %c0_21, %c0_22] : memref<4x32x128xbf16, #tpu.memory_space<vmem>>, vector<1x32x128xbf16>
    %42 = vector.shape_cast %41 : vector<1x32x128xbf16> to vector<32x128xbf16>
    %cst_23 = arith.constant dense<0.000000e+00> : vector<2x128xf32>
    %43 = tpu.matmul %40, %42, %cst_23 {dimension_numbers = #tpu.dot_dimension_numbers<[1], [0], [0], [1], [0, 0, 1, 1], [], []>} : vector<2x32xbf16>, vector<32x128xbf16>, vector<2x128xf32> -> vector<2x128xf32>
    %44 = arith.addf %39, %43 : vector<2x128xf32>
    %45 = vector.extract_strided_slice %44 {offsets = [0, 0], sizes = [2, 96], strides = [1, 1]} : vector<2x128xf32> to vector<2x96xf32>
    %46 = arith.negf %45 : vector<2x96xf32>
    %47 = math.exp %46 : vector<2x96xf32>
    %cst_24 = arith.constant 1.000000e+00 : f32
    %48 = vector.broadcast %cst_24 : f32 to vector<2x96xf32>
    %49 = arith.addf %48, %47 : vector<2x96xf32>
    %50 = arith.divf %48, %49 : vector<2x96xf32>
    %51 = vector.extract_strided_slice %50 {offsets = [0, 0], sizes = [2, 32], strides = [1, 1]} : vector<2x96xf32> to vector<2x32xf32>
    %52 = vector.extract_strided_slice %50 {offsets = [0, 32], sizes = [2, 32], strides = [1, 1]} : vector<2x96xf32> to vector<2x32xf32>
    %53 = vector.extract_strided_slice %50 {offsets = [0, 64], sizes = [2, 32], strides = [1, 1]} : vector<2x96xf32> to vector<2x32xf32>
    %54 = vector.extract_strided_slice %44 {offsets = [0, 96], sizes = [2, 32], strides = [1, 1]} : vector<2x128xf32> to vector<2x32xf32>
    %55 = math.tanh %54 : vector<2x32xf32>
    %56 = arith.mulf %52, %36 : vector<2x32xf32>
    %57 = arith.mulf %51, %55 : vector<2x32xf32>
    %58 = arith.addf %56, %57 : vector<2x32xf32>
    %59 = math.tanh %58 : vector<2x32xf32>
    %60 = arith.mulf %53, %59 : vector<2x32xf32>
    %61 = arith.truncf %38 : vector<2x32xf32> to vector<2x32xbf16>
    %c1 = arith.constant 1 : index
    %c0_25 = arith.constant 0 : index
    %c0_26 = arith.constant 0 : index
    %62 = vector.load %arg3[%c1, %c0_25, %c0_26] : memref<4x32x128xbf16, #tpu.memory_space<vmem>>, vector<1x32x128xbf16>
    %63 = vector.shape_cast %62 : vector<1x32x128xbf16> to vector<32x128xbf16>
    %cst_27 = arith.constant dense<0.000000e+00> : vector<2x128xf32>
    %64 = tpu.matmul %61, %63, %cst_27 {dimension_numbers = #tpu.dot_dimension_numbers<[1], [0], [0], [1], [0, 0, 1, 1], [], []>} : vector<2x32xbf16>, vector<32x128xbf16>, vector<2x128xf32> -> vector<2x128xf32>
    %65 = arith.truncf %16 : vector<2x32xf32> to vector<2x32xbf16>
    %c1_28 = arith.constant 1 : index
    %c0_29 = arith.constant 0 : index
    %c0_30 = arith.constant 0 : index
    %66 = vector.load %arg4[%c1_28, %c0_29, %c0_30] : memref<4x32x128xbf16, #tpu.memory_space<vmem>>, vector<1x32x128xbf16>
    %67 = vector.shape_cast %66 : vector<1x32x128xbf16> to vector<32x128xbf16>
    %cst_31 = arith.constant dense<0.000000e+00> : vector<2x128xf32>
    %68 = tpu.matmul %65, %67, %cst_31 {dimension_numbers = #tpu.dot_dimension_numbers<[1], [0], [0], [1], [0, 0, 1, 1], [], []>} : vector<2x32xbf16>, vector<32x128xbf16>, vector<2x128xf32> -> vector<2x128xf32>
    %69 = arith.addf %64, %68 : vector<2x128xf32>
    %c1_32 = arith.constant 1 : index
    %c0_33 = arith.constant 0 : index
    %c0_34 = arith.constant 0 : index
    %70 = vector.load %arg5[%c1_32, %c0_33, %c0_34] : memref<4x1x128xf32, #tpu.memory_space<vmem>>, vector<1x1x128xf32>
    %71 = vector.shape_cast %70 : vector<1x1x128xf32> to vector<1x128xf32>
    %72 = vector.broadcast %71 : vector<1x128xf32> to vector<2x128xf32>
    %73 = arith.addf %69, %72 : vector<2x128xf32>
    %74 = vector.extract_strided_slice %73 {offsets = [0, 0], sizes = [2, 96], strides = [1, 1]} : vector<2x128xf32> to vector<2x96xf32>
    %75 = arith.negf %74 : vector<2x96xf32>
    %76 = math.exp %75 : vector<2x96xf32>
    %cst_35 = arith.constant 1.000000e+00 : f32
    %77 = vector.broadcast %cst_35 : f32 to vector<2x96xf32>
    %78 = arith.addf %77, %76 : vector<2x96xf32>
    %79 = arith.divf %77, %78 : vector<2x96xf32>
    %80 = vector.extract_strided_slice %79 {offsets = [0, 0], sizes = [2, 32], strides = [1, 1]} : vector<2x96xf32> to vector<2x32xf32>
    %81 = vector.extract_strided_slice %79 {offsets = [0, 32], sizes = [2, 32], strides = [1, 1]} : vector<2x96xf32> to vector<2x32xf32>
    %82 = vector.extract_strided_slice %79 {offsets = [0, 64], sizes = [2, 32], strides = [1, 1]} : vector<2x96xf32> to vector<2x32xf32>
    %83 = vector.extract_strided_slice %73 {offsets = [0, 96], sizes = [2, 32], strides = [1, 1]} : vector<2x128xf32> to vector<2x32xf32>
    %84 = math.tanh %83 : vector<2x32xf32>
    %85 = arith.mulf %81, %16 : vector<2x32xf32>
    %86 = arith.mulf %80, %84 : vector<2x32xf32>
    %87 = arith.addf %85, %86 : vector<2x32xf32>
    %88 = math.tanh %87 : vector<2x32xf32>
    %89 = arith.mulf %82, %88 : vector<2x32xf32>
    %90 = vector.extract_strided_slice %15 {offsets = [4, 0], sizes = [2, 128], strides = [1, 1]} : vector<16x128xf32> to vector<2x128xf32>
    %91 = arith.truncf %60 : vector<2x32xf32> to vector<2x32xbf16>
    %c0_36 = arith.constant 0 : index
    %c0_37 = arith.constant 0 : index
    %c0_38 = arith.constant 0 : index
    %92 = vector.load %arg4[%c0_36, %c0_37, %c0_38] : memref<4x32x128xbf16, #tpu.memory_space<vmem>>, vector<1x32x128xbf16>
    %93 = vector.shape_cast %92 : vector<1x32x128xbf16> to vector<32x128xbf16>
    %cst_39 = arith.constant dense<0.000000e+00> : vector<2x128xf32>
    %94 = tpu.matmul %91, %93, %cst_39 {dimension_numbers = #tpu.dot_dimension_numbers<[1], [0], [0], [1], [0, 0, 1, 1], [], []>} : vector<2x32xbf16>, vector<32x128xbf16>, vector<2x128xf32> -> vector<2x128xf32>
    %95 = arith.addf %90, %94 : vector<2x128xf32>
    %96 = vector.extract_strided_slice %95 {offsets = [0, 0], sizes = [2, 96], strides = [1, 1]} : vector<2x128xf32> to vector<2x96xf32>
    %97 = arith.negf %96 : vector<2x96xf32>
    %98 = math.exp %97 : vector<2x96xf32>
    %cst_40 = arith.constant 1.000000e+00 : f32
    %99 = vector.broadcast %cst_40 : f32 to vector<2x96xf32>
    %100 = arith.addf %99, %98 : vector<2x96xf32>
    %101 = arith.divf %99, %100 : vector<2x96xf32>
    %102 = vector.extract_strided_slice %101 {offsets = [0, 0], sizes = [2, 32], strides = [1, 1]} : vector<2x96xf32> to vector<2x32xf32>
    %103 = vector.extract_strided_slice %101 {offsets = [0, 32], sizes = [2, 32], strides = [1, 1]} : vector<2x96xf32> to vector<2x32xf32>
    %104 = vector.extract_strided_slice %101 {offsets = [0, 64], sizes = [2, 32], strides = [1, 1]} : vector<2x96xf32> to vector<2x32xf32>
    %105 = vector.extract_strided_slice %95 {offsets = [0, 96], sizes = [2, 32], strides = [1, 1]} : vector<2x128xf32> to vector<2x32xf32>
    %106 = math.tanh %105 : vector<2x32xf32>
    %107 = arith.mulf %103, %58 : vector<2x32xf32>
    %108 = arith.mulf %102, %106 : vector<2x32xf32>
    %109 = arith.addf %107, %108 : vector<2x32xf32>
    %110 = math.tanh %109 : vector<2x32xf32>
    %111 = arith.mulf %104, %110 : vector<2x32xf32>
    %112 = arith.truncf %60 : vector<2x32xf32> to vector<2x32xbf16>
    %c1_41 = arith.constant 1 : index
    %c0_42 = arith.constant 0 : index
    %c0_43 = arith.constant 0 : index
    %113 = vector.load %arg3[%c1_41, %c0_42, %c0_43] : memref<4x32x128xbf16, #tpu.memory_space<vmem>>, vector<1x32x128xbf16>
    %114 = vector.shape_cast %113 : vector<1x32x128xbf16> to vector<32x128xbf16>
    %cst_44 = arith.constant dense<0.000000e+00> : vector<2x128xf32>
    %115 = tpu.matmul %112, %114, %cst_44 {dimension_numbers = #tpu.dot_dimension_numbers<[1], [0], [0], [1], [0, 0, 1, 1], [], []>} : vector<2x32xbf16>, vector<32x128xbf16>, vector<2x128xf32> -> vector<2x128xf32>
    %116 = arith.truncf %89 : vector<2x32xf32> to vector<2x32xbf16>
    %c1_45 = arith.constant 1 : index
    %c0_46 = arith.constant 0 : index
    %c0_47 = arith.constant 0 : index
    %117 = vector.load %arg4[%c1_45, %c0_46, %c0_47] : memref<4x32x128xbf16, #tpu.memory_space<vmem>>, vector<1x32x128xbf16>
    %118 = vector.shape_cast %117 : vector<1x32x128xbf16> to vector<32x128xbf16>
    %cst_48 = arith.constant dense<0.000000e+00> : vector<2x128xf32>
    %119 = tpu.matmul %116, %118, %cst_48 {dimension_numbers = #tpu.dot_dimension_numbers<[1], [0], [0], [1], [0, 0, 1, 1], [], []>} : vector<2x32xbf16>, vector<32x128xbf16>, vector<2x128xf32> -> vector<2x128xf32>
    %120 = arith.addf %115, %119 : vector<2x128xf32>
    %c1_49 = arith.constant 1 : index
    %c0_50 = arith.constant 0 : index
    %c0_51 = arith.constant 0 : index
    %121 = vector.load %arg5[%c1_49, %c0_50, %c0_51] : memref<4x1x128xf32, #tpu.memory_space<vmem>>, vector<1x1x128xf32>
    %122 = vector.shape_cast %121 : vector<1x1x128xf32> to vector<1x128xf32>
    %123 = vector.broadcast %122 : vector<1x128xf32> to vector<2x128xf32>
    %124 = arith.addf %120, %123 : vector<2x128xf32>
    %125 = vector.extract_strided_slice %124 {offsets = [0, 0], sizes = [2, 96], strides = [1, 1]} : vector<2x128xf32> to vector<2x96xf32>
    %126 = arith.negf %125 : vector<2x96xf32>
    %127 = math.exp %126 : vector<2x96xf32>
    %cst_52 = arith.constant 1.000000e+00 : f32
    %128 = vector.broadcast %cst_52 : f32 to vector<2x96xf32>
    %129 = arith.addf %128, %127 : vector<2x96xf32>
    %130 = arith.divf %128, %129 : vector<2x96xf32>
    %131 = vector.extract_strided_slice %130 {offsets = [0, 0], sizes = [2, 32], strides = [1, 1]} : vector<2x96xf32> to vector<2x32xf32>
    %132 = vector.extract_strided_slice %130 {offsets = [0, 32], sizes = [2, 32], strides = [1, 1]} : vector<2x96xf32> to vector<2x32xf32>
    %133 = vector.extract_strided_slice %130 {offsets = [0, 64], sizes = [2, 32], strides = [1, 1]} : vector<2x96xf32> to vector<2x32xf32>
    %134 = vector.extract_strided_slice %124 {offsets = [0, 96], sizes = [2, 32], strides = [1, 1]} : vector<2x128xf32> to vector<2x32xf32>
    %135 = math.tanh %134 : vector<2x32xf32>
    %136 = arith.mulf %132, %87 : vector<2x32xf32>
    %137 = arith.mulf %131, %135 : vector<2x32xf32>
    %138 = arith.addf %136, %137 : vector<2x32xf32>
    %139 = math.tanh %138 : vector<2x32xf32>
    %140 = arith.mulf %133, %139 : vector<2x32xf32>
    %141 = arith.truncf %89 : vector<2x32xf32> to vector<2x32xbf16>
    %c2 = arith.constant 2 : index
    %c0_53 = arith.constant 0 : index
    %c0_54 = arith.constant 0 : index
    %142 = vector.load %arg3[%c2, %c0_53, %c0_54] : memref<4x32x128xbf16, #tpu.memory_space<vmem>>, vector<1x32x128xbf16>
    %143 = vector.shape_cast %142 : vector<1x32x128xbf16> to vector<32x128xbf16>
    %cst_55 = arith.constant dense<0.000000e+00> : vector<2x128xf32>
    %144 = tpu.matmul %141, %143, %cst_55 {dimension_numbers = #tpu.dot_dimension_numbers<[1], [0], [0], [1], [0, 0, 1, 1], [], []>} : vector<2x32xbf16>, vector<32x128xbf16>, vector<2x128xf32> -> vector<2x128xf32>
    %145 = arith.truncf %16 : vector<2x32xf32> to vector<2x32xbf16>
    %c2_56 = arith.constant 2 : index
    %c0_57 = arith.constant 0 : index
    %c0_58 = arith.constant 0 : index
    %146 = vector.load %arg4[%c2_56, %c0_57, %c0_58] : memref<4x32x128xbf16, #tpu.memory_space<vmem>>, vector<1x32x128xbf16>
    %147 = vector.shape_cast %146 : vector<1x32x128xbf16> to vector<32x128xbf16>
    %cst_59 = arith.constant dense<0.000000e+00> : vector<2x128xf32>
    %148 = tpu.matmul %145, %147, %cst_59 {dimension_numbers = #tpu.dot_dimension_numbers<[1], [0], [0], [1], [0, 0, 1, 1], [], []>} : vector<2x32xbf16>, vector<32x128xbf16>, vector<2x128xf32> -> vector<2x128xf32>
    %149 = arith.addf %144, %148 : vector<2x128xf32>
    %c2_60 = arith.constant 2 : index
    %c0_61 = arith.constant 0 : index
    %c0_62 = arith.constant 0 : index
    %150 = vector.load %arg5[%c2_60, %c0_61, %c0_62] : memref<4x1x128xf32, #tpu.memory_space<vmem>>, vector<1x1x128xf32>
    %151 = vector.shape_cast %150 : vector<1x1x128xf32> to vector<1x128xf32>
    %152 = vector.broadcast %151 : vector<1x128xf32> to vector<2x128xf32>
    %153 = arith.addf %149, %152 : vector<2x128xf32>
    %154 = vector.extract_strided_slice %153 {offsets = [0, 0], sizes = [2, 96], strides = [1, 1]} : vector<2x128xf32> to vector<2x96xf32>
    %155 = arith.negf %154 : vector<2x96xf32>
    %156 = math.exp %155 : vector<2x96xf32>
    %cst_63 = arith.constant 1.000000e+00 : f32
    %157 = vector.broadcast %cst_63 : f32 to vector<2x96xf32>
    %158 = arith.addf %157, %156 : vector<2x96xf32>
    %159 = arith.divf %157, %158 : vector<2x96xf32>
    %160 = vector.extract_strided_slice %159 {offsets = [0, 0], sizes = [2, 32], strides = [1, 1]} : vector<2x96xf32> to vector<2x32xf32>
    %161 = vector.extract_strided_slice %159 {offsets = [0, 32], sizes = [2, 32], strides = [1, 1]} : vector<2x96xf32> to vector<2x32xf32>
    %162 = vector.extract_strided_slice %159 {offsets = [0, 64], sizes = [2, 32], strides = [1, 1]} : vector<2x96xf32> to vector<2x32xf32>
    %163 = vector.extract_strided_slice %153 {offsets = [0, 96], sizes = [2, 32], strides = [1, 1]} : vector<2x128xf32> to vector<2x32xf32>
    %164 = math.tanh %163 : vector<2x32xf32>
    %165 = arith.mulf %161, %16 : vector<2x32xf32>
    %166 = arith.mulf %160, %164 : vector<2x32xf32>
    %167 = arith.addf %165, %166 : vector<2x32xf32>
    %168 = math.tanh %167 : vector<2x32xf32>
    %169 = arith.mulf %162, %168 : vector<2x32xf32>
    %170 = vector.extract_strided_slice %15 {offsets = [6, 0], sizes = [2, 128], strides = [1, 1]} : vector<16x128xf32> to vector<2x128xf32>
    %171 = arith.truncf %111 : vector<2x32xf32> to vector<2x32xbf16>
    %c0_64 = arith.constant 0 : index
    %c0_65 = arith.constant 0 : index
    %c0_66 = arith.constant 0 : index
    %172 = vector.load %arg4[%c0_64, %c0_65, %c0_66] : memref<4x32x128xbf16, #tpu.memory_space<vmem>>, vector<1x32x128xbf16>
    %173 = vector.shape_cast %172 : vector<1x32x128xbf16> to vector<32x128xbf16>
    %cst_67 = arith.constant dense<0.000000e+00> : vector<2x128xf32>
    %174 = tpu.matmul %171, %173, %cst_67 {dimension_numbers = #tpu.dot_dimension_numbers<[1], [0], [0], [1], [0, 0, 1, 1], [], []>} : vector<2x32xbf16>, vector<32x128xbf16>, vector<2x128xf32> -> vector<2x128xf32>
    %175 = arith.addf %170, %174 : vector<2x128xf32>
    %176 = vector.extract_strided_slice %175 {offsets = [0, 0], sizes = [2, 96], strides = [1, 1]} : vector<2x128xf32> to vector<2x96xf32>
    %177 = arith.negf %176 : vector<2x96xf32>
    %178 = math.exp %177 : vector<2x96xf32>
    %cst_68 = arith.constant 1.000000e+00 : f32
    %179 = vector.broadcast %cst_68 : f32 to vector<2x96xf32>
    %180 = arith.addf %179, %178 : vector<2x96xf32>
    %181 = arith.divf %179, %180 : vector<2x96xf32>
    %182 = vector.extract_strided_slice %181 {offsets = [0, 0], sizes = [2, 32], strides = [1, 1]} : vector<2x96xf32> to vector<2x32xf32>
    %183 = vector.extract_strided_slice %181 {offsets = [0, 32], sizes = [2, 32], strides = [1, 1]} : vector<2x96xf32> to vector<2x32xf32>
    %184 = vector.extract_strided_slice %181 {offsets = [0, 64], sizes = [2, 32], strides = [1, 1]} : vector<2x96xf32> to vector<2x32xf32>
    %185 = vector.extract_strided_slice %175 {offsets = [0, 96], sizes = [2, 32], strides = [1, 1]} : vector<2x128xf32> to vector<2x32xf32>
    %186 = math.tanh %185 : vector<2x32xf32>
    %187 = arith.mulf %183, %109 : vector<2x32xf32>
    %188 = arith.mulf %182, %186 : vector<2x32xf32>
    %189 = arith.addf %187, %188 : vector<2x32xf32>
    %190 = math.tanh %189 : vector<2x32xf32>
    %191 = arith.mulf %184, %190 : vector<2x32xf32>
    %192 = arith.truncf %111 : vector<2x32xf32> to vector<2x32xbf16>
    %c1_69 = arith.constant 1 : index
    %c0_70 = arith.constant 0 : index
    %c0_71 = arith.constant 0 : index
    %193 = vector.load %arg3[%c1_69, %c0_70, %c0_71] : memref<4x32x128xbf16, #tpu.memory_space<vmem>>, vector<1x32x128xbf16>
    %194 = vector.shape_cast %193 : vector<1x32x128xbf16> to vector<32x128xbf16>
    %cst_72 = arith.constant dense<0.000000e+00> : vector<2x128xf32>
    %195 = tpu.matmul %192, %194, %cst_72 {dimension_numbers = #tpu.dot_dimension_numbers<[1], [0], [0], [1], [0, 0, 1, 1], [], []>} : vector<2x32xbf16>, vector<32x128xbf16>, vector<2x128xf32> -> vector<2x128xf32>
    %196 = arith.truncf %140 : vector<2x32xf32> to vector<2x32xbf16>
    %c1_73 = arith.constant 1 : index
    %c0_74 = arith.constant 0 : index
    %c0_75 = arith.constant 0 : index
    %197 = vector.load %arg4[%c1_73, %c0_74, %c0_75] : memref<4x32x128xbf16, #tpu.memory_space<vmem>>, vector<1x32x128xbf16>
    %198 = vector.shape_cast %197 : vector<1x32x128xbf16> to vector<32x128xbf16>
    %cst_76 = arith.constant dense<0.000000e+00> : vector<2x128xf32>
    %199 = tpu.matmul %196, %198, %cst_76 {dimension_numbers = #tpu.dot_dimension_numbers<[1], [0], [0], [1], [0, 0, 1, 1], [], []>} : vector<2x32xbf16>, vector<32x128xbf16>, vector<2x128xf32> -> vector<2x128xf32>
    %200 = arith.addf %195, %199 : vector<2x128xf32>
    %c1_77 = arith.constant 1 : index
    %c0_78 = arith.constant 0 : index
    %c0_79 = arith.constant 0 : index
    %201 = vector.load %arg5[%c1_77, %c0_78, %c0_79] : memref<4x1x128xf32, #tpu.memory_space<vmem>>, vector<1x1x128xf32>
    %202 = vector.shape_cast %201 : vector<1x1x128xf32> to vector<1x128xf32>
    %203 = vector.broadcast %202 : vector<1x128xf32> to vector<2x128xf32>
    %204 = arith.addf %200, %203 : vector<2x128xf32>
    %205 = vector.extract_strided_slice %204 {offsets = [0, 0], sizes = [2, 96], strides = [1, 1]} : vector<2x128xf32> to vector<2x96xf32>
    %206 = arith.negf %205 : vector<2x96xf32>
    %207 = math.exp %206 : vector<2x96xf32>
    %cst_80 = arith.constant 1.000000e+00 : f32
    %208 = vector.broadcast %cst_80 : f32 to vector<2x96xf32>
    %209 = arith.addf %208, %207 : vector<2x96xf32>
    %210 = arith.divf %208, %209 : vector<2x96xf32>
    %211 = vector.extract_strided_slice %210 {offsets = [0, 0], sizes = [2, 32], strides = [1, 1]} : vector<2x96xf32> to vector<2x32xf32>
    %212 = vector.extract_strided_slice %210 {offsets = [0, 32], sizes = [2, 32], strides = [1, 1]} : vector<2x96xf32> to vector<2x32xf32>
    %213 = vector.extract_strided_slice %210 {offsets = [0, 64], sizes = [2, 32], strides = [1, 1]} : vector<2x96xf32> to vector<2x32xf32>
    %214 = vector.extract_strided_slice %204 {offsets = [0, 96], sizes = [2, 32], strides = [1, 1]} : vector<2x128xf32> to vector<2x32xf32>
    %215 = math.tanh %214 : vector<2x32xf32>
    %216 = arith.mulf %212, %138 : vector<2x32xf32>
    %217 = arith.mulf %211, %215 : vector<2x32xf32>
    %218 = arith.addf %216, %217 : vector<2x32xf32>
    %219 = math.tanh %218 : vector<2x32xf32>
    %220 = arith.mulf %213, %219 : vector<2x32xf32>
    %221 = arith.truncf %140 : vector<2x32xf32> to vector<2x32xbf16>
    %c2_81 = arith.constant 2 : index
    %c0_82 = arith.constant 0 : index
    %c0_83 = arith.constant 0 : index
    %222 = vector.load %arg3[%c2_81, %c0_82, %c0_83] : memref<4x32x128xbf16, #tpu.memory_space<vmem>>, vector<1x32x128xbf16>
    %223 = vector.shape_cast %222 : vector<1x32x128xbf16> to vector<32x128xbf16>
    %cst_84 = arith.constant dense<0.000000e+00> : vector<2x128xf32>
    %224 = tpu.matmul %221, %223, %cst_84 {dimension_numbers = #tpu.dot_dimension_numbers<[1], [0], [0], [1], [0, 0, 1, 1], [], []>} : vector<2x32xbf16>, vector<32x128xbf16>, vector<2x128xf32> -> vector<2x128xf32>
    %225 = arith.truncf %169 : vector<2x32xf32> to vector<2x32xbf16>
    %c2_85 = arith.constant 2 : index
    %c0_86 = arith.constant 0 : index
    %c0_87 = arith.constant 0 : index
    %226 = vector.load %arg4[%c2_85, %c0_86, %c0_87] : memref<4x32x128xbf16, #tpu.memory_space<vmem>>, vector<1x32x128xbf16>
    %227 = vector.shape_cast %226 : vector<1x32x128xbf16> to vector<32x128xbf16>
    %cst_88 = arith.constant dense<0.000000e+00> : vector<2x128xf32>
    %228 = tpu.matmul %225, %227, %cst_88 {dimension_numbers = #tpu.dot_dimension_numbers<[1], [0], [0], [1], [0, 0, 1, 1], [], []>} : vector<2x32xbf16>, vector<32x128xbf16>, vector<2x128xf32> -> vector<2x128xf32>
    %229 = arith.addf %224, %228 : vector<2x128xf32>
    %c2_89 = arith.constant 2 : index
    %c0_90 = arith.constant 0 : index
    %c0_91 = arith.constant 0 : index
    %230 = vector.load %arg5[%c2_89, %c0_90, %c0_91] : memref<4x1x128xf32, #tpu.memory_space<vmem>>, vector<1x1x128xf32>
    %231 = vector.shape_cast %230 : vector<1x1x128xf32> to vector<1x128xf32>
    %232 = vector.broadcast %231 : vector<1x128xf32> to vector<2x128xf32>
    %233 = arith.addf %229, %232 : vector<2x128xf32>
    %234 = vector.extract_strided_slice %233 {offsets = [0, 0], sizes = [2, 96], strides = [1, 1]} : vector<2x128xf32> to vector<2x96xf32>
    %235 = arith.negf %234 : vector<2x96xf32>
    %236 = math.exp %235 : vector<2x96xf32>
    %cst_92 = arith.constant 1.000000e+00 : f32
    %237 = vector.broadcast %cst_92 : f32 to vector<2x96xf32>
    %238 = arith.addf %237, %236 : vector<2x96xf32>
    %239 = arith.divf %237, %238 : vector<2x96xf32>
    %240 = vector.extract_strided_slice %239 {offsets = [0, 0], sizes = [2, 32], strides = [1, 1]} : vector<2x96xf32> to vector<2x32xf32>
    %241 = vector.extract_strided_slice %239 {offsets = [0, 32], sizes = [2, 32], strides = [1, 1]} : vector<2x96xf32> to vector<2x32xf32>
    %242 = vector.extract_strided_slice %239 {offsets = [0, 64], sizes = [2, 32], strides = [1, 1]} : vector<2x96xf32> to vector<2x32xf32>
    %243 = vector.extract_strided_slice %233 {offsets = [0, 96], sizes = [2, 32], strides = [1, 1]} : vector<2x128xf32> to vector<2x32xf32>
    %244 = math.tanh %243 : vector<2x32xf32>
    %245 = arith.mulf %241, %167 : vector<2x32xf32>
    %246 = arith.mulf %240, %244 : vector<2x32xf32>
    %247 = arith.addf %245, %246 : vector<2x32xf32>
    %248 = math.tanh %247 : vector<2x32xf32>
    %249 = arith.mulf %242, %248 : vector<2x32xf32>
    %250 = arith.truncf %169 : vector<2x32xf32> to vector<2x32xbf16>
    %c3 = arith.constant 3 : index
    %c0_93 = arith.constant 0 : index
    %c0_94 = arith.constant 0 : index
    %251 = vector.load %arg3[%c3, %c0_93, %c0_94] : memref<4x32x128xbf16, #tpu.memory_space<vmem>>, vector<1x32x128xbf16>
    %252 = vector.shape_cast %251 : vector<1x32x128xbf16> to vector<32x128xbf16>
    %cst_95 = arith.constant dense<0.000000e+00> : vector<2x128xf32>
    %253 = tpu.matmul %250, %252, %cst_95 {dimension_numbers = #tpu.dot_dimension_numbers<[1], [0], [0], [1], [0, 0, 1, 1], [], []>} : vector<2x32xbf16>, vector<32x128xbf16>, vector<2x128xf32> -> vector<2x128xf32>
    %254 = arith.truncf %16 : vector<2x32xf32> to vector<2x32xbf16>
    %c3_96 = arith.constant 3 : index
    %c0_97 = arith.constant 0 : index
    %c0_98 = arith.constant 0 : index
    %255 = vector.load %arg4[%c3_96, %c0_97, %c0_98] : memref<4x32x128xbf16, #tpu.memory_space<vmem>>, vector<1x32x128xbf16>
    %256 = vector.shape_cast %255 : vector<1x32x128xbf16> to vector<32x128xbf16>
    %cst_99 = arith.constant dense<0.000000e+00> : vector<2x128xf32>
    %257 = tpu.matmul %254, %256, %cst_99 {dimension_numbers = #tpu.dot_dimension_numbers<[1], [0], [0], [1], [0, 0, 1, 1], [], []>} : vector<2x32xbf16>, vector<32x128xbf16>, vector<2x128xf32> -> vector<2x128xf32>
    %258 = arith.addf %253, %257 : vector<2x128xf32>
    %c3_100 = arith.constant 3 : index
    %c0_101 = arith.constant 0 : index
    %c0_102 = arith.constant 0 : index
    %259 = vector.load %arg5[%c3_100, %c0_101, %c0_102] : memref<4x1x128xf32, #tpu.memory_space<vmem>>, vector<1x1x128xf32>
    %260 = vector.shape_cast %259 : vector<1x1x128xf32> to vector<1x128xf32>
    %261 = vector.broadcast %260 : vector<1x128xf32> to vector<2x128xf32>
    %262 = arith.addf %258, %261 : vector<2x128xf32>
    %263 = vector.extract_strided_slice %262 {offsets = [0, 0], sizes = [2, 96], strides = [1, 1]} : vector<2x128xf32> to vector<2x96xf32>
    %264 = arith.negf %263 : vector<2x96xf32>
    %265 = math.exp %264 : vector<2x96xf32>
    %cst_103 = arith.constant 1.000000e+00 : f32
    %266 = vector.broadcast %cst_103 : f32 to vector<2x96xf32>
    %267 = arith.addf %266, %265 : vector<2x96xf32>
    %268 = arith.divf %266, %267 : vector<2x96xf32>
    %269 = vector.extract_strided_slice %268 {offsets = [0, 0], sizes = [2, 32], strides = [1, 1]} : vector<2x96xf32> to vector<2x32xf32>
    %270 = vector.extract_strided_slice %268 {offsets = [0, 32], sizes = [2, 32], strides = [1, 1]} : vector<2x96xf32> to vector<2x32xf32>
    %271 = vector.extract_strided_slice %268 {offsets = [0, 64], sizes = [2, 32], strides = [1, 1]} : vector<2x96xf32> to vector<2x32xf32>
    %272 = vector.extract_strided_slice %262 {offsets = [0, 96], sizes = [2, 32], strides = [1, 1]} : vector<2x128xf32> to vector<2x32xf32>
    %273 = math.tanh %272 : vector<2x32xf32>
    %274 = arith.mulf %270, %16 : vector<2x32xf32>
    %275 = arith.mulf %269, %273 : vector<2x32xf32>
    %276 = arith.addf %274, %275 : vector<2x32xf32>
    %277 = math.tanh %276 : vector<2x32xf32>
    %278 = arith.mulf %271, %277 : vector<2x32xf32>
    %c0_104 = arith.constant 0 : index
    %c0_105 = arith.constant 0 : index
    %279 = vector.load %arg6[%c0_104, %c0_105] : memref<16x32xf32, #tpu.memory_space<vmem>>, vector<2x32xf32>
    tpu.vector_store %arg6[%c0_104, %c0_105], %278 {strides = array<i32>} : memref<16x32xf32, #tpu.memory_space<vmem>>, vector<2x32xf32>,
    %280 = vector.extract_strided_slice %15 {offsets = [8, 0], sizes = [2, 128], strides = [1, 1]} : vector<16x128xf32> to vector<2x128xf32>
    %281 = arith.truncf %191 : vector<2x32xf32> to vector<2x32xbf16>
    %c0_106 = arith.constant 0 : index
    %c0_107 = arith.constant 0 : index
    %c0_108 = arith.constant 0 : index
    %282 = vector.load %arg4[%c0_106, %c0_107, %c0_108] : memref<4x32x128xbf16, #tpu.memory_space<vmem>>, vector<1x32x128xbf16>
    %283 = vector.shape_cast %282 : vector<1x32x128xbf16> to vector<32x128xbf16>
    %cst_109 = arith.constant dense<0.000000e+00> : vector<2x128xf32>
    %284 = tpu.matmul %281, %283, %cst_109 {dimension_numbers = #tpu.dot_dimension_numbers<[1], [0], [0], [1], [0, 0, 1, 1], [], []>} : vector<2x32xbf16>, vector<32x128xbf16>, vector<2x128xf32> -> vector<2x128xf32>
    %285 = arith.addf %280, %284 : vector<2x128xf32>
    %286 = vector.extract_strided_slice %285 {offsets = [0, 0], sizes = [2, 96], strides = [1, 1]} : vector<2x128xf32> to vector<2x96xf32>
    %287 = arith.negf %286 : vector<2x96xf32>
    %288 = math.exp %287 : vector<2x96xf32>
    %cst_110 = arith.constant 1.000000e+00 : f32
    %289 = vector.broadcast %cst_110 : f32 to vector<2x96xf32>
    %290 = arith.addf %289, %288 : vector<2x96xf32>
    %291 = arith.divf %289, %290 : vector<2x96xf32>
    %292 = vector.extract_strided_slice %291 {offsets = [0, 0], sizes = [2, 32], strides = [1, 1]} : vector<2x96xf32> to vector<2x32xf32>
    %293 = vector.extract_strided_slice %291 {offsets = [0, 32], sizes = [2, 32], strides = [1, 1]} : vector<2x96xf32> to vector<2x32xf32>
    %294 = vector.extract_strided_slice %291 {offsets = [0, 64], sizes = [2, 32], strides = [1, 1]} : vector<2x96xf32> to vector<2x32xf32>
    %295 = vector.extract_strided_slice %285 {offsets = [0, 96], sizes = [2, 32], strides = [1, 1]} : vector<2x128xf32> to vector<2x32xf32>
    %296 = math.tanh %295 : vector<2x32xf32>
    %297 = arith.mulf %293, %189 : vector<2x32xf32>
    %298 = arith.mulf %292, %296 : vector<2x32xf32>
    %299 = arith.addf %297, %298 : vector<2x32xf32>
    %300 = math.tanh %299 : vector<2x32xf32>
    %301 = arith.mulf %294, %300 : vector<2x32xf32>
    %302 = arith.truncf %191 : vector<2x32xf32> to vector<2x32xbf16>
    %c1_111 = arith.constant 1 : index
    %c0_112 = arith.constant 0 : index
    %c0_113 = arith.constant 0 : index
    %303 = vector.load %arg3[%c1_111, %c0_112, %c0_113] : memref<4x32x128xbf16, #tpu.memory_space<vmem>>, vector<1x32x128xbf16>
    %304 = vector.shape_cast %303 : vector<1x32x128xbf16> to vector<32x128xbf16>
    %cst_114 = arith.constant dense<0.000000e+00> : vector<2x128xf32>
    %305 = tpu.matmul %302, %304, %cst_114 {dimension_numbers = #tpu.dot_dimension_numbers<[1], [0], [0], [1], [0, 0, 1, 1], [], []>} : vector<2x32xbf16>, vector<32x128xbf16>, vector<2x128xf32> -> vector<2x128xf32>
    %306 = arith.truncf %220 : vector<2x32xf32> to vector<2x32xbf16>
    %c1_115 = arith.constant 1 : index
    %c0_116 = arith.constant 0 : index
    %c0_117 = arith.constant 0 : index
    %307 = vector.load %arg4[%c1_115, %c0_116, %c0_117] : memref<4x32x128xbf16, #tpu.memory_space<vmem>>, vector<1x32x128xbf16>
    %308 = vector.shape_cast %307 : vector<1x32x128xbf16> to vector<32x128xbf16>
    %cst_118 = arith.constant dense<0.000000e+00> : vector<2x128xf32>
    %309 = tpu.matmul %306, %308, %cst_118 {dimension_numbers = #tpu.dot_dimension_numbers<[1], [0], [0], [1], [0, 0, 1, 1], [], []>} : vector<2x32xbf16>, vector<32x128xbf16>, vector<2x128xf32> -> vector<2x128xf32>
    %310 = arith.addf %305, %309 : vector<2x128xf32>
    %c1_119 = arith.constant 1 : index
    %c0_120 = arith.constant 0 : index
    %c0_121 = arith.constant 0 : index
    %311 = vector.load %arg5[%c1_119, %c0_120, %c0_121] : memref<4x1x128xf32, #tpu.memory_space<vmem>>, vector<1x1x128xf32>
    %312 = vector.shape_cast %311 : vector<1x1x128xf32> to vector<1x128xf32>
    %313 = vector.broadcast %312 : vector<1x128xf32> to vector<2x128xf32>
    %314 = arith.addf %310, %313 : vector<2x128xf32>
    %315 = vector.extract_strided_slice %314 {offsets = [0, 0], sizes = [2, 96], strides = [1, 1]} : vector<2x128xf32> to vector<2x96xf32>
    %316 = arith.negf %315 : vector<2x96xf32>
    %317 = math.exp %316 : vector<2x96xf32>
    %cst_122 = arith.constant 1.000000e+00 : f32
    %318 = vector.broadcast %cst_122 : f32 to vector<2x96xf32>
    %319 = arith.addf %318, %317 : vector<2x96xf32>
    %320 = arith.divf %318, %319 : vector<2x96xf32>
    %321 = vector.extract_strided_slice %320 {offsets = [0, 0], sizes = [2, 32], strides = [1, 1]} : vector<2x96xf32> to vector<2x32xf32>
    %322 = vector.extract_strided_slice %320 {offsets = [0, 32], sizes = [2, 32], strides = [1, 1]} : vector<2x96xf32> to vector<2x32xf32>
    %323 = vector.extract_strided_slice %320 {offsets = [0, 64], sizes = [2, 32], strides = [1, 1]} : vector<2x96xf32> to vector<2x32xf32>
    %324 = vector.extract_strided_slice %314 {offsets = [0, 96], sizes = [2, 32], strides = [1, 1]} : vector<2x128xf32> to vector<2x32xf32>
    %325 = math.tanh %324 : vector<2x32xf32>
    %326 = arith.mulf %322, %218 : vector<2x32xf32>
    %327 = arith.mulf %321, %325 : vector<2x32xf32>
    %328 = arith.addf %326, %327 : vector<2x32xf32>
    %329 = math.tanh %328 : vector<2x32xf32>
    %330 = arith.mulf %323, %329 : vector<2x32xf32>
    %331 = arith.truncf %220 : vector<2x32xf32> to vector<2x32xbf16>
    %c2_123 = arith.constant 2 : index
    %c0_124 = arith.constant 0 : index
    %c0_125 = arith.constant 0 : index
    %332 = vector.load %arg3[%c2_123, %c0_124, %c0_125] : memref<4x32x128xbf16, #tpu.memory_space<vmem>>, vector<1x32x128xbf16>
    %333 = vector.shape_cast %332 : vector<1x32x128xbf16> to vector<32x128xbf16>
    %cst_126 = arith.constant dense<0.000000e+00> : vector<2x128xf32>
    %334 = tpu.matmul %331, %333, %cst_126 {dimension_numbers = #tpu.dot_dimension_numbers<[1], [0], [0], [1], [0, 0, 1, 1], [], []>} : vector<2x32xbf16>, vector<32x128xbf16>, vector<2x128xf32> -> vector<2x128xf32>
    %335 = arith.truncf %249 : vector<2x32xf32> to vector<2x32xbf16>
    %c2_127 = arith.constant 2 : index
    %c0_128 = arith.constant 0 : index
    %c0_129 = arith.constant 0 : index
    %336 = vector.load %arg4[%c2_127, %c0_128, %c0_129] : memref<4x32x128xbf16, #tpu.memory_space<vmem>>, vector<1x32x128xbf16>
    %337 = vector.shape_cast %336 : vector<1x32x128xbf16> to vector<32x128xbf16>
    %cst_130 = arith.constant dense<0.000000e+00> : vector<2x128xf32>
    %338 = tpu.matmul %335, %337, %cst_130 {dimension_numbers = #tpu.dot_dimension_numbers<[1], [0], [0], [1], [0, 0, 1, 1], [], []>} : vector<2x32xbf16>, vector<32x128xbf16>, vector<2x128xf32> -> vector<2x128xf32>
    %339 = arith.addf %334, %338 : vector<2x128xf32>
    %c2_131 = arith.constant 2 : index
    %c0_132 = arith.constant 0 : index
    %c0_133 = arith.constant 0 : index
    %340 = vector.load %arg5[%c2_131, %c0_132, %c0_133] : memref<4x1x128xf32, #tpu.memory_space<vmem>>, vector<1x1x128xf32>
    %341 = vector.shape_cast %340 : vector<1x1x128xf32> to vector<1x128xf32>
    %342 = vector.broadcast %341 : vector<1x128xf32> to vector<2x128xf32>
    %343 = arith.addf %339, %342 : vector<2x128xf32>
    %344 = vector.extract_strided_slice %343 {offsets = [0, 0], sizes = [2, 96], strides = [1, 1]} : vector<2x128xf32> to vector<2x96xf32>
    %345 = arith.negf %344 : vector<2x96xf32>
    %346 = math.exp %345 : vector<2x96xf32>
    %cst_134 = arith.constant 1.000000e+00 : f32
    %347 = vector.broadcast %cst_134 : f32 to vector<2x96xf32>
    %348 = arith.addf %347, %346 : vector<2x96xf32>
    %349 = arith.divf %347, %348 : vector<2x96xf32>
    %350 = vector.extract_strided_slice %349 {offsets = [0, 0], sizes = [2, 32], strides = [1, 1]} : vector<2x96xf32> to vector<2x32xf32>
    %351 = vector.extract_strided_slice %349 {offsets = [0, 32], sizes = [2, 32], strides = [1, 1]} : vector<2x96xf32> to vector<2x32xf32>
    %352 = vector.extract_strided_slice %349 {offsets = [0, 64], sizes = [2, 32], strides = [1, 1]} : vector<2x96xf32> to vector<2x32xf32>
    %353 = vector.extract_strided_slice %343 {offsets = [0, 96], sizes = [2, 32], strides = [1, 1]} : vector<2x128xf32> to vector<2x32xf32>
    %354 = math.tanh %353 : vector<2x32xf32>
    %355 = arith.mulf %351, %247 : vector<2x32xf32>
    %356 = arith.mulf %350, %354 : vector<2x32xf32>
    %357 = arith.addf %355, %356 : vector<2x32xf32>
    %358 = math.tanh %357 : vector<2x32xf32>
    %359 = arith.mulf %352, %358 : vector<2x32xf32>
    %360 = arith.truncf %249 : vector<2x32xf32> to vector<2x32xbf16>
    %c3_135 = arith.constant 3 : index
    %c0_136 = arith.constant 0 : index
    %c0_137 = arith.constant 0 : index
    %361 = vector.load %arg3[%c3_135, %c0_136, %c0_137] : memref<4x32x128xbf16, #tpu.memory_space<vmem>>, vector<1x32x128xbf16>
    %362 = vector.shape_cast %361 : vector<1x32x128xbf16> to vector<32x128xbf16>
    %cst_138 = arith.constant dense<0.000000e+00> : vector<2x128xf32>
    %363 = tpu.matmul %360, %362, %cst_138 {dimension_numbers = #tpu.dot_dimension_numbers<[1], [0], [0], [1], [0, 0, 1, 1], [], []>} : vector<2x32xbf16>, vector<32x128xbf16>, vector<2x128xf32> -> vector<2x128xf32>
    %364 = arith.truncf %278 : vector<2x32xf32> to vector<2x32xbf16>
    %c3_139 = arith.constant 3 : index
    %c0_140 = arith.constant 0 : index
    %c0_141 = arith.constant 0 : index
    %365 = vector.load %arg4[%c3_139, %c0_140, %c0_141] : memref<4x32x128xbf16, #tpu.memory_space<vmem>>, vector<1x32x128xbf16>
    %366 = vector.shape_cast %365 : vector<1x32x128xbf16> to vector<32x128xbf16>
    %cst_142 = arith.constant dense<0.000000e+00> : vector<2x128xf32>
    %367 = tpu.matmul %364, %366, %cst_142 {dimension_numbers = #tpu.dot_dimension_numbers<[1], [0], [0], [1], [0, 0, 1, 1], [], []>} : vector<2x32xbf16>, vector<32x128xbf16>, vector<2x128xf32> -> vector<2x128xf32>
    %368 = arith.addf %363, %367 : vector<2x128xf32>
    %c3_143 = arith.constant 3 : index
    %c0_144 = arith.constant 0 : index
    %c0_145 = arith.constant 0 : index
    %369 = vector.load %arg5[%c3_143, %c0_144, %c0_145] : memref<4x1x128xf32, #tpu.memory_space<vmem>>, vector<1x1x128xf32>
    %370 = vector.shape_cast %369 : vector<1x1x128xf32> to vector<1x128xf32>
    %371 = vector.broadcast %370 : vector<1x128xf32> to vector<2x128xf32>
    %372 = arith.addf %368, %371 : vector<2x128xf32>
    %373 = vector.extract_strided_slice %372 {offsets = [0, 0], sizes = [2, 96], strides = [1, 1]} : vector<2x128xf32> to vector<2x96xf32>
    %374 = arith.negf %373 : vector<2x96xf32>
    %375 = math.exp %374 : vector<2x96xf32>
    %cst_146 = arith.constant 1.000000e+00 : f32
    %376 = vector.broadcast %cst_146 : f32 to vector<2x96xf32>
    %377 = arith.addf %376, %375 : vector<2x96xf32>
    %378 = arith.divf %376, %377 : vector<2x96xf32>
    %379 = vector.extract_strided_slice %378 {offsets = [0, 0], sizes = [2, 32], strides = [1, 1]} : vector<2x96xf32> to vector<2x32xf32>
    %380 = vector.extract_strided_slice %378 {offsets = [0, 32], sizes = [2, 32], strides = [1, 1]} : vector<2x96xf32> to vector<2x32xf32>
    %381 = vector.extract_strided_slice %378 {offsets = [0, 64], sizes = [2, 32], strides = [1, 1]} : vector<2x96xf32> to vector<2x32xf32>
    %382 = vector.extract_strided_slice %372 {offsets = [0, 96], sizes = [2, 32], strides = [1, 1]} : vector<2x128xf32> to vector<2x32xf32>
    %383 = math.tanh %382 : vector<2x32xf32>
    %384 = arith.mulf %380, %276 : vector<2x32xf32>
    %385 = arith.mulf %379, %383 : vector<2x32xf32>
    %386 = arith.addf %384, %385 : vector<2x32xf32>
    %387 = math.tanh %386 : vector<2x32xf32>
    %388 = arith.mulf %381, %387 : vector<2x32xf32>
    %c2_147 = arith.constant 2 : index
    %c0_148 = arith.constant 0 : index
    %389 = vector.load %arg6[%c2_147, %c0_148] : memref<16x32xf32, #tpu.memory_space<vmem>>, vector<2x32xf32>
    tpu.vector_store %arg6[%c2_147, %c0_148], %388 {strides = array<i32>} : memref<16x32xf32, #tpu.memory_space<vmem>>, vector<2x32xf32>,
    %390 = vector.extract_strided_slice %15 {offsets = [10, 0], sizes = [2, 128], strides = [1, 1]} : vector<16x128xf32> to vector<2x128xf32>
    %391 = arith.truncf %301 : vector<2x32xf32> to vector<2x32xbf16>
    %c0_149 = arith.constant 0 : index
    %c0_150 = arith.constant 0 : index
    %c0_151 = arith.constant 0 : index
    %392 = vector.load %arg4[%c0_149, %c0_150, %c0_151] : memref<4x32x128xbf16, #tpu.memory_space<vmem>>, vector<1x32x128xbf16>
    %393 = vector.shape_cast %392 : vector<1x32x128xbf16> to vector<32x128xbf16>
    %cst_152 = arith.constant dense<0.000000e+00> : vector<2x128xf32>
    %394 = tpu.matmul %391, %393, %cst_152 {dimension_numbers = #tpu.dot_dimension_numbers<[1], [0], [0], [1], [0, 0, 1, 1], [], []>} : vector<2x32xbf16>, vector<32x128xbf16>, vector<2x128xf32> -> vector<2x128xf32>
    %395 = arith.addf %390, %394 : vector<2x128xf32>
    %396 = vector.extract_strided_slice %395 {offsets = [0, 0], sizes = [2, 96], strides = [1, 1]} : vector<2x128xf32> to vector<2x96xf32>
    %397 = arith.negf %396 : vector<2x96xf32>
    %398 = math.exp %397 : vector<2x96xf32>
    %cst_153 = arith.constant 1.000000e+00 : f32
    %399 = vector.broadcast %cst_153 : f32 to vector<2x96xf32>
    %400 = arith.addf %399, %398 : vector<2x96xf32>
    %401 = arith.divf %399, %400 : vector<2x96xf32>
    %402 = vector.extract_strided_slice %401 {offsets = [0, 0], sizes = [2, 32], strides = [1, 1]} : vector<2x96xf32> to vector<2x32xf32>
    %403 = vector.extract_strided_slice %401 {offsets = [0, 32], sizes = [2, 32], strides = [1, 1]} : vector<2x96xf32> to vector<2x32xf32>
    %404 = vector.extract_strided_slice %401 {offsets = [0, 64], sizes = [2, 32], strides = [1, 1]} : vector<2x96xf32> to vector<2x32xf32>
    %405 = vector.extract_strided_slice %395 {offsets = [0, 96], sizes = [2, 32], strides = [1, 1]} : vector<2x128xf32> to vector<2x32xf32>
    %406 = math.tanh %405 : vector<2x32xf32>
    %407 = arith.mulf %403, %299 : vector<2x32xf32>
    %408 = arith.mulf %402, %406 : vector<2x32xf32>
    %409 = arith.addf %407, %408 : vector<2x32xf32>
    %410 = math.tanh %409 : vector<2x32xf32>
    %411 = arith.mulf %404, %410 : vector<2x32xf32>
    %412 = arith.truncf %301 : vector<2x32xf32> to vector<2x32xbf16>
    %c1_154 = arith.constant 1 : index
    %c0_155 = arith.constant 0 : index
    %c0_156 = arith.constant 0 : index
    %413 = vector.load %arg3[%c1_154, %c0_155, %c0_156] : memref<4x32x128xbf16, #tpu.memory_space<vmem>>, vector<1x32x128xbf16>
    %414 = vector.shape_cast %413 : vector<1x32x128xbf16> to vector<32x128xbf16>
    %cst_157 = arith.constant dense<0.000000e+00> : vector<2x128xf32>
    %415 = tpu.matmul %412, %414, %cst_157 {dimension_numbers = #tpu.dot_dimension_numbers<[1], [0], [0], [1], [0, 0, 1, 1], [], []>} : vector<2x32xbf16>, vector<32x128xbf16>, vector<2x128xf32> -> vector<2x128xf32>
    %416 = arith.truncf %330 : vector<2x32xf32> to vector<2x32xbf16>
    %c1_158 = arith.constant 1 : index
    %c0_159 = arith.constant 0 : index
    %c0_160 = arith.constant 0 : index
    %417 = vector.load %arg4[%c1_158, %c0_159, %c0_160] : memref<4x32x128xbf16, #tpu.memory_space<vmem>>, vector<1x32x128xbf16>
    %418 = vector.shape_cast %417 : vector<1x32x128xbf16> to vector<32x128xbf16>
    %cst_161 = arith.constant dense<0.000000e+00> : vector<2x128xf32>
    %419 = tpu.matmul %416, %418, %cst_161 {dimension_numbers = #tpu.dot_dimension_numbers<[1], [0], [0], [1], [0, 0, 1, 1], [], []>} : vector<2x32xbf16>, vector<32x128xbf16>, vector<2x128xf32> -> vector<2x128xf32>
    %420 = arith.addf %415, %419 : vector<2x128xf32>
    %c1_162 = arith.constant 1 : index
    %c0_163 = arith.constant 0 : index
    %c0_164 = arith.constant 0 : index
    %421 = vector.load %arg5[%c1_162, %c0_163, %c0_164] : memref<4x1x128xf32, #tpu.memory_space<vmem>>, vector<1x1x128xf32>
    %422 = vector.shape_cast %421 : vector<1x1x128xf32> to vector<1x128xf32>
    %423 = vector.broadcast %422 : vector<1x128xf32> to vector<2x128xf32>
    %424 = arith.addf %420, %423 : vector<2x128xf32>
    %425 = vector.extract_strided_slice %424 {offsets = [0, 0], sizes = [2, 96], strides = [1, 1]} : vector<2x128xf32> to vector<2x96xf32>
    %426 = arith.negf %425 : vector<2x96xf32>
    %427 = math.exp %426 : vector<2x96xf32>
    %cst_165 = arith.constant 1.000000e+00 : f32
    %428 = vector.broadcast %cst_165 : f32 to vector<2x96xf32>
    %429 = arith.addf %428, %427 : vector<2x96xf32>
    %430 = arith.divf %428, %429 : vector<2x96xf32>
    %431 = vector.extract_strided_slice %430 {offsets = [0, 0], sizes = [2, 32], strides = [1, 1]} : vector<2x96xf32> to vector<2x32xf32>
    %432 = vector.extract_strided_slice %430 {offsets = [0, 32], sizes = [2, 32], strides = [1, 1]} : vector<2x96xf32> to vector<2x32xf32>
    %433 = vector.extract_strided_slice %430 {offsets = [0, 64], sizes = [2, 32], strides = [1, 1]} : vector<2x96xf32> to vector<2x32xf32>
    %434 = vector.extract_strided_slice %424 {offsets = [0, 96], sizes = [2, 32], strides = [1, 1]} : vector<2x128xf32> to vector<2x32xf32>
    %435 = math.tanh %434 : vector<2x32xf32>
    %436 = arith.mulf %432, %328 : vector<2x32xf32>
    %437 = arith.mulf %431, %435 : vector<2x32xf32>
    %438 = arith.addf %436, %437 : vector<2x32xf32>
    %439 = math.tanh %438 : vector<2x32xf32>
    %440 = arith.mulf %433, %439 : vector<2x32xf32>
    %441 = arith.truncf %330 : vector<2x32xf32> to vector<2x32xbf16>
    %c2_166 = arith.constant 2 : index
    %c0_167 = arith.constant 0 : index
    %c0_168 = arith.constant 0 : index
    %442 = vector.load %arg3[%c2_166, %c0_167, %c0_168] : memref<4x32x128xbf16, #tpu.memory_space<vmem>>, vector<1x32x128xbf16>
    %443 = vector.shape_cast %442 : vector<1x32x128xbf16> to vector<32x128xbf16>
    %cst_169 = arith.constant dense<0.000000e+00> : vector<2x128xf32>
    %444 = tpu.matmul %441, %443, %cst_169 {dimension_numbers = #tpu.dot_dimension_numbers<[1], [0], [0], [1], [0, 0, 1, 1], [], []>} : vector<2x32xbf16>, vector<32x128xbf16>, vector<2x128xf32> -> vector<2x128xf32>
    %445 = arith.truncf %359 : vector<2x32xf32> to vector<2x32xbf16>
    %c2_170 = arith.constant 2 : index
    %c0_171 = arith.constant 0 : index
    %c0_172 = arith.constant 0 : index
    %446 = vector.load %arg4[%c2_170, %c0_171, %c0_172] : memref<4x32x128xbf16, #tpu.memory_space<vmem>>, vector<1x32x128xbf16>
    %447 = vector.shape_cast %446 : vector<1x32x128xbf16> to vector<32x128xbf16>
    %cst_173 = arith.constant dense<0.000000e+00> : vector<2x128xf32>
    %448 = tpu.matmul %445, %447, %cst_173 {dimension_numbers = #tpu.dot_dimension_numbers<[1], [0], [0], [1], [0, 0, 1, 1], [], []>} : vector<2x32xbf16>, vector<32x128xbf16>, vector<2x128xf32> -> vector<2x128xf32>
    %449 = arith.addf %444, %448 : vector<2x128xf32>
    %c2_174 = arith.constant 2 : index
    %c0_175 = arith.constant 0 : index
    %c0_176 = arith.constant 0 : index
    %450 = vector.load %arg5[%c2_174, %c0_175, %c0_176] : memref<4x1x128xf32, #tpu.memory_space<vmem>>, vector<1x1x128xf32>
    %451 = vector.shape_cast %450 : vector<1x1x128xf32> to vector<1x128xf32>
    %452 = vector.broadcast %451 : vector<1x128xf32> to vector<2x128xf32>
    %453 = arith.addf %449, %452 : vector<2x128xf32>
    %454 = vector.extract_strided_slice %453 {offsets = [0, 0], sizes = [2, 96], strides = [1, 1]} : vector<2x128xf32> to vector<2x96xf32>
    %455 = arith.negf %454 : vector<2x96xf32>
    %456 = math.exp %455 : vector<2x96xf32>
    %cst_177 = arith.constant 1.000000e+00 : f32
    %457 = vector.broadcast %cst_177 : f32 to vector<2x96xf32>
    %458 = arith.addf %457, %456 : vector<2x96xf32>
    %459 = arith.divf %457, %458 : vector<2x96xf32>
    %460 = vector.extract_strided_slice %459 {offsets = [0, 0], sizes = [2, 32], strides = [1, 1]} : vector<2x96xf32> to vector<2x32xf32>
    %461 = vector.extract_strided_slice %459 {offsets = [0, 32], sizes = [2, 32], strides = [1, 1]} : vector<2x96xf32> to vector<2x32xf32>
    %462 = vector.extract_strided_slice %459 {offsets = [0, 64], sizes = [2, 32], strides = [1, 1]} : vector<2x96xf32> to vector<2x32xf32>
    %463 = vector.extract_strided_slice %453 {offsets = [0, 96], sizes = [2, 32], strides = [1, 1]} : vector<2x128xf32> to vector<2x32xf32>
    %464 = math.tanh %463 : vector<2x32xf32>
    %465 = arith.mulf %461, %357 : vector<2x32xf32>
    %466 = arith.mulf %460, %464 : vector<2x32xf32>
    %467 = arith.addf %465, %466 : vector<2x32xf32>
    %468 = math.tanh %467 : vector<2x32xf32>
    %469 = arith.mulf %462, %468 : vector<2x32xf32>
    %470 = arith.truncf %359 : vector<2x32xf32> to vector<2x32xbf16>
    %c3_178 = arith.constant 3 : index
    %c0_179 = arith.constant 0 : index
    %c0_180 = arith.constant 0 : index
    %471 = vector.load %arg3[%c3_178, %c0_179, %c0_180] : memref<4x32x128xbf16, #tpu.memory_space<vmem>>, vector<1x32x128xbf16>
    %472 = vector.shape_cast %471 : vector<1x32x128xbf16> to vector<32x128xbf16>
    %cst_181 = arith.constant dense<0.000000e+00> : vector<2x128xf32>
    %473 = tpu.matmul %470, %472, %cst_181 {dimension_numbers = #tpu.dot_dimension_numbers<[1], [0], [0], [1], [0, 0, 1, 1], [], []>} : vector<2x32xbf16>, vector<32x128xbf16>, vector<2x128xf32> -> vector<2x128xf32>
    %474 = arith.truncf %388 : vector<2x32xf32> to vector<2x32xbf16>
    %c3_182 = arith.constant 3 : index
    %c0_183 = arith.constant 0 : index
    %c0_184 = arith.constant 0 : index
    %475 = vector.load %arg4[%c3_182, %c0_183, %c0_184] : memref<4x32x128xbf16, #tpu.memory_space<vmem>>, vector<1x32x128xbf16>
    %476 = vector.shape_cast %475 : vector<1x32x128xbf16> to vector<32x128xbf16>
    %cst_185 = arith.constant dense<0.000000e+00> : vector<2x128xf32>
    %477 = tpu.matmul %474, %476, %cst_185 {dimension_numbers = #tpu.dot_dimension_numbers<[1], [0], [0], [1], [0, 0, 1, 1], [], []>} : vector<2x32xbf16>, vector<32x128xbf16>, vector<2x128xf32> -> vector<2x128xf32>
    %478 = arith.addf %473, %477 : vector<2x128xf32>
    %c3_186 = arith.constant 3 : index
    %c0_187 = arith.constant 0 : index
    %c0_188 = arith.constant 0 : index
    %479 = vector.load %arg5[%c3_186, %c0_187, %c0_188] : memref<4x1x128xf32, #tpu.memory_space<vmem>>, vector<1x1x128xf32>
    %480 = vector.shape_cast %479 : vector<1x1x128xf32> to vector<1x128xf32>
    %481 = vector.broadcast %480 : vector<1x128xf32> to vector<2x128xf32>
    %482 = arith.addf %478, %481 : vector<2x128xf32>
    %483 = vector.extract_strided_slice %482 {offsets = [0, 0], sizes = [2, 96], strides = [1, 1]} : vector<2x128xf32> to vector<2x96xf32>
    %484 = arith.negf %483 : vector<2x96xf32>
    %485 = math.exp %484 : vector<2x96xf32>
    %cst_189 = arith.constant 1.000000e+00 : f32
    %486 = vector.broadcast %cst_189 : f32 to vector<2x96xf32>
    %487 = arith.addf %486, %485 : vector<2x96xf32>
    %488 = arith.divf %486, %487 : vector<2x96xf32>
    %489 = vector.extract_strided_slice %488 {offsets = [0, 0], sizes = [2, 32], strides = [1, 1]} : vector<2x96xf32> to vector<2x32xf32>
    %490 = vector.extract_strided_slice %488 {offsets = [0, 32], sizes = [2, 32], strides = [1, 1]} : vector<2x96xf32> to vector<2x32xf32>
    %491 = vector.extract_strided_slice %488 {offsets = [0, 64], sizes = [2, 32], strides = [1, 1]} : vector<2x96xf32> to vector<2x32xf32>
    %492 = vector.extract_strided_slice %482 {offsets = [0, 96], sizes = [2, 32], strides = [1, 1]} : vector<2x128xf32> to vector<2x32xf32>
    %493 = math.tanh %492 : vector<2x32xf32>
    %494 = arith.mulf %490, %386 : vector<2x32xf32>
    %495 = arith.mulf %489, %493 : vector<2x32xf32>
    %496 = arith.addf %494, %495 : vector<2x32xf32>
    %497 = math.tanh %496 : vector<2x32xf32>
    %498 = arith.mulf %491, %497 : vector<2x32xf32>
    %c4 = arith.constant 4 : index
    %c0_190 = arith.constant 0 : index
    %499 = vector.load %arg6[%c4, %c0_190] : memref<16x32xf32, #tpu.memory_space<vmem>>, vector<2x32xf32>
    tpu.vector_store %arg6[%c4, %c0_190], %498 {strides = array<i32>} : memref<16x32xf32, #tpu.memory_space<vmem>>, vector<2x32xf32>,
    %500 = vector.extract_strided_slice %15 {offsets = [12, 0], sizes = [2, 128], strides = [1, 1]} : vector<16x128xf32> to vector<2x128xf32>
    %501 = arith.truncf %411 : vector<2x32xf32> to vector<2x32xbf16>
    %c0_191 = arith.constant 0 : index
    %c0_192 = arith.constant 0 : index
    %c0_193 = arith.constant 0 : index
    %502 = vector.load %arg4[%c0_191, %c0_192, %c0_193] : memref<4x32x128xbf16, #tpu.memory_space<vmem>>, vector<1x32x128xbf16>
    %503 = vector.shape_cast %502 : vector<1x32x128xbf16> to vector<32x128xbf16>
    %cst_194 = arith.constant dense<0.000000e+00> : vector<2x128xf32>
    %504 = tpu.matmul %501, %503, %cst_194 {dimension_numbers = #tpu.dot_dimension_numbers<[1], [0], [0], [1], [0, 0, 1, 1], [], []>} : vector<2x32xbf16>, vector<32x128xbf16>, vector<2x128xf32> -> vector<2x128xf32>
    %505 = arith.addf %500, %504 : vector<2x128xf32>
    %506 = vector.extract_strided_slice %505 {offsets = [0, 0], sizes = [2, 96], strides = [1, 1]} : vector<2x128xf32> to vector<2x96xf32>
    %507 = arith.negf %506 : vector<2x96xf32>
    %508 = math.exp %507 : vector<2x96xf32>
    %cst_195 = arith.constant 1.000000e+00 : f32
    %509 = vector.broadcast %cst_195 : f32 to vector<2x96xf32>
    %510 = arith.addf %509, %508 : vector<2x96xf32>
    %511 = arith.divf %509, %510 : vector<2x96xf32>
    %512 = vector.extract_strided_slice %511 {offsets = [0, 0], sizes = [2, 32], strides = [1, 1]} : vector<2x96xf32> to vector<2x32xf32>
    %513 = vector.extract_strided_slice %511 {offsets = [0, 32], sizes = [2, 32], strides = [1, 1]} : vector<2x96xf32> to vector<2x32xf32>
    %514 = vector.extract_strided_slice %511 {offsets = [0, 64], sizes = [2, 32], strides = [1, 1]} : vector<2x96xf32> to vector<2x32xf32>
    %515 = vector.extract_strided_slice %505 {offsets = [0, 96], sizes = [2, 32], strides = [1, 1]} : vector<2x128xf32> to vector<2x32xf32>
    %516 = math.tanh %515 : vector<2x32xf32>
    %517 = arith.mulf %513, %409 : vector<2x32xf32>
    %518 = arith.mulf %512, %516 : vector<2x32xf32>
    %519 = arith.addf %517, %518 : vector<2x32xf32>
    %520 = math.tanh %519 : vector<2x32xf32>
    %521 = arith.mulf %514, %520 : vector<2x32xf32>
    %522 = arith.truncf %411 : vector<2x32xf32> to vector<2x32xbf16>
    %c1_196 = arith.constant 1 : index
    %c0_197 = arith.constant 0 : index
    %c0_198 = arith.constant 0 : index
    %523 = vector.load %arg3[%c1_196, %c0_197, %c0_198] : memref<4x32x128xbf16, #tpu.memory_space<vmem>>, vector<1x32x128xbf16>
    %524 = vector.shape_cast %523 : vector<1x32x128xbf16> to vector<32x128xbf16>
    %cst_199 = arith.constant dense<0.000000e+00> : vector<2x128xf32>
    %525 = tpu.matmul %522, %524, %cst_199 {dimension_numbers = #tpu.dot_dimension_numbers<[1], [0], [0], [1], [0, 0, 1, 1], [], []>} : vector<2x32xbf16>, vector<32x128xbf16>, vector<2x128xf32> -> vector<2x128xf32>
    %526 = arith.truncf %440 : vector<2x32xf32> to vector<2x32xbf16>
    %c1_200 = arith.constant 1 : index
    %c0_201 = arith.constant 0 : index
    %c0_202 = arith.constant 0 : index
    %527 = vector.load %arg4[%c1_200, %c0_201, %c0_202] : memref<4x32x128xbf16, #tpu.memory_space<vmem>>, vector<1x32x128xbf16>
    %528 = vector.shape_cast %527 : vector<1x32x128xbf16> to vector<32x128xbf16>
    %cst_203 = arith.constant dense<0.000000e+00> : vector<2x128xf32>
    %529 = tpu.matmul %526, %528, %cst_203 {dimension_numbers = #tpu.dot_dimension_numbers<[1], [0], [0], [1], [0, 0, 1, 1], [], []>} : vector<2x32xbf16>, vector<32x128xbf16>, vector<2x128xf32> -> vector<2x128xf32>
    %530 = arith.addf %525, %529 : vector<2x128xf32>
    %c1_204 = arith.constant 1 : index
    %c0_205 = arith.constant 0 : index
    %c0_206 = arith.constant 0 : index
    %531 = vector.load %arg5[%c1_204, %c0_205, %c0_206] : memref<4x1x128xf32, #tpu.memory_space<vmem>>, vector<1x1x128xf32>
    %532 = vector.shape_cast %531 : vector<1x1x128xf32> to vector<1x128xf32>
    %533 = vector.broadcast %532 : vector<1x128xf32> to vector<2x128xf32>
    %534 = arith.addf %530, %533 : vector<2x128xf32>
    %535 = vector.extract_strided_slice %534 {offsets = [0, 0], sizes = [2, 96], strides = [1, 1]} : vector<2x128xf32> to vector<2x96xf32>
    %536 = arith.negf %535 : vector<2x96xf32>
    %537 = math.exp %536 : vector<2x96xf32>
    %cst_207 = arith.constant 1.000000e+00 : f32
    %538 = vector.broadcast %cst_207 : f32 to vector<2x96xf32>
    %539 = arith.addf %538, %537 : vector<2x96xf32>
    %540 = arith.divf %538, %539 : vector<2x96xf32>
    %541 = vector.extract_strided_slice %540 {offsets = [0, 0], sizes = [2, 32], strides = [1, 1]} : vector<2x96xf32> to vector<2x32xf32>
    %542 = vector.extract_strided_slice %540 {offsets = [0, 32], sizes = [2, 32], strides = [1, 1]} : vector<2x96xf32> to vector<2x32xf32>
    %543 = vector.extract_strided_slice %540 {offsets = [0, 64], sizes = [2, 32], strides = [1, 1]} : vector<2x96xf32> to vector<2x32xf32>
    %544 = vector.extract_strided_slice %534 {offsets = [0, 96], sizes = [2, 32], strides = [1, 1]} : vector<2x128xf32> to vector<2x32xf32>
    %545 = math.tanh %544 : vector<2x32xf32>
    %546 = arith.mulf %542, %438 : vector<2x32xf32>
    %547 = arith.mulf %541, %545 : vector<2x32xf32>
    %548 = arith.addf %546, %547 : vector<2x32xf32>
    %549 = math.tanh %548 : vector<2x32xf32>
    %550 = arith.mulf %543, %549 : vector<2x32xf32>
    %551 = arith.truncf %440 : vector<2x32xf32> to vector<2x32xbf16>
    %c2_208 = arith.constant 2 : index
    %c0_209 = arith.constant 0 : index
    %c0_210 = arith.constant 0 : index
    %552 = vector.load %arg3[%c2_208, %c0_209, %c0_210] : memref<4x32x128xbf16, #tpu.memory_space<vmem>>, vector<1x32x128xbf16>
    %553 = vector.shape_cast %552 : vector<1x32x128xbf16> to vector<32x128xbf16>
    %cst_211 = arith.constant dense<0.000000e+00> : vector<2x128xf32>
    %554 = tpu.matmul %551, %553, %cst_211 {dimension_numbers = #tpu.dot_dimension_numbers<[1], [0], [0], [1], [0, 0, 1, 1], [], []>} : vector<2x32xbf16>, vector<32x128xbf16>, vector<2x128xf32> -> vector<2x128xf32>
    %555 = arith.truncf %469 : vector<2x32xf32> to vector<2x32xbf16>
    %c2_212 = arith.constant 2 : index
    %c0_213 = arith.constant 0 : index
    %c0_214 = arith.constant 0 : index
    %556 = vector.load %arg4[%c2_212, %c0_213, %c0_214] : memref<4x32x128xbf16, #tpu.memory_space<vmem>>, vector<1x32x128xbf16>
    %557 = vector.shape_cast %556 : vector<1x32x128xbf16> to vector<32x128xbf16>
    %cst_215 = arith.constant dense<0.000000e+00> : vector<2x128xf32>
    %558 = tpu.matmul %555, %557, %cst_215 {dimension_numbers = #tpu.dot_dimension_numbers<[1], [0], [0], [1], [0, 0, 1, 1], [], []>} : vector<2x32xbf16>, vector<32x128xbf16>, vector<2x128xf32> -> vector<2x128xf32>
    %559 = arith.addf %554, %558 : vector<2x128xf32>
    %c2_216 = arith.constant 2 : index
    %c0_217 = arith.constant 0 : index
    %c0_218 = arith.constant 0 : index
    %560 = vector.load %arg5[%c2_216, %c0_217, %c0_218] : memref<4x1x128xf32, #tpu.memory_space<vmem>>, vector<1x1x128xf32>
    %561 = vector.shape_cast %560 : vector<1x1x128xf32> to vector<1x128xf32>
    %562 = vector.broadcast %561 : vector<1x128xf32> to vector<2x128xf32>
    %563 = arith.addf %559, %562 : vector<2x128xf32>
    %564 = vector.extract_strided_slice %563 {offsets = [0, 0], sizes = [2, 96], strides = [1, 1]} : vector<2x128xf32> to vector<2x96xf32>
    %565 = arith.negf %564 : vector<2x96xf32>
    %566 = math.exp %565 : vector<2x96xf32>
    %cst_219 = arith.constant 1.000000e+00 : f32
    %567 = vector.broadcast %cst_219 : f32 to vector<2x96xf32>
    %568 = arith.addf %567, %566 : vector<2x96xf32>
    %569 = arith.divf %567, %568 : vector<2x96xf32>
    %570 = vector.extract_strided_slice %569 {offsets = [0, 0], sizes = [2, 32], strides = [1, 1]} : vector<2x96xf32> to vector<2x32xf32>
    %571 = vector.extract_strided_slice %569 {offsets = [0, 32], sizes = [2, 32], strides = [1, 1]} : vector<2x96xf32> to vector<2x32xf32>
    %572 = vector.extract_strided_slice %569 {offsets = [0, 64], sizes = [2, 32], strides = [1, 1]} : vector<2x96xf32> to vector<2x32xf32>
    %573 = vector.extract_strided_slice %563 {offsets = [0, 96], sizes = [2, 32], strides = [1, 1]} : vector<2x128xf32> to vector<2x32xf32>
    %574 = math.tanh %573 : vector<2x32xf32>
    %575 = arith.mulf %571, %467 : vector<2x32xf32>
    %576 = arith.mulf %570, %574 : vector<2x32xf32>
    %577 = arith.addf %575, %576 : vector<2x32xf32>
    %578 = math.tanh %577 : vector<2x32xf32>
    %579 = arith.mulf %572, %578 : vector<2x32xf32>
    %580 = arith.truncf %469 : vector<2x32xf32> to vector<2x32xbf16>
    %c3_220 = arith.constant 3 : index
    %c0_221 = arith.constant 0 : index
    %c0_222 = arith.constant 0 : index
    %581 = vector.load %arg3[%c3_220, %c0_221, %c0_222] : memref<4x32x128xbf16, #tpu.memory_space<vmem>>, vector<1x32x128xbf16>
    %582 = vector.shape_cast %581 : vector<1x32x128xbf16> to vector<32x128xbf16>
    %cst_223 = arith.constant dense<0.000000e+00> : vector<2x128xf32>
    %583 = tpu.matmul %580, %582, %cst_223 {dimension_numbers = #tpu.dot_dimension_numbers<[1], [0], [0], [1], [0, 0, 1, 1], [], []>} : vector<2x32xbf16>, vector<32x128xbf16>, vector<2x128xf32> -> vector<2x128xf32>
    %584 = arith.truncf %498 : vector<2x32xf32> to vector<2x32xbf16>
    %c3_224 = arith.constant 3 : index
    %c0_225 = arith.constant 0 : index
    %c0_226 = arith.constant 0 : index
    %585 = vector.load %arg4[%c3_224, %c0_225, %c0_226] : memref<4x32x128xbf16, #tpu.memory_space<vmem>>, vector<1x32x128xbf16>
    %586 = vector.shape_cast %585 : vector<1x32x128xbf16> to vector<32x128xbf16>
    %cst_227 = arith.constant dense<0.000000e+00> : vector<2x128xf32>
    %587 = tpu.matmul %584, %586, %cst_227 {dimension_numbers = #tpu.dot_dimension_numbers<[1], [0], [0], [1], [0, 0, 1, 1], [], []>} : vector<2x32xbf16>, vector<32x128xbf16>, vector<2x128xf32> -> vector<2x128xf32>
    %588 = arith.addf %583, %587 : vector<2x128xf32>
    %c3_228 = arith.constant 3 : index
    %c0_229 = arith.constant 0 : index
    %c0_230 = arith.constant 0 : index
    %589 = vector.load %arg5[%c3_228, %c0_229, %c0_230] : memref<4x1x128xf32, #tpu.memory_space<vmem>>, vector<1x1x128xf32>
    %590 = vector.shape_cast %589 : vector<1x1x128xf32> to vector<1x128xf32>
    %591 = vector.broadcast %590 : vector<1x128xf32> to vector<2x128xf32>
    %592 = arith.addf %588, %591 : vector<2x128xf32>
    %593 = vector.extract_strided_slice %592 {offsets = [0, 0], sizes = [2, 96], strides = [1, 1]} : vector<2x128xf32> to vector<2x96xf32>
    %594 = arith.negf %593 : vector<2x96xf32>
    %595 = math.exp %594 : vector<2x96xf32>
    %cst_231 = arith.constant 1.000000e+00 : f32
    %596 = vector.broadcast %cst_231 : f32 to vector<2x96xf32>
    %597 = arith.addf %596, %595 : vector<2x96xf32>
    %598 = arith.divf %596, %597 : vector<2x96xf32>
    %599 = vector.extract_strided_slice %598 {offsets = [0, 0], sizes = [2, 32], strides = [1, 1]} : vector<2x96xf32> to vector<2x32xf32>
    %600 = vector.extract_strided_slice %598 {offsets = [0, 32], sizes = [2, 32], strides = [1, 1]} : vector<2x96xf32> to vector<2x32xf32>
    %601 = vector.extract_strided_slice %598 {offsets = [0, 64], sizes = [2, 32], strides = [1, 1]} : vector<2x96xf32> to vector<2x32xf32>
    %602 = vector.extract_strided_slice %592 {offsets = [0, 96], sizes = [2, 32], strides = [1, 1]} : vector<2x128xf32> to vector<2x32xf32>
    %603 = math.tanh %602 : vector<2x32xf32>
    %604 = arith.mulf %600, %496 : vector<2x32xf32>
    %605 = arith.mulf %599, %603 : vector<2x32xf32>
    %606 = arith.addf %604, %605 : vector<2x32xf32>
    %607 = math.tanh %606 : vector<2x32xf32>
    %608 = arith.mulf %601, %607 : vector<2x32xf32>
    %c6 = arith.constant 6 : index
    %c0_232 = arith.constant 0 : index
    %609 = vector.load %arg6[%c6, %c0_232] : memref<16x32xf32, #tpu.memory_space<vmem>>, vector<2x32xf32>
    tpu.vector_store %arg6[%c6, %c0_232], %608 {strides = array<i32>} : memref<16x32xf32, #tpu.memory_space<vmem>>, vector<2x32xf32>,
    %610 = vector.extract_strided_slice %15 {offsets = [14, 0], sizes = [2, 128], strides = [1, 1]} : vector<16x128xf32> to vector<2x128xf32>
    %611 = arith.truncf %521 : vector<2x32xf32> to vector<2x32xbf16>
    %c0_233 = arith.constant 0 : index
    %c0_234 = arith.constant 0 : index
    %c0_235 = arith.constant 0 : index
    %612 = vector.load %arg4[%c0_233, %c0_234, %c0_235] : memref<4x32x128xbf16, #tpu.memory_space<vmem>>, vector<1x32x128xbf16>
    %613 = vector.shape_cast %612 : vector<1x32x128xbf16> to vector<32x128xbf16>
    %cst_236 = arith.constant dense<0.000000e+00> : vector<2x128xf32>
    %614 = tpu.matmul %611, %613, %cst_236 {dimension_numbers = #tpu.dot_dimension_numbers<[1], [0], [0], [1], [0, 0, 1, 1], [], []>} : vector<2x32xbf16>, vector<32x128xbf16>, vector<2x128xf32> -> vector<2x128xf32>
    %615 = arith.addf %610, %614 : vector<2x128xf32>
    %616 = vector.extract_strided_slice %615 {offsets = [0, 0], sizes = [2, 96], strides = [1, 1]} : vector<2x128xf32> to vector<2x96xf32>
    %617 = arith.negf %616 : vector<2x96xf32>
    %618 = math.exp %617 : vector<2x96xf32>
    %cst_237 = arith.constant 1.000000e+00 : f32
    %619 = vector.broadcast %cst_237 : f32 to vector<2x96xf32>
    %620 = arith.addf %619, %618 : vector<2x96xf32>
    %621 = arith.divf %619, %620 : vector<2x96xf32>
    %622 = vector.extract_strided_slice %621 {offsets = [0, 0], sizes = [2, 32], strides = [1, 1]} : vector<2x96xf32> to vector<2x32xf32>
    %623 = vector.extract_strided_slice %621 {offsets = [0, 32], sizes = [2, 32], strides = [1, 1]} : vector<2x96xf32> to vector<2x32xf32>
    %624 = vector.extract_strided_slice %621 {offsets = [0, 64], sizes = [2, 32], strides = [1, 1]} : vector<2x96xf32> to vector<2x32xf32>
    %625 = vector.extract_strided_slice %615 {offsets = [0, 96], sizes = [2, 32], strides = [1, 1]} : vector<2x128xf32> to vector<2x32xf32>
    %626 = math.tanh %625 : vector<2x32xf32>
    %627 = arith.mulf %623, %519 : vector<2x32xf32>
    %628 = arith.mulf %622, %626 : vector<2x32xf32>
    %629 = arith.addf %627, %628 : vector<2x32xf32>
    %630 = math.tanh %629 : vector<2x32xf32>
    %631 = arith.mulf %624, %630 : vector<2x32xf32>
    %c0_238 = arith.constant 0 : index
    %c0_239 = arith.constant 0 : index
    %c0_240 = arith.constant 0 : index
    %632 = vector.load %arg7[%c0_238, %c0_239, %c0_240] : memref<4x2x32xf32, #tpu.memory_space<vmem>>, vector<1x2x32xf32>
    %633 = vector.shape_cast %632 : vector<1x2x32xf32> to vector<2x32xf32>
    %634 = vector.shape_cast %631 : vector<2x32xf32> to vector<1x2x32xf32>
    tpu.vector_store %arg7[%c0_238, %c0_239, %c0_240], %634 {strides = array<i32>} : memref<4x2x32xf32, #tpu.memory_space<vmem>>, vector<1x2x32xf32>,
    %c0_241 = arith.constant 0 : index
    %c0_242 = arith.constant 0 : index
    %c0_243 = arith.constant 0 : index
    %635 = vector.load %arg8[%c0_241, %c0_242, %c0_243] : memref<4x2x32xf32, #tpu.memory_space<vmem>>, vector<1x2x32xf32>
    %636 = vector.shape_cast %635 : vector<1x2x32xf32> to vector<2x32xf32>
    %637 = vector.shape_cast %629 : vector<2x32xf32> to vector<1x2x32xf32>
    tpu.vector_store %arg8[%c0_241, %c0_242, %c0_243], %637 {strides = array<i32>} : memref<4x2x32xf32, #tpu.memory_space<vmem>>, vector<1x2x32xf32>,
    %638 = arith.truncf %521 : vector<2x32xf32> to vector<2x32xbf16>
    %c1_244 = arith.constant 1 : index
    %c0_245 = arith.constant 0 : index
    %c0_246 = arith.constant 0 : index
    %639 = vector.load %arg3[%c1_244, %c0_245, %c0_246] : memref<4x32x128xbf16, #tpu.memory_space<vmem>>, vector<1x32x128xbf16>
    %640 = vector.shape_cast %639 : vector<1x32x128xbf16> to vector<32x128xbf16>
    %cst_247 = arith.constant dense<0.000000e+00> : vector<2x128xf32>
    %641 = tpu.matmul %638, %640, %cst_247 {dimension_numbers = #tpu.dot_dimension_numbers<[1], [0], [0], [1], [0, 0, 1, 1], [], []>} : vector<2x32xbf16>, vector<32x128xbf16>, vector<2x128xf32> -> vector<2x128xf32>
    %642 = arith.truncf %550 : vector<2x32xf32> to vector<2x32xbf16>
    %c1_248 = arith.constant 1 : index
    %c0_249 = arith.constant 0 : index
    %c0_250 = arith.constant 0 : index
    %643 = vector.load %arg4[%c1_248, %c0_249, %c0_250] : memref<4x32x128xbf16, #tpu.memory_space<vmem>>, vector<1x32x128xbf16>
    %644 = vector.shape_cast %643 : vector<1x32x128xbf16> to vector<32x128xbf16>
    %cst_251 = arith.constant dense<0.000000e+00> : vector<2x128xf32>
    %645 = tpu.matmul %642, %644, %cst_251 {dimension_numbers = #tpu.dot_dimension_numbers<[1], [0], [0], [1], [0, 0, 1, 1], [], []>} : vector<2x32xbf16>, vector<32x128xbf16>, vector<2x128xf32> -> vector<2x128xf32>
    %646 = arith.addf %641, %645 : vector<2x128xf32>
    %c1_252 = arith.constant 1 : index
    %c0_253 = arith.constant 0 : index
    %c0_254 = arith.constant 0 : index
    %647 = vector.load %arg5[%c1_252, %c0_253, %c0_254] : memref<4x1x128xf32, #tpu.memory_space<vmem>>, vector<1x1x128xf32>
    %648 = vector.shape_cast %647 : vector<1x1x128xf32> to vector<1x128xf32>
    %649 = vector.broadcast %648 : vector<1x128xf32> to vector<2x128xf32>
    %650 = arith.addf %646, %649 : vector<2x128xf32>
    %651 = vector.extract_strided_slice %650 {offsets = [0, 0], sizes = [2, 96], strides = [1, 1]} : vector<2x128xf32> to vector<2x96xf32>
    %652 = arith.negf %651 : vector<2x96xf32>
    %653 = math.exp %652 : vector<2x96xf32>
    %cst_255 = arith.constant 1.000000e+00 : f32
    %654 = vector.broadcast %cst_255 : f32 to vector<2x96xf32>
    %655 = arith.addf %654, %653 : vector<2x96xf32>
    %656 = arith.divf %654, %655 : vector<2x96xf32>
    %657 = vector.extract_strided_slice %656 {offsets = [0, 0], sizes = [2, 32], strides = [1, 1]} : vector<2x96xf32> to vector<2x32xf32>
    %658 = vector.extract_strided_slice %656 {offsets = [0, 32], sizes = [2, 32], strides = [1, 1]} : vector<2x96xf32> to vector<2x32xf32>
    %659 = vector.extract_strided_slice %656 {offsets = [0, 64], sizes = [2, 32], strides = [1, 1]} : vector<2x96xf32> to vector<2x32xf32>
    %660 = vector.extract_strided_slice %650 {offsets = [0, 96], sizes = [2, 32], strides = [1, 1]} : vector<2x128xf32> to vector<2x32xf32>
    %661 = math.tanh %660 : vector<2x32xf32>
    %662 = arith.mulf %658, %548 : vector<2x32xf32>
    %663 = arith.mulf %657, %661 : vector<2x32xf32>
    %664 = arith.addf %662, %663 : vector<2x32xf32>
    %665 = math.tanh %664 : vector<2x32xf32>
    %666 = arith.mulf %659, %665 : vector<2x32xf32>
    %667 = arith.truncf %550 : vector<2x32xf32> to vector<2x32xbf16>
    %c2_256 = arith.constant 2 : index
    %c0_257 = arith.constant 0 : index
    %c0_258 = arith.constant 0 : index
    %668 = vector.load %arg3[%c2_256, %c0_257, %c0_258] : memref<4x32x128xbf16, #tpu.memory_space<vmem>>, vector<1x32x128xbf16>
    %669 = vector.shape_cast %668 : vector<1x32x128xbf16> to vector<32x128xbf16>
    %cst_259 = arith.constant dense<0.000000e+00> : vector<2x128xf32>
    %670 = tpu.matmul %667, %669, %cst_259 {dimension_numbers = #tpu.dot_dimension_numbers<[1], [0], [0], [1], [0, 0, 1, 1], [], []>} : vector<2x32xbf16>, vector<32x128xbf16>, vector<2x128xf32> -> vector<2x128xf32>
    %671 = arith.truncf %579 : vector<2x32xf32> to vector<2x32xbf16>
    %c2_260 = arith.constant 2 : index
    %c0_261 = arith.constant 0 : index
    %c0_262 = arith.constant 0 : index
    %672 = vector.load %arg4[%c2_260, %c0_261, %c0_262] : memref<4x32x128xbf16, #tpu.memory_space<vmem>>, vector<1x32x128xbf16>
    %673 = vector.shape_cast %672 : vector<1x32x128xbf16> to vector<32x128xbf16>
    %cst_263 = arith.constant dense<0.000000e+00> : vector<2x128xf32>
    %674 = tpu.matmul %671, %673, %cst_263 {dimension_numbers = #tpu.dot_dimension_numbers<[1], [0], [0], [1], [0, 0, 1, 1], [], []>} : vector<2x32xbf16>, vector<32x128xbf16>, vector<2x128xf32> -> vector<2x128xf32>
    %675 = arith.addf %670, %674 : vector<2x128xf32>
    %c2_264 = arith.constant 2 : index
    %c0_265 = arith.constant 0 : index
    %c0_266 = arith.constant 0 : index
    %676 = vector.load %arg5[%c2_264, %c0_265, %c0_266] : memref<4x1x128xf32, #tpu.memory_space<vmem>>, vector<1x1x128xf32>
    %677 = vector.shape_cast %676 : vector<1x1x128xf32> to vector<1x128xf32>
    %678 = vector.broadcast %677 : vector<1x128xf32> to vector<2x128xf32>
    %679 = arith.addf %675, %678 : vector<2x128xf32>
    %680 = vector.extract_strided_slice %679 {offsets = [0, 0], sizes = [2, 96], strides = [1, 1]} : vector<2x128xf32> to vector<2x96xf32>
    %681 = arith.negf %680 : vector<2x96xf32>
    %682 = math.exp %681 : vector<2x96xf32>
    %cst_267 = arith.constant 1.000000e+00 : f32
    %683 = vector.broadcast %cst_267 : f32 to vector<2x96xf32>
    %684 = arith.addf %683, %682 : vector<2x96xf32>
    %685 = arith.divf %683, %684 : vector<2x96xf32>
    %686 = vector.extract_strided_slice %685 {offsets = [0, 0], sizes = [2, 32], strides = [1, 1]} : vector<2x96xf32> to vector<2x32xf32>
    %687 = vector.extract_strided_slice %685 {offsets = [0, 32], sizes = [2, 32], strides = [1, 1]} : vector<2x96xf32> to vector<2x32xf32>
    %688 = vector.extract_strided_slice %685 {offsets = [0, 64], sizes = [2, 32], strides = [1, 1]} : vector<2x96xf32> to vector<2x32xf32>
    %689 = vector.extract_strided_slice %679 {offsets = [0, 96], sizes = [2, 32], strides = [1, 1]} : vector<2x128xf32> to vector<2x32xf32>
    %690 = math.tanh %689 : vector<2x32xf32>
    %691 = arith.mulf %687, %577 : vector<2x32xf32>
    %692 = arith.mulf %686, %690 : vector<2x32xf32>
    %693 = arith.addf %691, %692 : vector<2x32xf32>
    %694 = math.tanh %693 : vector<2x32xf32>
    %695 = arith.mulf %688, %694 : vector<2x32xf32>
    %696 = arith.truncf %579 : vector<2x32xf32> to vector<2x32xbf16>
    %c3_268 = arith.constant 3 : index
    %c0_269 = arith.constant 0 : index
    %c0_270 = arith.constant 0 : index
    %697 = vector.load %arg3[%c3_268, %c0_269, %c0_270] : memref<4x32x128xbf16, #tpu.memory_space<vmem>>, vector<1x32x128xbf16>
    %698 = vector.shape_cast %697 : vector<1x32x128xbf16> to vector<32x128xbf16>
    %cst_271 = arith.constant dense<0.000000e+00> : vector<2x128xf32>
    %699 = tpu.matmul %696, %698, %cst_271 {dimension_numbers = #tpu.dot_dimension_numbers<[1], [0], [0], [1], [0, 0, 1, 1], [], []>} : vector<2x32xbf16>, vector<32x128xbf16>, vector<2x128xf32> -> vector<2x128xf32>
    %700 = arith.truncf %608 : vector<2x32xf32> to vector<2x32xbf16>
    %c3_272 = arith.constant 3 : index
    %c0_273 = arith.constant 0 : index
    %c0_274 = arith.constant 0 : index
    %701 = vector.load %arg4[%c3_272, %c0_273, %c0_274] : memref<4x32x128xbf16, #tpu.memory_space<vmem>>, vector<1x32x128xbf16>
    %702 = vector.shape_cast %701 : vector<1x32x128xbf16> to vector<32x128xbf16>
    %cst_275 = arith.constant dense<0.000000e+00> : vector<2x128xf32>
    %703 = tpu.matmul %700, %702, %cst_275 {dimension_numbers = #tpu.dot_dimension_numbers<[1], [0], [0], [1], [0, 0, 1, 1], [], []>} : vector<2x32xbf16>, vector<32x128xbf16>, vector<2x128xf32> -> vector<2x128xf32>
    %704 = arith.addf %699, %703 : vector<2x128xf32>
    %c3_276 = arith.constant 3 : index
    %c0_277 = arith.constant 0 : index
    %c0_278 = arith.constant 0 : index
    %705 = vector.load %arg5[%c3_276, %c0_277, %c0_278] : memref<4x1x128xf32, #tpu.memory_space<vmem>>, vector<1x1x128xf32>
    %706 = vector.shape_cast %705 : vector<1x1x128xf32> to vector<1x128xf32>
    %707 = vector.broadcast %706 : vector<1x128xf32> to vector<2x128xf32>
    %708 = arith.addf %704, %707 : vector<2x128xf32>
    %709 = vector.extract_strided_slice %708 {offsets = [0, 0], sizes = [2, 96], strides = [1, 1]} : vector<2x128xf32> to vector<2x96xf32>
    %710 = arith.negf %709 : vector<2x96xf32>
    %711 = math.exp %710 : vector<2x96xf32>
    %cst_279 = arith.constant 1.000000e+00 : f32
    %712 = vector.broadcast %cst_279 : f32 to vector<2x96xf32>
    %713 = arith.addf %712, %711 : vector<2x96xf32>
    %714 = arith.divf %712, %713 : vector<2x96xf32>
    %715 = vector.extract_strided_slice %714 {offsets = [0, 0], sizes = [2, 32], strides = [1, 1]} : vector<2x96xf32> to vector<2x32xf32>
    %716 = vector.extract_strided_slice %714 {offsets = [0, 32], sizes = [2, 32], strides = [1, 1]} : vector<2x96xf32> to vector<2x32xf32>
    %717 = vector.extract_strided_slice %714 {offsets = [0, 64], sizes = [2, 32], strides = [1, 1]} : vector<2x96xf32> to vector<2x32xf32>
    %718 = vector.extract_strided_slice %708 {offsets = [0, 96], sizes = [2, 32], strides = [1, 1]} : vector<2x128xf32> to vector<2x32xf32>
    %719 = math.tanh %718 : vector<2x32xf32>
    %720 = arith.mulf %716, %606 : vector<2x32xf32>
    %721 = arith.mulf %715, %719 : vector<2x32xf32>
    %722 = arith.addf %720, %721 : vector<2x32xf32>
    %723 = math.tanh %722 : vector<2x32xf32>
    %724 = arith.mulf %717, %723 : vector<2x32xf32>
    %c8 = arith.constant 8 : index
    %c0_280 = arith.constant 0 : index
    %725 = vector.load %arg6[%c8, %c0_280] : memref<16x32xf32, #tpu.memory_space<vmem>>, vector<2x32xf32>
    tpu.vector_store %arg6[%c8, %c0_280], %724 {strides = array<i32>} : memref<16x32xf32, #tpu.memory_space<vmem>>, vector<2x32xf32>,
    %726 = arith.truncf %631 : vector<2x32xf32> to vector<2x32xbf16>
    %c1_281 = arith.constant 1 : index
    %c0_282 = arith.constant 0 : index
    %c0_283 = arith.constant 0 : index
    %727 = vector.load %arg3[%c1_281, %c0_282, %c0_283] : memref<4x32x128xbf16, #tpu.memory_space<vmem>>, vector<1x32x128xbf16>
    %728 = vector.shape_cast %727 : vector<1x32x128xbf16> to vector<32x128xbf16>
    %cst_284 = arith.constant dense<0.000000e+00> : vector<2x128xf32>
    %729 = tpu.matmul %726, %728, %cst_284 {dimension_numbers = #tpu.dot_dimension_numbers<[1], [0], [0], [1], [0, 0, 1, 1], [], []>} : vector<2x32xbf16>, vector<32x128xbf16>, vector<2x128xf32> -> vector<2x128xf32>
    %730 = arith.truncf %666 : vector<2x32xf32> to vector<2x32xbf16>
    %c1_285 = arith.constant 1 : index
    %c0_286 = arith.constant 0 : index
    %c0_287 = arith.constant 0 : index
    %731 = vector.load %arg4[%c1_285, %c0_286, %c0_287] : memref<4x32x128xbf16, #tpu.memory_space<vmem>>, vector<1x32x128xbf16>
    %732 = vector.shape_cast %731 : vector<1x32x128xbf16> to vector<32x128xbf16>
    %cst_288 = arith.constant dense<0.000000e+00> : vector<2x128xf32>
    %733 = tpu.matmul %730, %732, %cst_288 {dimension_numbers = #tpu.dot_dimension_numbers<[1], [0], [0], [1], [0, 0, 1, 1], [], []>} : vector<2x32xbf16>, vector<32x128xbf16>, vector<2x128xf32> -> vector<2x128xf32>
    %734 = arith.addf %729, %733 : vector<2x128xf32>
    %c1_289 = arith.constant 1 : index
    %c0_290 = arith.constant 0 : index
    %c0_291 = arith.constant 0 : index
    %735 = vector.load %arg5[%c1_289, %c0_290, %c0_291] : memref<4x1x128xf32, #tpu.memory_space<vmem>>, vector<1x1x128xf32>
    %736 = vector.shape_cast %735 : vector<1x1x128xf32> to vector<1x128xf32>
    %737 = vector.broadcast %736 : vector<1x128xf32> to vector<2x128xf32>
    %738 = arith.addf %734, %737 : vector<2x128xf32>
    %739 = vector.extract_strided_slice %738 {offsets = [0, 0], sizes = [2, 96], strides = [1, 1]} : vector<2x128xf32> to vector<2x96xf32>
    %740 = arith.negf %739 : vector<2x96xf32>
    %741 = math.exp %740 : vector<2x96xf32>
    %cst_292 = arith.constant 1.000000e+00 : f32
    %742 = vector.broadcast %cst_292 : f32 to vector<2x96xf32>
    %743 = arith.addf %742, %741 : vector<2x96xf32>
    %744 = arith.divf %742, %743 : vector<2x96xf32>
    %745 = vector.extract_strided_slice %744 {offsets = [0, 0], sizes = [2, 32], strides = [1, 1]} : vector<2x96xf32> to vector<2x32xf32>
    %746 = vector.extract_strided_slice %744 {offsets = [0, 32], sizes = [2, 32], strides = [1, 1]} : vector<2x96xf32> to vector<2x32xf32>
    %747 = vector.extract_strided_slice %744 {offsets = [0, 64], sizes = [2, 32], strides = [1, 1]} : vector<2x96xf32> to vector<2x32xf32>
    %748 = vector.extract_strided_slice %738 {offsets = [0, 96], sizes = [2, 32], strides = [1, 1]} : vector<2x128xf32> to vector<2x32xf32>
    %749 = math.tanh %748 : vector<2x32xf32>
    %750 = arith.mulf %746, %664 : vector<2x32xf32>
    %751 = arith.mulf %745, %749 : vector<2x32xf32>
    %752 = arith.addf %750, %751 : vector<2x32xf32>
    %753 = math.tanh %752 : vector<2x32xf32>
    %754 = arith.mulf %747, %753 : vector<2x32xf32>
    %c1_293 = arith.constant 1 : index
    %c0_294 = arith.constant 0 : index
    %c0_295 = arith.constant 0 : index
    %755 = vector.load %arg7[%c1_293, %c0_294, %c0_295] : memref<4x2x32xf32, #tpu.memory_space<vmem>>, vector<1x2x32xf32>
    %756 = vector.shape_cast %755 : vector<1x2x32xf32> to vector<2x32xf32>
    %757 = vector.shape_cast %754 : vector<2x32xf32> to vector<1x2x32xf32>
    tpu.vector_store %arg7[%c1_293, %c0_294, %c0_295], %757 {strides = array<i32>} : memref<4x2x32xf32, #tpu.memory_space<vmem>>, vector<1x2x32xf32>,
    %c1_296 = arith.constant 1 : index
    %c0_297 = arith.constant 0 : index
    %c0_298 = arith.constant 0 : index
    %758 = vector.load %arg8[%c1_296, %c0_297, %c0_298] : memref<4x2x32xf32, #tpu.memory_space<vmem>>, vector<1x2x32xf32>
    %759 = vector.shape_cast %758 : vector<1x2x32xf32> to vector<2x32xf32>
    %760 = vector.shape_cast %752 : vector<2x32xf32> to vector<1x2x32xf32>
    tpu.vector_store %arg8[%c1_296, %c0_297, %c0_298], %760 {strides = array<i32>} : memref<4x2x32xf32, #tpu.memory_space<vmem>>, vector<1x2x32xf32>,
    %761 = arith.truncf %666 : vector<2x32xf32> to vector<2x32xbf16>
    %c2_299 = arith.constant 2 : index
    %c0_300 = arith.constant 0 : index
    %c0_301 = arith.constant 0 : index
    %762 = vector.load %arg3[%c2_299, %c0_300, %c0_301] : memref<4x32x128xbf16, #tpu.memory_space<vmem>>, vector<1x32x128xbf16>
    %763 = vector.shape_cast %762 : vector<1x32x128xbf16> to vector<32x128xbf16>
    %cst_302 = arith.constant dense<0.000000e+00> : vector<2x128xf32>
    %764 = tpu.matmul %761, %763, %cst_302 {dimension_numbers = #tpu.dot_dimension_numbers<[1], [0], [0], [1], [0, 0, 1, 1], [], []>} : vector<2x32xbf16>, vector<32x128xbf16>, vector<2x128xf32> -> vector<2x128xf32>
    %765 = arith.truncf %695 : vector<2x32xf32> to vector<2x32xbf16>
    %c2_303 = arith.constant 2 : index
    %c0_304 = arith.constant 0 : index
    %c0_305 = arith.constant 0 : index
    %766 = vector.load %arg4[%c2_303, %c0_304, %c0_305] : memref<4x32x128xbf16, #tpu.memory_space<vmem>>, vector<1x32x128xbf16>
    %767 = vector.shape_cast %766 : vector<1x32x128xbf16> to vector<32x128xbf16>
    %cst_306 = arith.constant dense<0.000000e+00> : vector<2x128xf32>
    %768 = tpu.matmul %765, %767, %cst_306 {dimension_numbers = #tpu.dot_dimension_numbers<[1], [0], [0], [1], [0, 0, 1, 1], [], []>} : vector<2x32xbf16>, vector<32x128xbf16>, vector<2x128xf32> -> vector<2x128xf32>
    %769 = arith.addf %764, %768 : vector<2x128xf32>
    %c2_307 = arith.constant 2 : index
    %c0_308 = arith.constant 0 : index
    %c0_309 = arith.constant 0 : index
    %770 = vector.load %arg5[%c2_307, %c0_308, %c0_309] : memref<4x1x128xf32, #tpu.memory_space<vmem>>, vector<1x1x128xf32>
    %771 = vector.shape_cast %770 : vector<1x1x128xf32> to vector<1x128xf32>
    %772 = vector.broadcast %771 : vector<1x128xf32> to vector<2x128xf32>
    %773 = arith.addf %769, %772 : vector<2x128xf32>
    %774 = vector.extract_strided_slice %773 {offsets = [0, 0], sizes = [2, 96], strides = [1, 1]} : vector<2x128xf32> to vector<2x96xf32>
    %775 = arith.negf %774 : vector<2x96xf32>
    %776 = math.exp %775 : vector<2x96xf32>
    %cst_310 = arith.constant 1.000000e+00 : f32
    %777 = vector.broadcast %cst_310 : f32 to vector<2x96xf32>
    %778 = arith.addf %777, %776 : vector<2x96xf32>
    %779 = arith.divf %777, %778 : vector<2x96xf32>
    %780 = vector.extract_strided_slice %779 {offsets = [0, 0], sizes = [2, 32], strides = [1, 1]} : vector<2x96xf32> to vector<2x32xf32>
    %781 = vector.extract_strided_slice %779 {offsets = [0, 32], sizes = [2, 32], strides = [1, 1]} : vector<2x96xf32> to vector<2x32xf32>
    %782 = vector.extract_strided_slice %779 {offsets = [0, 64], sizes = [2, 32], strides = [1, 1]} : vector<2x96xf32> to vector<2x32xf32>
    %783 = vector.extract_strided_slice %773 {offsets = [0, 96], sizes = [2, 32], strides = [1, 1]} : vector<2x128xf32> to vector<2x32xf32>
    %784 = math.tanh %783 : vector<2x32xf32>
    %785 = arith.mulf %781, %693 : vector<2x32xf32>
    %786 = arith.mulf %780, %784 : vector<2x32xf32>
    %787 = arith.addf %785, %786 : vector<2x32xf32>
    %788 = math.tanh %787 : vector<2x32xf32>
    %789 = arith.mulf %782, %788 : vector<2x32xf32>
    %790 = arith.truncf %695 : vector<2x32xf32> to vector<2x32xbf16>
    %c3_311 = arith.constant 3 : index
    %c0_312 = arith.constant 0 : index
    %c0_313 = arith.constant 0 : index
    %791 = vector.load %arg3[%c3_311, %c0_312, %c0_313] : memref<4x32x128xbf16, #tpu.memory_space<vmem>>, vector<1x32x128xbf16>
    %792 = vector.shape_cast %791 : vector<1x32x128xbf16> to vector<32x128xbf16>
    %cst_314 = arith.constant dense<0.000000e+00> : vector<2x128xf32>
    %793 = tpu.matmul %790, %792, %cst_314 {dimension_numbers = #tpu.dot_dimension_numbers<[1], [0], [0], [1], [0, 0, 1, 1], [], []>} : vector<2x32xbf16>, vector<32x128xbf16>, vector<2x128xf32> -> vector<2x128xf32>
    %794 = arith.truncf %724 : vector<2x32xf32> to vector<2x32xbf16>
    %c3_315 = arith.constant 3 : index
    %c0_316 = arith.constant 0 : index
    %c0_317 = arith.constant 0 : index
    %795 = vector.load %arg4[%c3_315, %c0_316, %c0_317] : memref<4x32x128xbf16, #tpu.memory_space<vmem>>, vector<1x32x128xbf16>
    %796 = vector.shape_cast %795 : vector<1x32x128xbf16> to vector<32x128xbf16>
    %cst_318 = arith.constant dense<0.000000e+00> : vector<2x128xf32>
    %797 = tpu.matmul %794, %796, %cst_318 {dimension_numbers = #tpu.dot_dimension_numbers<[1], [0], [0], [1], [0, 0, 1, 1], [], []>} : vector<2x32xbf16>, vector<32x128xbf16>, vector<2x128xf32> -> vector<2x128xf32>
    %798 = arith.addf %793, %797 : vector<2x128xf32>
    %c3_319 = arith.constant 3 : index
    %c0_320 = arith.constant 0 : index
    %c0_321 = arith.constant 0 : index
    %799 = vector.load %arg5[%c3_319, %c0_320, %c0_321] : memref<4x1x128xf32, #tpu.memory_space<vmem>>, vector<1x1x128xf32>
    %800 = vector.shape_cast %799 : vector<1x1x128xf32> to vector<1x128xf32>
    %801 = vector.broadcast %800 : vector<1x128xf32> to vector<2x128xf32>
    %802 = arith.addf %798, %801 : vector<2x128xf32>
    %803 = vector.extract_strided_slice %802 {offsets = [0, 0], sizes = [2, 96], strides = [1, 1]} : vector<2x128xf32> to vector<2x96xf32>
    %804 = arith.negf %803 : vector<2x96xf32>
    %805 = math.exp %804 : vector<2x96xf32>
    %cst_322 = arith.constant 1.000000e+00 : f32
    %806 = vector.broadcast %cst_322 : f32 to vector<2x96xf32>
    %807 = arith.addf %806, %805 : vector<2x96xf32>
    %808 = arith.divf %806, %807 : vector<2x96xf32>
    %809 = vector.extract_strided_slice %808 {offsets = [0, 0], sizes = [2, 32], strides = [1, 1]} : vector<2x96xf32> to vector<2x32xf32>
    %810 = vector.extract_strided_slice %808 {offsets = [0, 32], sizes = [2, 32], strides = [1, 1]} : vector<2x96xf32> to vector<2x32xf32>
    %811 = vector.extract_strided_slice %808 {offsets = [0, 64], sizes = [2, 32], strides = [1, 1]} : vector<2x96xf32> to vector<2x32xf32>
    %812 = vector.extract_strided_slice %802 {offsets = [0, 96], sizes = [2, 32], strides = [1, 1]} : vector<2x128xf32> to vector<2x32xf32>
    %813 = math.tanh %812 : vector<2x32xf32>
    %814 = arith.mulf %810, %722 : vector<2x32xf32>
    %815 = arith.mulf %809, %813 : vector<2x32xf32>
    %816 = arith.addf %814, %815 : vector<2x32xf32>
    %817 = math.tanh %816 : vector<2x32xf32>
    %818 = arith.mulf %811, %817 : vector<2x32xf32>
    %c10 = arith.constant 10 : index
    %c0_323 = arith.constant 0 : index
    %819 = vector.load %arg6[%c10, %c0_323] : memref<16x32xf32, #tpu.memory_space<vmem>>, vector<2x32xf32>
    tpu.vector_store %arg6[%c10, %c0_323], %818 {strides = array<i32>} : memref<16x32xf32, #tpu.memory_space<vmem>>, vector<2x32xf32>,
    %820 = arith.truncf %754 : vector<2x32xf32> to vector<2x32xbf16>
    %c2_324 = arith.constant 2 : index
    %c0_325 = arith.constant 0 : index
    %c0_326 = arith.constant 0 : index
    %821 = vector.load %arg3[%c2_324, %c0_325, %c0_326] : memref<4x32x128xbf16, #tpu.memory_space<vmem>>, vector<1x32x128xbf16>
    %822 = vector.shape_cast %821 : vector<1x32x128xbf16> to vector<32x128xbf16>
    %cst_327 = arith.constant dense<0.000000e+00> : vector<2x128xf32>
    %823 = tpu.matmul %820, %822, %cst_327 {dimension_numbers = #tpu.dot_dimension_numbers<[1], [0], [0], [1], [0, 0, 1, 1], [], []>} : vector<2x32xbf16>, vector<32x128xbf16>, vector<2x128xf32> -> vector<2x128xf32>
    %824 = arith.truncf %789 : vector<2x32xf32> to vector<2x32xbf16>
    %c2_328 = arith.constant 2 : index
    %c0_329 = arith.constant 0 : index
    %c0_330 = arith.constant 0 : index
    %825 = vector.load %arg4[%c2_328, %c0_329, %c0_330] : memref<4x32x128xbf16, #tpu.memory_space<vmem>>, vector<1x32x128xbf16>
    %826 = vector.shape_cast %825 : vector<1x32x128xbf16> to vector<32x128xbf16>
    %cst_331 = arith.constant dense<0.000000e+00> : vector<2x128xf32>
    %827 = tpu.matmul %824, %826, %cst_331 {dimension_numbers = #tpu.dot_dimension_numbers<[1], [0], [0], [1], [0, 0, 1, 1], [], []>} : vector<2x32xbf16>, vector<32x128xbf16>, vector<2x128xf32> -> vector<2x128xf32>
    %828 = arith.addf %823, %827 : vector<2x128xf32>
    %c2_332 = arith.constant 2 : index
    %c0_333 = arith.constant 0 : index
    %c0_334 = arith.constant 0 : index
    %829 = vector.load %arg5[%c2_332, %c0_333, %c0_334] : memref<4x1x128xf32, #tpu.memory_space<vmem>>, vector<1x1x128xf32>
    %830 = vector.shape_cast %829 : vector<1x1x128xf32> to vector<1x128xf32>
    %831 = vector.broadcast %830 : vector<1x128xf32> to vector<2x128xf32>
    %832 = arith.addf %828, %831 : vector<2x128xf32>
    %833 = vector.extract_strided_slice %832 {offsets = [0, 0], sizes = [2, 96], strides = [1, 1]} : vector<2x128xf32> to vector<2x96xf32>
    %834 = arith.negf %833 : vector<2x96xf32>
    %835 = math.exp %834 : vector<2x96xf32>
    %cst_335 = arith.constant 1.000000e+00 : f32
    %836 = vector.broadcast %cst_335 : f32 to vector<2x96xf32>
    %837 = arith.addf %836, %835 : vector<2x96xf32>
    %838 = arith.divf %836, %837 : vector<2x96xf32>
    %839 = vector.extract_strided_slice %838 {offsets = [0, 0], sizes = [2, 32], strides = [1, 1]} : vector<2x96xf32> to vector<2x32xf32>
    %840 = vector.extract_strided_slice %838 {offsets = [0, 32], sizes = [2, 32], strides = [1, 1]} : vector<2x96xf32> to vector<2x32xf32>
    %841 = vector.extract_strided_slice %838 {offsets = [0, 64], sizes = [2, 32], strides = [1, 1]} : vector<2x96xf32> to vector<2x32xf32>
    %842 = vector.extract_strided_slice %832 {offsets = [0, 96], sizes = [2, 32], strides = [1, 1]} : vector<2x128xf32> to vector<2x32xf32>
    %843 = math.tanh %842 : vector<2x32xf32>
    %844 = arith.mulf %840, %787 : vector<2x32xf32>
    %845 = arith.mulf %839, %843 : vector<2x32xf32>
    %846 = arith.addf %844, %845 : vector<2x32xf32>
    %847 = math.tanh %846 : vector<2x32xf32>
    %848 = arith.mulf %841, %847 : vector<2x32xf32>
    %c2_336 = arith.constant 2 : index
    %c0_337 = arith.constant 0 : index
    %c0_338 = arith.constant 0 : index
    %849 = vector.load %arg7[%c2_336, %c0_337, %c0_338] : memref<4x2x32xf32, #tpu.memory_space<vmem>>, vector<1x2x32xf32>
    %850 = vector.shape_cast %849 : vector<1x2x32xf32> to vector<2x32xf32>
    %851 = vector.shape_cast %848 : vector<2x32xf32> to vector<1x2x32xf32>
    tpu.vector_store %arg7[%c2_336, %c0_337, %c0_338], %851 {strides = array<i32>} : memref<4x2x32xf32, #tpu.memory_space<vmem>>, vector<1x2x32xf32>,
    %c2_339 = arith.constant 2 : index
    %c0_340 = arith.constant 0 : index
    %c0_341 = arith.constant 0 : index
    %852 = vector.load %arg8[%c2_339, %c0_340, %c0_341] : memref<4x2x32xf32, #tpu.memory_space<vmem>>, vector<1x2x32xf32>
    %853 = vector.shape_cast %852 : vector<1x2x32xf32> to vector<2x32xf32>
    %854 = vector.shape_cast %846 : vector<2x32xf32> to vector<1x2x32xf32>
    tpu.vector_store %arg8[%c2_339, %c0_340, %c0_341], %854 {strides = array<i32>} : memref<4x2x32xf32, #tpu.memory_space<vmem>>, vector<1x2x32xf32>,
    %855 = arith.truncf %789 : vector<2x32xf32> to vector<2x32xbf16>
    %c3_342 = arith.constant 3 : index
    %c0_343 = arith.constant 0 : index
    %c0_344 = arith.constant 0 : index
    %856 = vector.load %arg3[%c3_342, %c0_343, %c0_344] : memref<4x32x128xbf16, #tpu.memory_space<vmem>>, vector<1x32x128xbf16>
    %857 = vector.shape_cast %856 : vector<1x32x128xbf16> to vector<32x128xbf16>
    %cst_345 = arith.constant dense<0.000000e+00> : vector<2x128xf32>
    %858 = tpu.matmul %855, %857, %cst_345 {dimension_numbers = #tpu.dot_dimension_numbers<[1], [0], [0], [1], [0, 0, 1, 1], [], []>} : vector<2x32xbf16>, vector<32x128xbf16>, vector<2x128xf32> -> vector<2x128xf32>
    %859 = arith.truncf %818 : vector<2x32xf32> to vector<2x32xbf16>
    %c3_346 = arith.constant 3 : index
    %c0_347 = arith.constant 0 : index
    %c0_348 = arith.constant 0 : index
    %860 = vector.load %arg4[%c3_346, %c0_347, %c0_348] : memref<4x32x128xbf16, #tpu.memory_space<vmem>>, vector<1x32x128xbf16>
    %861 = vector.shape_cast %860 : vector<1x32x128xbf16> to vector<32x128xbf16>
    %cst_349 = arith.constant dense<0.000000e+00> : vector<2x128xf32>
    %862 = tpu.matmul %859, %861, %cst_349 {dimension_numbers = #tpu.dot_dimension_numbers<[1], [0], [0], [1], [0, 0, 1, 1], [], []>} : vector<2x32xbf16>, vector<32x128xbf16>, vector<2x128xf32> -> vector<2x128xf32>
    %863 = arith.addf %858, %862 : vector<2x128xf32>
    %c3_350 = arith.constant 3 : index
    %c0_351 = arith.constant 0 : index
    %c0_352 = arith.constant 0 : index
    %864 = vector.load %arg5[%c3_350, %c0_351, %c0_352] : memref<4x1x128xf32, #tpu.memory_space<vmem>>, vector<1x1x128xf32>
    %865 = vector.shape_cast %864 : vector<1x1x128xf32> to vector<1x128xf32>
    %866 = vector.broadcast %865 : vector<1x128xf32> to vector<2x128xf32>
    %867 = arith.addf %863, %866 : vector<2x128xf32>
    %868 = vector.extract_strided_slice %867 {offsets = [0, 0], sizes = [2, 96], strides = [1, 1]} : vector<2x128xf32> to vector<2x96xf32>
    %869 = arith.negf %868 : vector<2x96xf32>
    %870 = math.exp %869 : vector<2x96xf32>
    %cst_353 = arith.constant 1.000000e+00 : f32
    %871 = vector.broadcast %cst_353 : f32 to vector<2x96xf32>
    %872 = arith.addf %871, %870 : vector<2x96xf32>
    %873 = arith.divf %871, %872 : vector<2x96xf32>
    %874 = vector.extract_strided_slice %873 {offsets = [0, 0], sizes = [2, 32], strides = [1, 1]} : vector<2x96xf32> to vector<2x32xf32>
    %875 = vector.extract_strided_slice %873 {offsets = [0, 32], sizes = [2, 32], strides = [1, 1]} : vector<2x96xf32> to vector<2x32xf32>
    %876 = vector.extract_strided_slice %873 {offsets = [0, 64], sizes = [2, 32], strides = [1, 1]} : vector<2x96xf32> to vector<2x32xf32>
    %877 = vector.extract_strided_slice %867 {offsets = [0, 96], sizes = [2, 32], strides = [1, 1]} : vector<2x128xf32> to vector<2x32xf32>
    %878 = math.tanh %877 : vector<2x32xf32>
    %879 = arith.mulf %875, %816 : vector<2x32xf32>
    %880 = arith.mulf %874, %878 : vector<2x32xf32>
    %881 = arith.addf %879, %880 : vector<2x32xf32>
    %882 = math.tanh %881 : vector<2x32xf32>
    %883 = arith.mulf %876, %882 : vector<2x32xf32>
    %c12 = arith.constant 12 : index
    %c0_354 = arith.constant 0 : index
    %884 = vector.load %arg6[%c12, %c0_354] : memref<16x32xf32, #tpu.memory_space<vmem>>, vector<2x32xf32>
    tpu.vector_store %arg6[%c12, %c0_354], %883 {strides = array<i32>} : memref<16x32xf32, #tpu.memory_space<vmem>>, vector<2x32xf32>,
    %885 = arith.truncf %848 : vector<2x32xf32> to vector<2x32xbf16>
    %c3_355 = arith.constant 3 : index
    %c0_356 = arith.constant 0 : index
    %c0_357 = arith.constant 0 : index
    %886 = vector.load %arg3[%c3_355, %c0_356, %c0_357] : memref<4x32x128xbf16, #tpu.memory_space<vmem>>, vector<1x32x128xbf16>
    %887 = vector.shape_cast %886 : vector<1x32x128xbf16> to vector<32x128xbf16>
    %cst_358 = arith.constant dense<0.000000e+00> : vector<2x128xf32>
    %888 = tpu.matmul %885, %887, %cst_358 {dimension_numbers = #tpu.dot_dimension_numbers<[1], [0], [0], [1], [0, 0, 1, 1], [], []>} : vector<2x32xbf16>, vector<32x128xbf16>, vector<2x128xf32> -> vector<2x128xf32>
    %889 = arith.truncf %883 : vector<2x32xf32> to vector<2x32xbf16>
    %c3_359 = arith.constant 3 : index
    %c0_360 = arith.constant 0 : index
    %c0_361 = arith.constant 0 : index
    %890 = vector.load %arg4[%c3_359, %c0_360, %c0_361] : memref<4x32x128xbf16, #tpu.memory_space<vmem>>, vector<1x32x128xbf16>
    %891 = vector.shape_cast %890 : vector<1x32x128xbf16> to vector<32x128xbf16>
    %cst_362 = arith.constant dense<0.000000e+00> : vector<2x128xf32>
    %892 = tpu.matmul %889, %891, %cst_362 {dimension_numbers = #tpu.dot_dimension_numbers<[1], [0], [0], [1], [0, 0, 1, 1], [], []>} : vector<2x32xbf16>, vector<32x128xbf16>, vector<2x128xf32> -> vector<2x128xf32>
    %893 = arith.addf %888, %892 : vector<2x128xf32>
    %c3_363 = arith.constant 3 : index
    %c0_364 = arith.constant 0 : index
    %c0_365 = arith.constant 0 : index
    %894 = vector.load %arg5[%c3_363, %c0_364, %c0_365] : memref<4x1x128xf32, #tpu.memory_space<vmem>>, vector<1x1x128xf32>
    %895 = vector.shape_cast %894 : vector<1x1x128xf32> to vector<1x128xf32>
    %896 = vector.broadcast %895 : vector<1x128xf32> to vector<2x128xf32>
    %897 = arith.addf %893, %896 : vector<2x128xf32>
    %898 = vector.extract_strided_slice %897 {offsets = [0, 0], sizes = [2, 96], strides = [1, 1]} : vector<2x128xf32> to vector<2x96xf32>
    %899 = arith.negf %898 : vector<2x96xf32>
    %900 = math.exp %899 : vector<2x96xf32>
    %cst_366 = arith.constant 1.000000e+00 : f32
    %901 = vector.broadcast %cst_366 : f32 to vector<2x96xf32>
    %902 = arith.addf %901, %900 : vector<2x96xf32>
    %903 = arith.divf %901, %902 : vector<2x96xf32>
    %904 = vector.extract_strided_slice %903 {offsets = [0, 0], sizes = [2, 32], strides = [1, 1]} : vector<2x96xf32> to vector<2x32xf32>
    %905 = vector.extract_strided_slice %903 {offsets = [0, 32], sizes = [2, 32], strides = [1, 1]} : vector<2x96xf32> to vector<2x32xf32>
    %906 = vector.extract_strided_slice %903 {offsets = [0, 64], sizes = [2, 32], strides = [1, 1]} : vector<2x96xf32> to vector<2x32xf32>
    %907 = vector.extract_strided_slice %897 {offsets = [0, 96], sizes = [2, 32], strides = [1, 1]} : vector<2x128xf32> to vector<2x32xf32>
    %908 = math.tanh %907 : vector<2x32xf32>
    %909 = arith.mulf %905, %881 : vector<2x32xf32>
    %910 = arith.mulf %904, %908 : vector<2x32xf32>
    %911 = arith.addf %909, %910 : vector<2x32xf32>
    %912 = math.tanh %911 : vector<2x32xf32>
    %913 = arith.mulf %906, %912 : vector<2x32xf32>
    %c14 = arith.constant 14 : index
    %c0_367 = arith.constant 0 : index
    %914 = vector.load %arg6[%c14, %c0_367] : memref<16x32xf32, #tpu.memory_space<vmem>>, vector<2x32xf32>
    tpu.vector_store %arg6[%c14, %c0_367], %913 {strides = array<i32>} : memref<16x32xf32, #tpu.memory_space<vmem>>, vector<2x32xf32>,
    %c3_368 = arith.constant 3 : index
    %c0_369 = arith.constant 0 : index
    %c0_370 = arith.constant 0 : index
    %915 = vector.load %arg7[%c3_368, %c0_369, %c0_370] : memref<4x2x32xf32, #tpu.memory_space<vmem>>, vector<1x2x32xf32>
    %916 = vector.shape_cast %915 : vector<1x2x32xf32> to vector<2x32xf32>
    %917 = vector.shape_cast %913 : vector<2x32xf32> to vector<1x2x32xf32>
    tpu.vector_store %arg7[%c3_368, %c0_369, %c0_370], %917 {strides = array<i32>} : memref<4x2x32xf32, #tpu.memory_space<vmem>>, vector<1x2x32xf32>,
    %c3_371 = arith.constant 3 : index
    %c0_372 = arith.constant 0 : index
    %c0_373 = arith.constant 0 : index
    %918 = vector.load %arg8[%c3_371, %c0_372, %c0_373] : memref<4x2x32xf32, #tpu.memory_space<vmem>>, vector<1x2x32xf32>
    %919 = vector.shape_cast %918 : vector<1x2x32xf32> to vector<2x32xf32>
    %920 = vector.shape_cast %911 : vector<2x32xf32> to vector<1x2x32xf32>
    tpu.vector_store %arg8[%c3_371, %c0_372, %c0_373], %920 {strides = array<i32>} : memref<4x2x32xf32, #tpu.memory_space<vmem>>, vector<1x2x32xf32>,
    return
  }
}

</mosaic_0001>

<bundles_post_ra>
// kernel: encoder_forward.1
= control target key start
LH: loop header
LB: loop body
LE: loop exit
PB: predicated region body
PF: predicated region fallthrough
CT: control target
= control target key end

     0   :  { %14 = vsyncpa [#allocation3], 0  ;;  %v8279_v8 = vmov 0   ;;  %vm427_vm0 = vcmask 261120   ;;  %s10017_s0 = inlined_call_operand.vmem [shape: bf16[32,4096], index: 0, kind: input, shape index: {}]   ;;  %s10018_s1 = inlined_call_operand.vmem [shape: bf16[32,32], index: 1, kind: input, shape index: {}]   ;;  %s10019_s2 = inlined_call_operand.vmem [shape: bf16[16,4096], index: 2, kind: input, shape index: {}]   ;;  %s10020_s3 = inlined_call_operand.vmem [shape: bf16[4,32,128], index: 3, kind: input, shape index: {}]   ;;  %s10021_s4 = inlined_call_operand.vmem [shape: bf16[4,32,128], index: 4, kind: input, shape index: {}]   ;;  %s10022_s5 = inlined_call_operand.vmem [shape: f32[4,1,128], index: 5, kind: input, shape index: {}]   ;;  %s10023_s6 = inlined_call_operand.vmem [shape: f32[16,32], index: 6, kind: output, shape index: {0}]   ;;  %s10024_s7 = inlined_call_operand.hbm [shape: f32[4,2,32], index: 7, kind: output, shape index: {1}]   ;;  %s10025_s8 = inlined_call_operand.hbm [shape: f32[4,2,32], index: 8, kind: output, shape index: {2}]  }
   0x1   :  { %v65_v0 = vld [vmem:[%s10017_s0 + $0x100] sm:$0xff]  ;;  %v66_v2 = vld [vmem:[%s10017_s0 + $0x108] sm:$0xff]  ;;  %466 = vmatprep.mubr.bf16.mxu0 %v8279_v8  ;;  %519 = vmatprep.mubr.bf16.mxu1 %v8279_v8  ;;  %v67_v15 = vld [vmem:[%s10017_s0 + $0x110] sm:$0xff] }
   0x2   :  { %v81_v1 = vld [vmem:[%s10017_s0 + $0x180] sm:$0xff]  ;;  %v82_v4 = vld [vmem:[%s10017_s0 + $0x188] sm:$0xff]  ;;  %v83_v17 = vld [vmem:[%s10017_s0 + $0x190] sm:$0xff] }
   0x3   :  { %v6758_v3 = vcombine.high %v65_v0, %v81_v1  ;;  %v6757_v5 = vcombine.low %v65_v0, %v81_v1  ;;  %v33_v6 = vld [vmem:[%s10017_s0] sm:$0xff]  ;;  %v6760_v9 = vcombine.high %v66_v2, %v82_v4  ;;  %v6759_v10 = vcombine.low %v66_v2, %v82_v4  ;;  %v34_v12 = vld [vmem:[%s10017_s0 + $0x8] sm:$0xff]  ;;  %v68_v18 = vld [vmem:[%s10017_s0 + $0x118] sm:$0xff] }
   0x4   :  { %v49_v7 = vld [vmem:[%s10017_s0 + $0x80] sm:$0xff]  ;;  %v50_v13 = vld [vmem:[%s10017_s0 + $0x88] sm:$0xff]  ;;  %v84_v19 = vld [vmem:[%s10017_s0 + $0x198] sm:$0xff]  ;;  %v6762_v21 = vcombine.high %v67_v15, %v83_v17  ;;  %v6761_v26 = vcombine.low %v67_v15, %v83_v17 }
   0x5   :  { %v6726_v11 = vcombine.high %v33_v6, %v49_v7  ;;  %446 = vmatprep.subr.bf16.mxu0 %v6758_v3  ;;  %v6728_v14 = vcombine.high %v34_v12, %v50_v13  ;;  %499 = vmatprep.subr.bf16.mxu1 %v6760_v9  ;;  %v6725_v16 = vcombine.low %v33_v6, %v49_v7  ;;  %v8374_v23 = vld [vmem:[%s10018_s1] sm:$0xff]   ;;  %v35_v24 = vld [vmem:[%s10017_s0 + $0x10] sm:$0xff]  ;;  %v36_v27 = vld [vmem:[%s10017_s0 + $0x18] sm:$0xff] }
   0x6   :  { %447 = vmatpush1.bf16.msra.mxu0 %v6757_v5  ;;  %500 = vmatpush1.bf16.msra.mxu1 %v6759_v10  ;;  %v6727_v20 = vcombine.low %v34_v12, %v50_v13  ;;  %v6764_v22 = vcombine.high %v68_v18, %v84_v19  ;;  %v51_v25 = vld [vmem:[%s10017_s0 + $0x90] sm:$0xff]  ;;  %v52_v28 = vld [vmem:[%s10017_s0 + $0x98] sm:$0xff]  ;;  %v6763_v29 = vcombine.low %v68_v18, %v84_v19  ;;  %v69_v31 = vld [vmem:[%s10017_s0 + $0x120] sm:$0xff] }
   0x7   :  { %448 = vmatprep.subr.bf16.mxu0 %v6726_v11  ;;  %501 = vmatprep.subr.bf16.mxu1 %v6728_v14  ;;  %v6730_v30 = vcombine.high %v35_v24, %v51_v25  ;;  %v85_v32 = vld [vmem:[%s10017_s0 + $0x1a0] sm:$0xff]  ;;  %v6732_v33 = vcombine.high %v36_v27, %v52_v28  ;;  %v70_v34 = vld [vmem:[%s10017_s0 + $0x128] sm:$0xff]  ;;  %v6729_v36 = vcombine.low %v35_v24, %v51_v25  ;;  %v71_v46 = vld [vmem:[%s10017_s0 + $0x130] sm:$0xff] }
   0x8   :  { %v86_v35 = vld [vmem:[%s10017_s0 + $0x1a8] sm:$0xff]  ;;  %v6731_v37 = vcombine.low %v36_v27, %v52_v28  ;;  %v6766_v38 = vcombine.high %v69_v31, %v85_v32  ;;  %v37_v41 = vld [vmem:[%s10017_s0 + $0x20] sm:$0xff]  ;;  %v6765_v45 = vcombine.low %v69_v31, %v85_v32  ;;  %v87_v47 = vld [vmem:[%s10017_s0 + $0x1b0] sm:$0xff] }
   0x9   :  { %v6768_v39 = vcombine.high %v70_v34, %v86_v35  ;;  %v8409_v40 = vld [vmem:[%s10018_s1 + $0x8] sm:$0xff]   ;;  %v53_v42 = vld [vmem:[%s10017_s0 + $0xa0] sm:$0xff]  ;;  %v6767_v48 = vcombine.low %v70_v34, %v86_v35  ;;  %v72_v49 = vld [vmem:[%s10017_s0 + $0x138] sm:$0xff]  ;;  %v6770_v55 = vcombine.high %v71_v46, %v87_v47  ;;  %v6769_v61 = vcombine.low %v71_v46, %v87_v47 }
   0xa   :  { %449 = vmatpush1.bf16.msra.mxu0 %v6725_v16  ;;  %502 = vmatpush1.bf16.msra.mxu1 %v6727_v20  ;;  %v38_v43 = vld [vmem:[%s10017_s0 + $0x28] sm:$0xff]  ;;  %v88_v50 = vld [vmem:[%s10017_s0 + $0x1b8] sm:$0xff]  ;;  %v6734_v51 = vcombine.high %v37_v41, %v53_v42  ;;  %v6733_v53 = vcombine.low %v37_v41, %v53_v42  ;;  %v39_v57 = vld [vmem:[%s10017_s0 + $0x30] sm:$0xff] }
   0xb   :  { %552 = vmatprep.subr.bf16.mxu0 %v6762_v21  ;;  %605 = vmatprep.subr.bf16.mxu1 %v6764_v22  ;;  %v54_v44 = vld [vmem:[%s10017_s0 + $0xa8] sm:$0xff]  ;;  %v6772_v56 = vcombine.high %v72_v49, %v88_v50  ;;  %v55_v58 = vld [vmem:[%s10017_s0 + $0xb0] sm:$0xff]  ;;  %v40_v59 = vld [vmem:[%s10017_s0 + $0x38] sm:$0xff]  ;;  %v6771_v0 = vcombine.low %v72_v49, %v88_v50 }
   0xc   :  { %v6736_v52 = vcombine.high %v38_v43, %v54_v44  ;;  %v6735_v54 = vcombine.low %v38_v43, %v54_v44  ;;  %v56_v60 = vld [vmem:[%s10017_s0 + $0xb8] sm:$0xff]  ;;  %v73_v62 = vld [vmem:[%s10017_s0 + $0x140] sm:$0xff]  ;;  %v74_v1 = vld [vmem:[%s10017_s0 + $0x148] sm:$0xff]  ;;  %v6738_v3 = vcombine.high %v39_v57, %v55_v58  ;;  %v6737_v5 = vcombine.low %v39_v57, %v55_v58 }
   0xd   :  { %6789 = vmatmul.mubr.msk.bf16.vlgmr.msra.gmra.mxu0 %vm427_vm0, %v8374_v23  ;;  %6791 = vmatmul.mubr.msk.bf16.vlgmr.msra.gmra.mxu1 %vm427_vm0, %v8374_v23  ;;  %v89_v63 = vld [vmem:[%s10017_s0 + $0x1c0] sm:$0xff]  ;;  %v90_v2 = vld [vmem:[%s10017_s0 + $0x1c8] sm:$0xff]  ;;  %v6740_v4 = vcombine.high %v40_v59, %v56_v60  ;;  %v6739_v6 = vcombine.low %v40_v59, %v56_v60  ;;  %v75_v15 = vld [vmem:[%s10017_s0 + $0x150] sm:$0xff] }
   0xe   :  { %553 = vmatpush1.bf16.msra.mxu0 %v6761_v26  ;;  %606 = vmatpush1.bf16.msra.mxu1 %v6763_v29  ;;  %v6774_v7 = vcombine.high %v73_v62, %v89_v63  ;;  %v6776_v9 = vcombine.high %v74_v1, %v90_v2  ;;  %v41_v10 = vld [vmem:[%s10017_s0 + $0x40] sm:$0xff]  ;;  %v42_v12 = vld [vmem:[%s10017_s0 + $0x48] sm:$0xff]  ;;  %v6773_v14 = vcombine.low %v73_v62, %v89_v63  ;;  %v91_v16 = vld [vmem:[%s10017_s0 + $0x1d0] sm:$0xff] }
   0xf   :  { %476 = vmatprep.mubr.bf16.mxu0 %v8279_v8  ;;  %529 = vmatprep.mubr.bf16.mxu1 %v8279_v8  ;;  %v57_v11 = vld [vmem:[%s10017_s0 + $0xc0] sm:$0xff]  ;;  %v58_v13 = vld [vmem:[%s10017_s0 + $0xc8] sm:$0xff]  ;;  %v6775_v17 = vcombine.low %v74_v1, %v90_v2  ;;  %v76_v18 = vld [vmem:[%s10017_s0 + $0x158] sm:$0xff]  ;;  %v6778_v25 = vcombine.high %v75_v15, %v91_v16  ;;  %v6777_v31 = vcombine.low %v75_v15, %v91_v16 }
  0x10   :  { %554 = vmatprep.subr.bf16.mxu0 %v6730_v30  ;;  %607 = vmatprep.subr.bf16.mxu1 %v6732_v33  ;;  %v92_v19 = vld [vmem:[%s10017_s0 + $0x1d8] sm:$0xff]  ;;  %v6742_v20 = vcombine.high %v41_v10, %v57_v11  ;;  %v6744_v21 = vcombine.high %v42_v12, %v58_v13  ;;  %v6741_v22 = vcombine.low %v41_v10, %v57_v11  ;;  %v43_v27 = vld [vmem:[%s10017_s0 + $0x50] sm:$0xff]  ;;  %v77_v32 = vld [vmem:[%s10017_s0 + $0x160] sm:$0xff] }
  0x11   :  { %v6743_v24 = vcombine.low %v42_v12, %v58_v13  ;;  %v6780_v26 = vcombine.high %v76_v18, %v92_v19  ;;  %v59_v28 = vld [vmem:[%s10017_s0 + $0xd0] sm:$0xff]  ;;  %v44_v29 = vld [vmem:[%s10017_s0 + $0x58] sm:$0xff]  ;;  %v93_v33 = vld [vmem:[%s10017_s0 + $0x1e0] sm:$0xff]  ;;  %v6779_v34 = vcombine.low %v76_v18, %v92_v19 }
  0x12   :  { %555 = vmatpush1.bf16.msra.mxu0 %v6729_v36  ;;  %608 = vmatpush1.bf16.msra.mxu1 %v6731_v37  ;;  %v60_v30 = vld [vmem:[%s10017_s0 + $0xd8] sm:$0xff]  ;;  %v78_v35 = vld [vmem:[%s10017_s0 + $0x168] sm:$0xff]  ;;  %v6746_v37 = vcombine.high %v43_v27, %v59_v28  ;;  %v6782_v42 = vcombine.high %v77_v32, %v93_v33  ;;  %v45_v44 = vld [vmem:[%s10017_s0 + $0x60] sm:$0xff] }
  0x13   :  { %658 = vmatprep.subr.bf16.mxu0 %v6766_v38  ;;  %711 = vmatprep.subr.bf16.mxu1 %v6768_v39  ;;  %v94_v36 = vld [vmem:[%s10017_s0 + $0x1e8] sm:$0xff]  ;;  %v6748_v38 = vcombine.high %v44_v29, %v60_v30  ;;  %v6745_v39 = vcombine.low %v43_v27, %v59_v28  ;;  %v6747_v41 = vcombine.low %v44_v29, %v60_v30 }
  0x14   :  { %v6784_v43 = vcombine.high %v78_v35, %v94_v36 }
  0x15   :  { %6790 = vmatmul.mubr.msk.bf16.gmra.mxu0 %vm427_vm0, %v8409_v40  ;;  %6792 = vmatmul.mubr.msk.bf16.gmra.mxu1 %vm427_vm0, %v8409_v40 }
  0x16   :  { %572 = vmatprep.mubr.bf16.mxu0 %v8279_v8  ;;  %625 = vmatprep.mubr.bf16.mxu1 %v8279_v8 }
  0x1d   :  { %6793 = vmatmul.mubr.msk.bf16.vlgmr.msra.gmra.mxu0 %vm427_vm0, %v8374_v23  ;;  %6795 = vmatmul.mubr.msk.bf16.vlgmr.msra.gmra.mxu1 %vm427_vm0, %v8374_v23 }
  0x1e   :  { %659 = vmatpush1.bf16.msra.mxu0 %v6765_v45  ;;  %712 = vmatpush1.bf16.msra.mxu1 %v6767_v48  ;;  %v61_v45 = vld [vmem:[%s10017_s0 + $0xe0] sm:$0xff] }
  0x1f   :  { %582 = vmatprep.mubr.bf16.mxu0 %v8279_v8  ;;  %635 = vmatprep.mubr.bf16.mxu1 %v8279_v8 }
  0x20   :  { %660 = vmatprep.subr.bf16.mxu0 %v6734_v51  ;;  %713 = vmatprep.subr.bf16.mxu1 %v6736_v52 }
  0x22   :  { %661 = vmatpush1.bf16.msra.mxu0 %v6733_v53  ;;  %714 = vmatpush1.bf16.msra.mxu1 %v6735_v54 }
  0x23   :  { %764 = vmatprep.subr.bf16.mxu0 %v6770_v55  ;;  %817 = vmatprep.subr.bf16.mxu1 %v6772_v56 }
  0x25   :  { %6794 = vmatmul.mubr.msk.bf16.gmra.mxu0 %vm427_vm0, %v8409_v40  ;;  %6796 = vmatmul.mubr.msk.bf16.gmra.mxu1 %vm427_vm0, %v8409_v40 }
  0x26   :  { %678 = vmatprep.mubr.bf16.mxu0 %v8279_v8  ;;  %731 = vmatprep.mubr.bf16.mxu1 %v8279_v8 }
  0x2d   :  { %6797 = vmatmul.mubr.msk.bf16.vlgmr.msra.gmra.mxu0 %vm427_vm0, %v8374_v23  ;;  %6799 = vmatmul.mubr.msk.bf16.vlgmr.msra.gmra.mxu1 %vm427_vm0, %v8374_v23 }
  0x2e   :  { %765 = vmatpush1.bf16.msra.mxu0 %v6769_v61  ;;  %818 = vmatpush1.bf16.msra.mxu1 %v6771_v0 }
  0x2f   :  { %688 = vmatprep.mubr.bf16.mxu0 %v8279_v8  ;;  %741 = vmatprep.mubr.bf16.mxu1 %v8279_v8 }
  0x30   :  { %766 = vmatprep.subr.bf16.mxu0 %v6738_v3  ;;  %819 = vmatprep.subr.bf16.mxu1 %v6740_v4 }
  0x32   :  { %767 = vmatpush1.bf16.msra.mxu0 %v6737_v5  ;;  %820 = vmatpush1.bf16.msra.mxu1 %v6739_v6 }
  0x33   :  { %870 = vmatprep.subr.bf16.mxu0 %v6774_v7  ;;  %923 = vmatprep.subr.bf16.mxu1 %v6776_v9 }
  0x35   :  { %6798 = vmatmul.mubr.msk.bf16.gmra.mxu0 %vm427_vm0, %v8409_v40  ;;  %6800 = vmatmul.mubr.msk.bf16.gmra.mxu1 %vm427_vm0, %v8409_v40 }
  0x36   :  { %784 = vmatprep.mubr.bf16.mxu0 %v8279_v8  ;;  %837 = vmatprep.mubr.bf16.mxu1 %v8279_v8 }
  0x3d   :  { %6801 = vmatmul.mubr.msk.bf16.vlgmr.msra.gmra.mxu0 %vm427_vm0, %v8374_v23  ;;  %6803 = vmatmul.mubr.msk.bf16.vlgmr.msra.gmra.mxu1 %vm427_vm0, %v8374_v23 }
  0x3e   :  { %871 = vmatpush1.bf16.msra.mxu0 %v6773_v14  ;;  %924 = vmatpush1.bf16.msra.mxu1 %v6775_v17 }
  0x3f   :  { %794 = vmatprep.mubr.bf16.mxu0 %v8279_v8  ;;  %847 = vmatprep.mubr.bf16.mxu1 %v8279_v8 }
  0x40   :  { %872 = vmatprep.subr.bf16.mxu0 %v6742_v20  ;;  %925 = vmatprep.subr.bf16.mxu1 %v6744_v21 }
  0x42   :  { %873 = vmatpush1.bf16.msra.mxu0 %v6741_v22  ;;  %926 = vmatpush1.bf16.msra.mxu1 %v6743_v24 }
  0x43   :  { %976 = vmatprep.subr.bf16.mxu0 %v6778_v25  ;;  %1029 = vmatprep.subr.bf16.mxu1 %v6780_v26 }
  0x45   :  { %6802 = vmatmul.mubr.msk.bf16.gmra.mxu0 %vm427_vm0, %v8409_v40  ;;  %6804 = vmatmul.mubr.msk.bf16.gmra.mxu1 %vm427_vm0, %v8409_v40 }
  0x46   :  { %890 = vmatprep.mubr.bf16.mxu0 %v8279_v8  ;;  %943 = vmatprep.mubr.bf16.mxu1 %v8279_v8 }
  0x4d   :  { %6805 = vmatmul.mubr.msk.bf16.vlgmr.msra.gmra.mxu0 %vm427_vm0, %v8374_v23  ;;  %6807 = vmatmul.mubr.msk.bf16.vlgmr.msra.gmra.mxu1 %vm427_vm0, %v8374_v23 }
  0x4e   :  { %977 = vmatpush1.bf16.msra.mxu0 %v6777_v31  ;;  %1030 = vmatpush1.bf16.msra.mxu1 %v6779_v34 }
  0x4f   :  { %900 = vmatprep.mubr.bf16.mxu0 %v8279_v8  ;;  %953 = vmatprep.mubr.bf16.mxu1 %v8279_v8 }
  0x50   :  { %978 = vmatprep.subr.bf16.mxu0 %v6746_v37  ;;  %1031 = vmatprep.subr.bf16.mxu1 %v6748_v38 }
  0x52   :  { %979 = vmatpush1.bf16.msra.mxu0 %v6745_v39  ;;  %1032 = vmatpush1.bf16.msra.mxu1 %v6747_v41 }
  0x53   :  { %1082 = vmatprep.subr.bf16.mxu0 %v6782_v42  ;;  %1135 = vmatprep.subr.bf16.mxu1 %v6784_v43 }
  0x55   :  { %6806 = vmatmul.mubr.msk.bf16.gmra.mxu0 %vm427_vm0, %v8409_v40  ;;  %6808 = vmatmul.mubr.msk.bf16.gmra.mxu1 %vm427_vm0, %v8409_v40 }
  0x56   :  { %996 = vmatprep.mubr.bf16.mxu0 %v8279_v8  ;;  %1049 = vmatprep.mubr.bf16.mxu1 %v8279_v8 }
  0x57   :  { %15 = vsyncpa [#allocation5], 0  ;;  %v6781_v46 = vcombine.low %v77_v32, %v93_v33  ;;  %v46_v47 = vld [vmem:[%s10017_s0 + $0x68] sm:$0xff]  ;;  %v6783_v49 = vcombine.low %v78_v35, %v94_v36  ;;  %v6750_v50 = vcombine.high %v45_v44, %v61_v45  ;;  %v79_v51 = vld [vmem:[%s10017_s0 + $0x170] sm:$0xff]  ;;  %v6749_v56 = vcombine.low %v45_v44, %v61_v45  ;;  %s8282_s24 = smov 32   ;;  %s8284_s20 = smov 96  }
  0x58   :  { %v62_v48 = vld [vmem:[%s10017_s0 + $0xe8] sm:$0xff]  ;;  %v95_v52 = vld [vmem:[%s10017_s0 + $0x1f0] sm:$0xff]  ;;  %v80_v54 = vld [vmem:[%s10017_s0 + $0x178] sm:$0xff]  ;;  %vm8281_vm1 = vmmov 0   ;;  %vm5247_vm2 = vcmask 261126   ;;  %vm3491_vm3 = vcmask 254976  }
  0x59   :  { %v6752_v53 = vcombine.high %v46_v47, %v62_v48  ;;  %v96_v55 = vld [vmem:[%s10017_s0 + $0x1f8] sm:$0xff]  ;;  %v6751_v57 = vcombine.low %v46_v47, %v62_v48  ;;  %v6786_v58 = vcombine.high %v79_v51, %v95_v52  ;;  %v47_v60 = vld [vmem:[%s10017_s0 + $0x70] sm:$0xff]  ;;  %v6785_v62 = vcombine.low %v79_v51, %v95_v52  ;;  %v8614_v4 = vld [vmem:[%s10019_s2] sm:$0xff]  ;;  %s8285_s23 = smov [#allocation4]  }
  0x5a   :  { %v6788_v59 = vcombine.high %v80_v54, %v96_v55  ;;  %v63_v61 = vld [vmem:[%s10017_s0 + $0xf0] sm:$0xff]  ;;  %v48_v63 = vld [vmem:[%s10017_s0 + $0x78] sm:$0xff]  ;;  %v6787_v1 = vcombine.low %v80_v54, %v96_v55  ;;  %v8619_v5 = vld [vmem:[%s10019_s2 + $0x80] sm:$0xff]  ;;  %s6706_s25 = sshll.u32 %s8285_s23, 4  ;;  %s6707_s25 = int_to_ptr.vmem [resolvable:$true] %s6706_s25 }
  0x5b   :  { %v64_v0 = vld [vmem:[%s10017_s0 + $0xf8] sm:$0xff]  ;;  %v6754_v2 = vcombine.high %v47_v60, %v63_v61  ;;  %v8624_v6 = vld [vmem:[%s10019_s2 + $0x8] sm:$0xff]  ;;  %v6753_v7 = vcombine.low %v47_v60, %v63_v61  ;;  %v6821_v11 = vcombine.low %v8614_v4, %v8619_v5  ;;  %v6822_v13 = vcombine.high %v8614_v4, %v8619_v5  ;;  %s8283_s0 = smov 64   ;;  %s8235_s26 = scalar_lea.vmem %s6707_s25, 128 }
  0x5c   :  { %v6756_v3 = vcombine.high %v48_v63, %v64_v0  ;;  %v8631_v9 = vld [vmem:[%s10019_s2 + $0x88] sm:$0xff]  ;;  %v6755_v10 = vcombine.low %v48_v63, %v64_v0  ;;  %p8236_p0 = scmp.ne.s32.totalorder %s6707_s25, %s8235_s26  ;;  %p8240_p1 = scmp.lt.s32.totalorder %s6707_s25, %s6707_s25 }
  0x5d   :  { %6809 = vmatmul.mubr.msk.bf16.vlgmr.msra.gmra.mxu0 %vm427_vm0, %v8374_v23  ;;  %6811 = vmatmul.mubr.msk.bf16.vlgmr.msra.gmra.mxu1 %vm427_vm0, %v8374_v23  ;;  %v6823_v12 = vcombine.low %v8624_v6, %v8631_v9  ;;  %v6824_v14 = vcombine.high %v8624_v6, %v8631_v9  ;;  %p8241_p2 = scmp.lt.s32.totalorder %s8235_s26, %s8235_s26 }
  0x5e   :  { %1083 = vmatpush1.bf16.msra.mxu0 %v6781_v46  ;;  %1136 = vmatpush1.bf16.msra.mxu1 %v6783_v49 }
  0x5f   :  { %1006 = vmatprep.mubr.bf16.mxu0 %v8279_v8  ;;  %1059 = vmatprep.mubr.bf16.mxu1 %v8279_v8  ;;  %p8242_p3 = por %p8241_p2, %p8240_p1 }
  0x60   :  { %1084 = vmatprep.subr.bf16.mxu0 %v6750_v50  ;;  %1137 = vmatprep.subr.bf16.mxu1 %v6752_v53 }
  0x61   :  { %p8243_p4 = pnand %p8242_p3, %p8236_p0 }
  0x62   :  { %1085 = vmatpush1.bf16.msra.mxu0 %v6749_v56  ;;  %1138 = vmatpush1.bf16.msra.mxu1 %v6751_v57 }
  0x63   :  { %1188 = vmatprep.subr.bf16.mxu0 %v6786_v58  ;;  %1241 = vmatprep.subr.bf16.mxu1 %v6788_v59 }
  0x65   :  { %6810 = vmatmul.mubr.msk.bf16.gmra.mxu0 %vm427_vm0, %v8409_v40  ;;  %6812 = vmatmul.mubr.msk.bf16.gmra.mxu1 %vm427_vm0, %v8409_v40 }
  0x66   :  { %1102 = vmatprep.mubr.bf16.mxu0 %v8279_v8  ;;  %1155 = vmatprep.mubr.bf16.mxu1 %v8279_v8 }
  0x6d   :  { %6813 = vmatmul.mubr.msk.bf16.vlgmr.msra.gmra.mxu0 %vm427_vm0, %v8374_v23  ;;  %6815 = vmatmul.mubr.msk.bf16.vlgmr.msra.gmra.mxu1 %vm427_vm0, %v8374_v23 }
  0x6e   :  { %1189 = vmatpush1.bf16.msra.mxu0 %v6785_v62  ;;  %1242 = vmatpush1.bf16.msra.mxu1 %v6787_v1 }
  0x6f   :  { %1112 = vmatprep.mubr.bf16.mxu0 %v8279_v8  ;;  %1165 = vmatprep.mubr.bf16.mxu1 %v8279_v8 }
  0x70   :  { %1190 = vmatprep.subr.bf16.mxu0 %v6754_v2  ;;  %1243 = vmatprep.subr.bf16.mxu1 %v6756_v3 }
  0x72   :  { %1191 = vmatpush1.bf16.msra.mxu0 %v6753_v7  ;;  %1244 = vmatpush1.bf16.msra.mxu1 %v6755_v10 }
  0x75   :  { %6814 = vmatmul.mubr.msk.bf16.gmra.mxu0 %vm427_vm0, %v8409_v40  ;;  %6816 = vmatmul.mubr.msk.bf16.gmra.mxu1 %vm427_vm0, %v8409_v40 }
  0x76   :  { %1208 = vmatprep.mubr.bf16.mxu0 %v8279_v8  ;;  %1261 = vmatprep.mubr.bf16.mxu1 %v8279_v8 }
  0x7d   :  { %6817 = vmatmul.mubr.msk.bf16.vlgmr.msra.gmra.mxu0 %vm427_vm0, %v8374_v23  ;;  %6819 = vmatmul.mubr.msk.bf16.vlgmr.msra.gmra.mxu1 %vm427_vm0, %v8374_v23 }
  0x7e   :  { %1218 = vmatprep.mubr.bf16.mxu0 %v8279_v8  ;;  %1271 = vmatprep.mubr.bf16.mxu1 %v8279_v8 }
  0x85   :  { %6818 = vmatmul.mubr.msk.bf16.gmra.mxu0 %vm427_vm0, %v8409_v40  ;;  %6820 = vmatmul.mubr.msk.bf16.gmra.mxu1 %vm427_vm0, %v8409_v40 }
  0x86   :  { %1698 = vmatprep.mubr.bf16.mxu0 %v6822_v13  ;;  %1739 = vmatprep.mubr.bf16.mxu1 %v6824_v14 }
  0xcd   :  { %v468_v15 = vpop.f32.mrf.mxu0  ;;  %v521_v23 = vpop.f32.mrf.mxu1 }
  0xce   :  { %v1282_v59 = vmax.f32 %v468_v15, 0.0  ;;  %v1284_v61 = vmax.f32 %v521_v23, 0.0  ;;  %v8670_v15 = vld [vmem:[%s10019_s2 + $0x10] sm:$0xff] }
  0xcf   :  { %v470_v16 = vpop.f32.mrf.mxu0  ;;  %v523_v17 = vpop.f32.mrf.mxu1  ;;  %v8675_v23 = vld [vmem:[%s10019_s2 + $0x90] sm:$0xff] }
  0xd0   :  { %v1283_v41 = vmax.f32 %v470_v16, 0.0  ;;  %v1285_v45 = vmax.f32 %v523_v17, 0.0 }
  0xd1   :  { %v472_v18 = vpop.f32.mrf.mxu0  ;;  %v525_v19 = vpop.f32.mrf.mxu1 }
  0xd2   :  { %v1314_v55 = vmax.f32 %v472_v18, 0.0  ;;  %v1316_v57 = vmax.f32 %v525_v19, 0.0 }
  0xd3   :  { %v474_v20 = vpop.f32.mrf.mxu0  ;;  %v527_v21 = vpop.f32.mrf.mxu1 }
  0xd4   :  { %v1315_v31 = vmax.f32 %v474_v20, 0.0  ;;  %v1317_v35 = vmax.f32 %v527_v21, 0.0  ;;  %v1410_v63 = vpack.c.bf16 %v1314_v55, %v1282_v59  ;;  %v1412_v1 = vpack.c.bf16 %v1316_v57, %v1284_v61 }
  0xd5   :  { %v478_v22 = vpop.f32.mrf.mxu0  ;;  %v531_v24 = vpop.f32.mrf.mxu1 }
  0xd6   :  { %v1346_v36 = vmax.f32 %v478_v22, 0.0  ;;  %v1348_v42 = vmax.f32 %v531_v24, 0.0  ;;  %v1411_v49 = vpack.c.bf16 %v1315_v31, %v1283_v41  ;;  %v1413_v52 = vpack.c.bf16 %v1317_v35, %v1285_v45 }
  0xd7   :  { %v480_v25 = vpop.f32.mrf.mxu0  ;;  %v533_v26 = vpop.f32.mrf.mxu1 }
  0xd8   :  { %v1347_v40 = vmax.f32 %v480_v25, 0.0  ;;  %v1349_v37 = vmax.f32 %v533_v26, 0.0  ;;  %v8682_v25 = vld [vmem:[%s10019_s2 + $0x18] sm:$0xff] }
  0xd9   :  { %v482_v27 = vpop.f32.mrf.mxu0  ;;  %v535_v28 = vpop.f32.mrf.mxu1  ;;  %v8687_v26 = vld [vmem:[%s10019_s2 + $0x98] sm:$0xff] }
  0xda   :  { %v1378_v29 = vmax.f32 %v482_v27, 0.0  ;;  %v1380_v32 = vmax.f32 %v535_v28, 0.0 }
  0xdb   :  { %v484_v30 = vpop.f32.mrf.mxu0  ;;  %v537_v34 = vpop.f32.mrf.mxu1 }
  0xdc   :  { %v1379_v33 = vmax.f32 %v484_v30, 0.0  ;;  %v1381_v38 = vmax.f32 %v537_v34, 0.0  ;;  %v1442_v46 = vpack.c.bf16 %v1378_v29, %v1346_v36  ;;  %v1444_v50 = vpack.c.bf16 %v1380_v32, %v1348_v42 }
  0xdd   :  { %v8659_v39 = vpop.f32.mrf.mxu0  ;;  %v8661_v44 = vpop.f32.mrf.mxu1  ;;  %v6826_v34 = vcombine.high %v8670_v15, %v8675_v23 }
  0xde   :  { %v1443_v43 = vpack.c.bf16 %v1379_v33, %v1347_v40  ;;  %v1445_v47 = vpack.c.bf16 %v1381_v38, %v1349_v37  ;;  %v6828_v38 = vcombine.high %v8682_v25, %v8687_v26  ;;  %v1286_v6 = vmax.f32 %v8659_v39, 0.0 }
  0xdf   :  { %v576_v48 = vpop.f32.mrf.mxu0  ;;  %v629_v51 = vpop.f32.mrf.mxu1  ;;  %v1288_v9 = vmax.f32 %v8661_v44, 0.0  ;;  %v6827_v39 = vcombine.low %v8682_v25, %v8687_v26 }
  0xe0   :  { %1678 = vmatprep.subr.bf16.mxu0 %v1443_v43  ;;  %1719 = vmatprep.subr.bf16.mxu1 %v1445_v47  ;;  %v1287_v31 = vmax.f32 %v576_v48, 0.0  ;;  %v1289_v40 = vmax.f32 %v629_v51, 0.0 }
  0xe1   :  { %v8663_v53 = vpop.f32.mrf.mxu0  ;;  %1679 = vmatpush1.bf16.xpose.msra.mxu0 %v1442_v46  ;;  %v8665_v54 = vpop.f32.mrf.mxu1  ;;  %1720 = vmatpush1.bf16.xpose.msra.mxu1 %v1444_v50 }
  0xe2   :  { %1680 = vmatprep.subr.bf16.mxu0 %v1411_v49  ;;  %1721 = vmatprep.subr.bf16.mxu1 %v1413_v52  ;;  %v1318_v5 = vmax.f32 %v8663_v53, 0.0 }
  0xe3   :  { %v580_v56 = vpop.f32.mrf.mxu0  ;;  %v633_v58 = vpop.f32.mrf.mxu1 }
  0xe4   :  { %v1319_v19 = vmax.f32 %v580_v56, 0.0  ;;  %v1321_v20 = vmax.f32 %v633_v58, 0.0  ;;  %v1414_v49 = vpack.c.bf16 %v1318_v5, %v1286_v6 }
  0xe5   :  { %v584_v60 = vpop.f32.mrf.mxu0  ;;  %v637_v62 = vpop.f32.mrf.mxu1 }
  0xe6   :  { %v1350_v27 = vmax.f32 %v584_v60, 0.0  ;;  %v1352_v28 = vmax.f32 %v637_v62, 0.0  ;;  %v1415_v41 = vpack.c.bf16 %v1319_v19, %v1287_v31  ;;  %v1417_v42 = vpack.c.bf16 %v1321_v20, %v1289_v40 }
  0xe7   :  { %v586_v0 = vpop.f32.mrf.mxu0  ;;  %v639_v2 = vpop.f32.mrf.mxu1 }
  0xe8   :  { %v1351_v13 = vmax.f32 %v586_v0, 0.0  ;;  %v1353_v21 = vmax.f32 %v639_v2, 0.0  ;;  %v8722_v0 = vld [vmem:[%s10019_s2 + $0x20] sm:$0xff] }
  0xe9   :  { %v588_v3 = vpop.f32.mrf.mxu0  ;;  %1681 = vmatpush1.bf16.xpose.msra.mxu0 %v1410_v63  ;;  %v641_v7 = vpop.f32.mrf.mxu1  ;;  %1722 = vmatpush1.bf16.xpose.msra.mxu1 %v1412_v1  ;;  %v8727_v1 = vld [vmem:[%s10019_s2 + $0xa0] sm:$0xff] }
  0xea   :  { %v1382_v14 = vmax.f32 %v588_v3, 0.0  ;;  %v1384_v16 = vmax.f32 %v641_v7, 0.0 }
  0xeb   :  { %v590_v10 = vpop.f32.mrf.mxu0  ;;  %v643_v18 = vpop.f32.mrf.mxu1 }
  0xec   :  { %v1383_v17 = vmax.f32 %v590_v10, 0.0  ;;  %v1385_v22 = vmax.f32 %v643_v18, 0.0  ;;  %v1446_v35 = vpack.c.bf16 %v1382_v14, %v1350_v27  ;;  %v1448_v36 = vpack.c.bf16 %v1384_v16, %v1352_v28  ;;  %v8739_v14 = vld [vmem:[%s10019_s2 + $0xa8] sm:$0xff] }
  0xed   :  { %v8677_v24 = vpop.f32.mrf.mxu0  ;;  %v8689_v30 = vpop.f32.mrf.mxu1 }
  0xee   :  { %v1447_v29 = vpack.c.bf16 %v1383_v17, %v1351_v13  ;;  %v1449_v32 = vpack.c.bf16 %v1385_v22, %v1353_v21  ;;  %v8734_v13 = vld [vmem:[%s10019_s2 + $0x28] sm:$0xff]  ;;  %v6830_v21 = vcombine.high %v8722_v0, %v8727_v1 }
  0xef   :  { %v8691_v33 = vpop.f32.mrf.mxu0  ;;  %v8695_v37 = vpop.f32.mrf.mxu1  ;;  %v6832_v27 = vcombine.high %v8734_v13, %v8739_v14 }
  0xf0   :  { %1699 = vmatmul.mubr.bf16.vlgmr.msra.gmra.mxu0 %v6821_v11  ;;  %1760 = vmatprep.subr.bf16.mxu0 %v1447_v29  ;;  %v1320_v11 = vmax.f32 %v8665_v54, 0.0  ;;  %v6825_v54 = vcombine.low %v8670_v15, %v8675_v23  ;;  %v1291_v16 = vmax.f32 %v8691_v33, 0.0  ;;  %v1293_v23 = vmax.f32 %v8695_v37, 0.0 }
  0xf1   :  { %1740 = vmatmul.mubr.bf16.vlgmr.msra.gmra.mxu1 %v6823_v12  ;;  %1801 = vmatprep.subr.bf16.mxu1 %v1449_v32  ;;  %v8705_v43 = vpop.f32.mrf.mxu0  ;;  %v8707_v45 = vpop.f32.mrf.mxu1  ;;  %v1292_v37 = vmax.f32 %v8689_v30, 0.0 }
  0xf2   :  { %1761 = vmatpush1.bf16.xpose.msra.mxu0 %v1446_v35  ;;  %1802 = vmatpush1.bf16.xpose.msra.mxu1 %v1448_v36  ;;  %v1416_v50 = vpack.c.bf16 %v1320_v11, %v1288_v9  ;;  %v1322_v40 = vmax.f32 %v8705_v43, 0.0  ;;  %v1324_v33 = vmax.f32 %v8707_v45, 0.0  ;;  %v1290_v35 = vmax.f32 %v8677_v24, 0.0 }
  0xf3   :  { %1762 = vmatprep.subr.bf16.mxu0 %v1415_v41  ;;  %1803 = vmatprep.subr.bf16.mxu1 %v1417_v42  ;;  %v686_v4 = vpop.f32.mrf.mxu0  ;;  %v739_v46 = vpop.f32.mrf.mxu1  ;;  %v6829_v9 = vcombine.low %v8722_v0, %v8727_v1 }
  0xf4   :  { %1780 = vmatprep.mubr.bf16.mxu0 %v6826_v34  ;;  %1821 = vmatprep.mubr.bf16.mxu1 %v6828_v38  ;;  %v1323_v44 = vmax.f32 %v686_v4, 0.0  ;;  %v1325_v2 = vmax.f32 %v739_v46, 0.0  ;;  %v1418_v41 = vpack.c.bf16 %v1322_v40, %v1290_v35  ;;  %v1420_v4 = vpack.c.bf16 %v1324_v33, %v1292_v37 }
  0xf5   :  { %v690_v47 = vpop.f32.mrf.mxu0  ;;  %v743_v12 = vpop.f32.mrf.mxu1 }
  0xf6   :  { %v1354_v3 = vmax.f32 %v690_v47, 0.0  ;;  %v1356_v17 = vmax.f32 %v743_v12, 0.0  ;;  %v1419_v22 = vpack.c.bf16 %v1323_v44, %v1291_v16  ;;  %v1421_v28 = vpack.c.bf16 %v1325_v2, %v1293_v23 }
  0xf7   :  { %v692_v48 = vpop.f32.mrf.mxu0  ;;  %v745_v51 = vpop.f32.mrf.mxu1 }
  0xf8   :  { %v1355_v56 = vmax.f32 %v692_v48, 0.0  ;;  %v1357_v60 = vmax.f32 %v745_v51, 0.0  ;;  %v8771_v51 = vld [vmem:[%s10019_s2 + $0xb0] sm:$0xff] }
  0xf9   :  { %v694_v52 = vpop.f32.mrf.mxu0  ;;  %v747_v55 = vpop.f32.mrf.mxu1 }
  0xfa   :  { %1763 = vmatpush1.bf16.xpose.msra.mxu0 %v1414_v49  ;;  %1804 = vmatpush1.bf16.xpose.msra.mxu1 %v1416_v50  ;;  %v1386_v57 = vmax.f32 %v694_v52, 0.0  ;;  %v1388_v61 = vmax.f32 %v747_v55, 0.0  ;;  %v8766_v50 = vld [vmem:[%s10019_s2 + $0x30] sm:$0xff] }
  0xfb   :  { %v696_v53 = vpop.f32.mrf.mxu0  ;;  %v749_v59 = vpop.f32.mrf.mxu1  ;;  %v6834_v1 = vcombine.high %v8766_v50, %v8771_v51 }
  0xfc   :  { %v1387_v58 = vmax.f32 %v696_v53, 0.0  ;;  %v1389_v62 = vmax.f32 %v749_v59, 0.0  ;;  %v1450_v19 = vpack.c.bf16 %v1386_v57, %v1354_v3  ;;  %v1452_v25 = vpack.c.bf16 %v1388_v61, %v1356_v17  ;;  %v8780_v57 = vld [vmem:[%s10019_s2 + $0x38] sm:$0xff] }
  0xfd   :  { %v8717_v63 = vpop.f32.mrf.mxu0  ;;  %v8729_v10 = vpop.f32.mrf.mxu1 }
  0xfe   :  { %v1451_v7 = vpack.c.bf16 %v1387_v58, %v1355_v56  ;;  %v1453_v18 = vpack.c.bf16 %v1389_v62, %v1357_v60  ;;  %v6831_v56 = vcombine.low %v8734_v13, %v8739_v14  ;;  %v8785_v58 = vld [vmem:[%s10019_s2 + $0xb8] sm:$0xff] }
  0xff   :  { %v8742_v15 = vpop.f32.mrf.mxu0  ;;  %v8745_v20 = vpop.f32.mrf.mxu1  ;;  %v6836_v13 = vcombine.high %v8780_v57, %v8785_v58 }
 0x100   :  { %1842 = vmatprep.subr.bf16.mxu0 %v1451_v7  ;;  %1883 = vmatprep.subr.bf16.mxu1 %v1453_v18  ;;  %v1295_v59 = vmax.f32 %v8742_v15, 0.0  ;;  %v1297_v61 = vmax.f32 %v8745_v20, 0.0  ;;  %v1294_v20 = vmax.f32 %v8717_v63, 0.0 }
 0x101   :  { %1781 = vmatmul.mubr.bf16.vlgmr.msra.gmra.mxu0 %v6825_v54  ;;  %1822 = vmatmul.mubr.bf16.vlgmr.msra.gmra.mxu1 %v6827_v39  ;;  %v8749_v26 = vpop.f32.mrf.mxu0  ;;  %v8753_v29 = vpop.f32.mrf.mxu1 }
 0x102   :  { %1843 = vmatpush1.bf16.xpose.msra.mxu0 %v1450_v19  ;;  %1884 = vmatpush1.bf16.xpose.msra.mxu1 %v1452_v25  ;;  %v1326_v18 = vmax.f32 %v8749_v26, 0.0  ;;  %v1328_v23 = vmax.f32 %v8753_v29, 0.0 }
 0x103   :  { %1844 = vmatprep.subr.bf16.mxu0 %v1419_v22  ;;  %v792_v31 = vpop.f32.mrf.mxu0  ;;  %1885 = vmatprep.subr.bf16.mxu1 %v1421_v28  ;;  %v845_v32 = vpop.f32.mrf.mxu1  ;;  %v1296_v22 = vmax.f32 %v8729_v10, 0.0 }
 0x104   :  { %1862 = vmatprep.mubr.bf16.mxu0 %v6830_v21  ;;  %1903 = vmatprep.mubr.bf16.mxu1 %v6832_v27  ;;  %v1327_v24 = vmax.f32 %v792_v31, 0.0  ;;  %v1329_v52 = vmax.f32 %v845_v32, 0.0  ;;  %v1422_v27 = vpack.c.bf16 %v1326_v18, %v1294_v20 }
 0x105   :  { %v796_v34 = vpop.f32.mrf.mxu0  ;;  %v849_v36 = vpop.f32.mrf.mxu1  ;;  %v1424_v31 = vpack.c.bf16 %v1328_v23, %v1296_v22 }
 0x106   :  { %v1358_v55 = vmax.f32 %v796_v34, 0.0  ;;  %v1360_v39 = vmax.f32 %v849_v36, 0.0  ;;  %v1423_v2 = vpack.c.bf16 %v1327_v24, %v1295_v59  ;;  %v1425_v14 = vpack.c.bf16 %v1329_v52, %v1297_v61 }
 0x107   :  { %v798_v38 = vpop.f32.mrf.mxu0  ;;  %v851_v42 = vpop.f32.mrf.mxu1  ;;  %v6833_v36 = vcombine.low %v8766_v50, %v8771_v51 }
 0x108   :  { %v1359_v46 = vmax.f32 %v798_v38, 0.0  ;;  %v1361_v12 = vmax.f32 %v851_v42, 0.0  ;;  %v8812_v42 = vld [vmem:[%s10019_s2 + $0x40] sm:$0xff] }
 0x109   :  { %v800_v5 = vpop.f32.mrf.mxu0  ;;  %v853_v11 = vpop.f32.mrf.mxu1 }
 0x10a   :  { %1845 = vmatpush1.bf16.xpose.msra.mxu0 %v1418_v41  ;;  %1886 = vmatpush1.bf16.xpose.msra.mxu1 %v1420_v4  ;;  %v1390_v47 = vmax.f32 %v800_v5, 0.0  ;;  %v1392_v48 = vmax.f32 %v853_v11, 0.0  ;;  %v8817_v4 = vld [vmem:[%s10019_s2 + $0xc0] sm:$0xff] }
 0x10b   :  { %v802_v43 = vpop.f32.mrf.mxu0  ;;  %v855_v45 = vpop.f32.mrf.mxu1  ;;  %v6838_v52 = vcombine.high %v8812_v42, %v8817_v4 }
 0x10c   :  { %v1391_v6 = vmax.f32 %v802_v43, 0.0  ;;  %v1393_v30 = vmax.f32 %v855_v45, 0.0  ;;  %v1454_v62 = vpack.c.bf16 %v1390_v47, %v1358_v55  ;;  %v1456_v3 = vpack.c.bf16 %v1392_v48, %v1360_v39  ;;  %v8831_v45 = vld [vmem:[%s10019_s2 + $0xc8] sm:$0xff] }
 0x10d   :  { %v8761_v49 = vpop.f32.mrf.mxu0  ;;  %v8773_v54 = vpop.f32.mrf.mxu1  ;;  %v6835_v47 = vcombine.low %v8780_v57, %v8785_v58 }
 0x10e   :  { %v1455_v53 = vpack.c.bf16 %v1391_v6, %v1359_v46  ;;  %v1457_v44 = vpack.c.bf16 %v1393_v30, %v1361_v12  ;;  %v8826_v6 = vld [vmem:[%s10019_s2 + $0x48] sm:$0xff] }
 0x10f   :  { %v8788_v60 = vpop.f32.mrf.mxu0  ;;  %v8791_v0 = vpop.f32.mrf.mxu1  ;;  %v6840_v57 = vcombine.high %v8826_v6, %v8831_v45 }
 0x110   :  { %1924 = vmatprep.subr.bf16.mxu0 %v1455_v53  ;;  %1965 = vmatprep.subr.bf16.mxu1 %v1457_v44  ;;  %v1301_v30 = vmax.f32 %v8791_v0, 0.0  ;;  %v1298_v0 = vmax.f32 %v8761_v49, 0.0 }
 0x111   :  { %1863 = vmatmul.mubr.bf16.vlgmr.msra.gmra.mxu0 %v6829_v9  ;;  %v8795_v7 = vpop.f32.mrf.mxu0  ;;  %1904 = vmatmul.mubr.bf16.vlgmr.msra.gmra.mxu1 %v6831_v56  ;;  %v8799_v16 = vpop.f32.mrf.mxu1  ;;  %v1299_v9 = vmax.f32 %v8788_v60, 0.0 }
 0x112   :  { %1925 = vmatpush1.bf16.xpose.msra.mxu0 %v1454_v62  ;;  %1966 = vmatpush1.bf16.xpose.msra.mxu1 %v1456_v3  ;;  %v1330_v44 = vmax.f32 %v8795_v7, 0.0  ;;  %v1332_v61 = vmax.f32 %v8799_v16, 0.0 }
 0x113   :  { %1926 = vmatprep.subr.bf16.mxu0 %v1423_v2  ;;  %v898_v17 = vpop.f32.mrf.mxu0  ;;  %1967 = vmatprep.subr.bf16.mxu1 %v1425_v14  ;;  %v951_v15 = vpop.f32.mrf.mxu1  ;;  %v1300_v2 = vmax.f32 %v8773_v54, 0.0 }
 0x114   :  { %1944 = vmatprep.mubr.bf16.mxu0 %v6834_v1  ;;  %1985 = vmatprep.mubr.bf16.mxu1 %v6836_v13  ;;  %v1331_v63 = vmax.f32 %v898_v17, 0.0  ;;  %v1333_v5 = vmax.f32 %v951_v15, 0.0  ;;  %v1426_v13 = vpack.c.bf16 %v1330_v44, %v1298_v0 }
 0x115   :  { %v902_v19 = vpop.f32.mrf.mxu0  ;;  %v955_v21 = vpop.f32.mrf.mxu1  ;;  %v1428_v17 = vpack.c.bf16 %v1332_v61, %v1300_v2 }
 0x116   :  { %v1362_v11 = vmax.f32 %v902_v19, 0.0  ;;  %v1364_v24 = vmax.f32 %v955_v21, 0.0  ;;  %v1427_v55 = vpack.c.bf16 %v1331_v63, %v1299_v9  ;;  %v1429_v58 = vpack.c.bf16 %v1333_v5, %v1301_v30 }
 0x117   :  { %v904_v25 = vpop.f32.mrf.mxu0  ;;  %v957_v28 = vpop.f32.mrf.mxu1  ;;  %v6837_v21 = vcombine.low %v8812_v42, %v8817_v4 }
 0x118   :  { %v1363_v33 = vmax.f32 %v904_v25, 0.0  ;;  %v1365_v37 = vmax.f32 %v957_v28, 0.0  ;;  %v8858_v28 = vld [vmem:[%s10019_s2 + $0x50] sm:$0xff] }
 0x119   :  { %v906_v40 = vpop.f32.mrf.mxu0  ;;  %v959_v32 = vpop.f32.mrf.mxu1 }
 0x11a   :  { %1927 = vmatpush1.bf16.xpose.msra.mxu0 %v1422_v27  ;;  %1968 = vmatpush1.bf16.xpose.msra.mxu1 %v1424_v31  ;;  %v1394_v34 = vmax.f32 %v906_v40, 0.0  ;;  %v1396_v38 = vmax.f32 %v959_v32, 0.0  ;;  %v8863_v31 = vld [vmem:[%s10019_s2 + $0xd0] sm:$0xff] }
 0x11b   :  { %v908_v26 = vpop.f32.mrf.mxu0  ;;  %v961_v29 = vpop.f32.mrf.mxu1  ;;  %v6842_v5 = vcombine.high %v8858_v28, %v8863_v31 }
 0x11c   :  { %v1395_v35 = vmax.f32 %v908_v26, 0.0  ;;  %v1397_v10 = vmax.f32 %v961_v29, 0.0  ;;  %v1458_v50 = vpack.c.bf16 %v1394_v34, %v1362_v11  ;;  %v1460_v53 = vpack.c.bf16 %v1396_v38, %v1364_v24  ;;  %v8877_v29 = vld [vmem:[%s10019_s2 + $0xd8] sm:$0xff] }
 0x11d   :  { %v8807_v41 = vpop.f32.mrf.mxu0  ;;  %v8819_v46 = vpop.f32.mrf.mxu1  ;;  %v6839_v34 = vcombine.low %v8826_v6, %v8831_v45 }
 0x11e   :  { %v1459_v43 = vpack.c.bf16 %v1395_v35, %v1363_v33  ;;  %v1461_v12 = vpack.c.bf16 %v1397_v10, %v1365_v37  ;;  %v8872_v35 = vld [vmem:[%s10019_s2 + $0x58] sm:$0xff] }
 0x11f   :  { %v8834_v48 = vpop.f32.mrf.mxu0  ;;  %v8837_v51 = vpop.f32.mrf.mxu1  ;;  %v6844_v6 = vcombine.high %v8872_v35, %v8877_v29 }
 0x120   :  { %2006 = vmatprep.subr.bf16.mxu0 %v1459_v43  ;;  %2047 = vmatprep.subr.bf16.mxu1 %v1461_v12  ;;  %v1305_v10 = vmax.f32 %v8837_v51, 0.0  ;;  %v1302_v51 = vmax.f32 %v8807_v41, 0.0 }
 0x121   :  { %1945 = vmatmul.mubr.bf16.vlgmr.msra.gmra.mxu0 %v6833_v36  ;;  %v8841_v56 = vpop.f32.mrf.mxu0  ;;  %1986 = vmatmul.mubr.bf16.vlgmr.msra.gmra.mxu1 %v6835_v47  ;;  %v8845_v59 = vpop.f32.mrf.mxu1  ;;  %v1303_v36 = vmax.f32 %v8834_v48, 0.0 }
 0x122   :  { %2007 = vmatpush1.bf16.xpose.msra.mxu0 %v1458_v50  ;;  %2048 = vmatpush1.bf16.xpose.msra.mxu1 %v1460_v53  ;;  %v1334_v12 = vmax.f32 %v8841_v56, 0.0  ;;  %v1336_v30 = vmax.f32 %v8845_v59, 0.0 }
 0x123   :  { %2008 = vmatprep.subr.bf16.mxu0 %v1427_v55  ;;  %v1004_v39 = vpop.f32.mrf.mxu0  ;;  %2049 = vmatprep.subr.bf16.mxu1 %v1429_v58  ;;  %v1057_v60 = vpop.f32.mrf.mxu1  ;;  %v1304_v55 = vmax.f32 %v8819_v46, 0.0 }
 0x124   :  { %2026 = vmatprep.mubr.bf16.mxu0 %v6838_v52  ;;  %2067 = vmatprep.mubr.bf16.mxu1 %v6840_v57  ;;  %v1335_v49 = vmax.f32 %v1004_v39, 0.0  ;;  %v1337_v40 = vmax.f32 %v1057_v60, 0.0  ;;  %v1430_v57 = vpack.c.bf16 %v1334_v12, %v1302_v51 }
 0x125   :  { %v1008_v62 = vpop.f32.mrf.mxu0  ;;  %v1061_v1 = vpop.f32.mrf.mxu1  ;;  %v1432_v39 = vpack.c.bf16 %v1336_v30, %v1304_v55 }
 0x126   :  { %v1366_v32 = vmax.f32 %v1008_v62, 0.0  ;;  %v1368_v63 = vmax.f32 %v1061_v1, 0.0  ;;  %v1431_v11 = vpack.c.bf16 %v1335_v49, %v1303_v36  ;;  %v1433_v45 = vpack.c.bf16 %v1337_v40, %v1305_v10 }
 0x127   :  { %v1010_v3 = vpop.f32.mrf.mxu0  ;;  %v1063_v14 = vpop.f32.mrf.mxu1  ;;  %v6841_v1 = vcombine.low %v8858_v28, %v8863_v31 }
 0x128   :  { %v1367_v23 = vmax.f32 %v1010_v3, 0.0  ;;  %v1369_v22 = vmax.f32 %v1063_v14, 0.0  ;;  %v8904_v14 = vld [vmem:[%s10019_s2 + $0x60] sm:$0xff] }
 0x129   :  { %v1012_v18 = vpop.f32.mrf.mxu0  ;;  %v1065_v15 = vpop.f32.mrf.mxu1 }
 0x12a   :  { %2009 = vmatpush1.bf16.xpose.msra.mxu0 %v1426_v13  ;;  %2050 = vmatpush1.bf16.xpose.msra.mxu1 %v1428_v17  ;;  %v1398_v19 = vmax.f32 %v1012_v18, 0.0  ;;  %v1400_v25 = vmax.f32 %v1065_v15, 0.0  ;;  %v8909_v17 = vld [vmem:[%s10019_s2 + $0xe0] sm:$0xff] }
 0x12b   :  { %v1014_v7 = vpop.f32.mrf.mxu0  ;;  %v1067_v16 = vpop.f32.mrf.mxu1  ;;  %v6846_v40 = vcombine.high %v8904_v14, %v8909_v17 }
 0x12c   :  { %v1399_v20 = vmax.f32 %v1014_v7, 0.0  ;;  %v1401_v54 = vmax.f32 %v1067_v16, 0.0  ;;  %v1462_v42 = vpack.c.bf16 %v1398_v19, %v1366_v32  ;;  %v1464_v43 = vpack.c.bf16 %v1400_v25, %v1368_v63  ;;  %v8923_v16 = vld [vmem:[%s10019_s2 + $0xe8] sm:$0xff] }
 0x12d   :  { %v8853_v27 = vpop.f32.mrf.mxu0  ;;  %v8865_v33 = vpop.f32.mrf.mxu1  ;;  %v6843_v19 = vcombine.low %v8872_v35, %v8877_v29 }
 0x12e   :  { %v1463_v26 = vpack.c.bf16 %v1399_v20, %v1367_v23  ;;  %v1465_v37 = vpack.c.bf16 %v1401_v54, %v1369_v22  ;;  %v8918_v20 = vld [vmem:[%s10019_s2 + $0x68] sm:$0xff] }
 0x12f   :  { %v8880_v38 = vpop.f32.mrf.mxu0  ;;  %v8883_v4 = vpop.f32.mrf.mxu1  ;;  %v6848_v35 = vcombine.high %v8918_v20, %v8923_v16 }
 0x130   :  { %2088 = vmatprep.subr.bf16.mxu0 %v1463_v26  ;;  %2129 = vmatprep.subr.bf16.mxu1 %v1465_v37  ;;  %v1309_v54 = vmax.f32 %v8883_v4, 0.0  ;;  %v1306_v4 = vmax.f32 %v8853_v27, 0.0 }
 0x131   :  { %2027 = vmatmul.mubr.bf16.vlgmr.msra.gmra.mxu0 %v6837_v21  ;;  %v8887_v47 = vpop.f32.mrf.mxu0  ;;  %2068 = vmatmul.mubr.bf16.vlgmr.msra.gmra.mxu1 %v6839_v34  ;;  %v8891_v9 = vpop.f32.mrf.mxu1  ;;  %v1307_v21 = vmax.f32 %v8880_v38, 0.0 }
 0x132   :  { %2089 = vmatpush1.bf16.xpose.msra.mxu0 %v1462_v42  ;;  %2130 = vmatpush1.bf16.xpose.msra.mxu1 %v1464_v43  ;;  %v1338_v37 = vmax.f32 %v8887_v47, 0.0  ;;  %v1340_v10 = vmax.f32 %v8891_v9, 0.0 }
 0x133   :  { %2090 = vmatprep.subr.bf16.mxu0 %v1431_v11  ;;  %v1110_v24 = vpop.f32.mrf.mxu0  ;;  %2131 = vmatprep.subr.bf16.mxu1 %v1433_v45  ;;  %v1163_v48 = vpop.f32.mrf.mxu1  ;;  %v1308_v11 = vmax.f32 %v8865_v33, 0.0 }
 0x134   :  { %2108 = vmatprep.mubr.bf16.mxu0 %v6842_v5  ;;  %2149 = vmatprep.mubr.bf16.mxu1 %v6844_v6  ;;  %v1339_v41 = vmax.f32 %v1110_v24, 0.0  ;;  %v1341_v18 = vmax.f32 %v1163_v48, 0.0  ;;  %v1434_v6 = vpack.c.bf16 %v1338_v37, %v1306_v4 }
 0x135   :  { %v1114_v50 = vpop.f32.mrf.mxu0  ;;  %v1167_v52 = vpop.f32.mrf.mxu1  ;;  %v1436_v24 = vpack.c.bf16 %v1340_v10, %v1308_v11 }
 0x136   :  { %v1370_v15 = vmax.f32 %v1114_v50, 0.0  ;;  %v1372_v49 = vmax.f32 %v1167_v52, 0.0  ;;  %v1435_v32 = vpack.c.bf16 %v1339_v41, %v1307_v21  ;;  %v1437_v29 = vpack.c.bf16 %v1341_v18, %v1309_v54 }
 0x137   :  { %v1116_v53 = vpop.f32.mrf.mxu0  ;;  %v1169_v58 = vpop.f32.mrf.mxu1  ;;  %v6845_v52 = vcombine.low %v8904_v14, %v8909_v17  ;;  %v8280_v54 = vmov 0.0  }
 0x138   :  { %v1371_v61 = vmax.f32 %v1116_v53, 0.0  ;;  %v1373_v2 = vmax.f32 %v1169_v58, 0.0  ;;  %v1504_v58 = vld [vmem:[%s10019_s2 + $0xf0] sm:$0xff] }
 0x139   :  { %v1118_v44 = vpop.f32.mrf.mxu0  ;;  %v1171_v60 = vpop.f32.mrf.mxu1 }
 0x13a   :  { %2091 = vmatpush1.bf16.xpose.msra.mxu0 %v1430_v57  ;;  %2132 = vmatpush1.bf16.xpose.msra.mxu1 %v1432_v39  ;;  %v1402_v62 = vmax.f32 %v1118_v44, 0.0  ;;  %v1404_v3 = vmax.f32 %v1171_v60, 0.0  ;;  %v1488_v57 = vld [vmem:[%s10019_s2 + $0x70] sm:$0xff] }
 0x13b   :  { %v1120_v56 = vpop.f32.mrf.mxu0  ;;  %v1173_v59 = vpop.f32.mrf.mxu1 }
 0x13c   :  { %v1403_v0 = vmax.f32 %v1120_v56, 0.0  ;;  %v1405_v46 = vmax.f32 %v1173_v59, 0.0  ;;  %v1466_v28 = vpack.c.bf16 %v1402_v62, %v1370_v15  ;;  %v1468_v26 = vpack.c.bf16 %v1404_v3, %v1372_v49  ;;  %v1505_v62 = vld [vmem:[%s10019_s2 + $0xf8] sm:$0xff] }
 0x13d   :  { %v8899_v13 = vpop.f32.mrf.mxu0  ;;  %v8911_v23 = vpop.f32.mrf.mxu1  ;;  %v6847_v56 = vcombine.low %v8918_v20, %v8923_v16  ;;  %v6850_v3 = vcombine.high %v1488_v57, %v1504_v58  ;;  %v6849_v49 = vcombine.low %v1488_v57, %v1504_v58 }
 0x13e   :  { %v1467_v7 = vpack.c.bf16 %v1403_v0, %v1371_v61  ;;  %v1469_v22 = vpack.c.bf16 %v1405_v46, %v1373_v2  ;;  %v1489_v61 = vld [vmem:[%s10019_s2 + $0x78] sm:$0xff]  ;;  %v1312_v20 = vmax.f32 %v8911_v23, 0.0  ;;  %v8980_v23 = vld [vmem:[%s10021_s4] sm:$0xff]  }
 0x13f   :  { %v8926_v25 = vpop.f32.mrf.mxu0  ;;  %v8929_v31 = vpop.f32.mrf.mxu1  ;;  %v6852_v17 = vcombine.high %v1489_v61, %v1505_v62 }
 0x140   :  { %2170 = vmatprep.subr.bf16.mxu0 %v1467_v7  ;;  %2211 = vmatprep.subr.bf16.mxu1 %v1469_v22  ;;  %v1311_v0 = vmax.f32 %v8926_v25, 0.0  ;;  %v1313_v41 = vmax.f32 %v8929_v31, 0.0  ;;  %v6851_v22 = vcombine.low %v1489_v61, %v1505_v62  ;;  %v8968_v25 = vld [vmem:[%s10021_s4 + $0x8] sm:$0xff]  }
 0x141   :  { %2109 = vmatmul.mubr.bf16.vlgmr.msra.gmra.mxu0 %v6841_v1  ;;  %v8933_v34 = vpop.f32.mrf.mxu0  ;;  %2150 = vmatmul.mubr.bf16.vlgmr.msra.gmra.mxu1 %v6843_v19  ;;  %v8937_v36 = vpop.f32.mrf.mxu1  ;;  %v1310_v19 = vmax.f32 %v8899_v13, 0.0  ;;  %v7884_v13 = vld [vmem:[%s10020_s3 + $0x8] sm:$0xff]  }
 0x142   :  { %2171 = vmatpush1.bf16.xpose.msra.mxu0 %v1466_v28  ;;  %2212 = vmatpush1.bf16.xpose.msra.mxu1 %v1468_v26  ;;  %v1342_v15 = vmax.f32 %v8933_v34, 0.0  ;;  %v1344_v7 = vmax.f32 %v8937_v36, 0.0  ;;  %v7886_v28 = vld [vmem:[%s10020_s3] sm:$0xff]  }
 0x143   :  { %2172 = vmatprep.subr.bf16.mxu0 %v1435_v32  ;;  %v1216_v63 = vpop.f32.mrf.mxu0  ;;  %2213 = vmatprep.subr.bf16.mxu1 %v1437_v29  ;;  %v1269_v38 = vpop.f32.mrf.mxu1 }
 0x144   :  { %2190 = vmatprep.mubr.bf16.mxu0 %v6846_v40  ;;  %2231 = vmatprep.mubr.bf16.mxu1 %v6848_v35  ;;  %v1343_v27 = vmax.f32 %v1216_v63, 0.0  ;;  %v1345_v39 = vmax.f32 %v1269_v38, 0.0  ;;  %v1438_v16 = vpack.c.bf16 %v1342_v15, %v1310_v19  ;;  %v1440_v21 = vpack.c.bf16 %v1344_v7, %v1312_v20 }
 0x145   :  { %v1220_v42 = vpop.f32.mrf.mxu0  ;;  %v1273_v5 = vpop.f32.mrf.mxu1 }
 0x146   :  { %v1374_v44 = vmax.f32 %v1220_v42, 0.0  ;;  %v1376_v59 = vmax.f32 %v1273_v5, 0.0  ;;  %v1439_v46 = vpack.c.bf16 %v1343_v27, %v1311_v0  ;;  %v1441_v18 = vpack.c.bf16 %v1345_v39, %v1313_v41 }
 0x147   :  { %v1222_v43 = vpop.f32.mrf.mxu0  ;;  %v1275_v45 = vpop.f32.mrf.mxu1 }
 0x148   :  { %v1375_v30 = vmax.f32 %v1222_v43, 0.0  ;;  %v1377_v55 = vmax.f32 %v1275_v45, 0.0 }
 0x149   :  { %v1224_v12 = vpop.f32.mrf.mxu0  ;;  %v1277_v48 = vpop.f32.mrf.mxu1 }
 0x14a   :  { %2173 = vmatpush1.bf16.xpose.msra.mxu0 %v1434_v6  ;;  %2214 = vmatpush1.bf16.xpose.msra.mxu1 %v1436_v24  ;;  %v1406_v50 = vmax.f32 %v1224_v12, 0.0  ;;  %v1408_v53 = vmax.f32 %v1277_v48, 0.0 }
 0x14b   :  { %v1226_v47 = vpop.f32.mrf.mxu0  ;;  %v1279_v9 = vpop.f32.mrf.mxu1 }
 0x14c   :  { %v1407_v51 = vmax.f32 %v1226_v47, 0.0  ;;  %v1409_v33 = vmax.f32 %v1279_v9, 0.0  ;;  %v1470_v2 = vpack.c.bf16 %v1406_v50, %v1374_v44  ;;  %v1472_v14 = vpack.c.bf16 %v1408_v53, %v1376_v59 }
 0x14e   :  { %v1471_v60 = vpack.c.bf16 %v1407_v51, %v1375_v30  ;;  %v1473_v1 = vpack.c.bf16 %v1409_v33, %v1377_v55 }
 0x150   :  { %2252 = vmatprep.subr.bf16.mxu0 %v1471_v60  ;;  %2293 = vmatprep.subr.bf16.mxu1 %v1473_v1 }
 0x151   :  { %2191 = vmatmul.mubr.bf16.vlgmr.msra.gmra.mxu0 %v6845_v52  ;;  %2232 = vmatmul.mubr.bf16.vlgmr.msra.gmra.mxu1 %v6847_v56 }
 0x152   :  { %2253 = vmatpush1.bf16.xpose.msra.mxu0 %v1470_v2  ;;  %2294 = vmatpush1.bf16.xpose.msra.mxu1 %v1472_v14 }
 0x153   :  { %2254 = vmatprep.subr.bf16.mxu0 %v1439_v46  ;;  %2295 = vmatprep.subr.bf16.mxu1 %v1441_v18 }
 0x154   :  { %2272 = vmatprep.mubr.bf16.mxu0 %v6850_v3  ;;  %2313 = vmatprep.mubr.bf16.mxu1 %v6852_v17 }
 0x15a   :  { %2255 = vmatpush1.bf16.xpose.msra.mxu0 %v1438_v16  ;;  %2296 = vmatpush1.bf16.xpose.msra.mxu1 %v1440_v21 }
 0x15b   :  { %7424 = vmatprep.subr.bf16.mxu1 %v8280_v54  ;;  %7416 = vmatprep.subr.bf16.mxu0 %v8280_v54 }
 0x161   :  { %2273 = vmatmul.mubr.bf16.vlgmr.msra.gmra.mxu0 %v6849_v49  ;;  %2314 = vmatmul.mubr.bf16.vlgmr.msra.gmra.mxu1 %v6851_v22 }
 0x162   :  { %7425 = vmatpush3.bf16.msra.mxu1 %v8968_v25  ;;  %7417 = vmatpush3.bf16.msra.mxu0 %v7884_v13 }
 0x163   :  { %7426 = vmatprep.subr.bf16.mxu1 %v8280_v54  ;;  %7418 = vmatprep.subr.bf16.mxu0 %v8280_v54 }
 0x164   :  { %7428 = vmatprep.mubr.msk.bf16.mxu1 %vm8281_vm1, %v8280_v54  ;;  %7420 = vmatprep.mubr.msk.bf16.mxu0 %vm8281_vm1, %v8280_v54 }
 0x166   :  { %7427 = vmatpush3.bf16.msra.mxu1 %v8980_v23  ;;  %7419 = vmatpush3.bf16.msra.mxu0 %v7886_v28 }
 0x167   :  { %7440 = vmatprep.subr.bf16.mxu1 %v8280_v54  ;;  %7432 = vmatprep.subr.bf16.mxu0 %v8280_v54 }
 0x169   :  { %7429 = vmatmul.mubr.bf16.vlgmr.msra.gmra.mxu1 %v8279_v8 }
 0x16a   :  { %7444 = vmatprep.mubr.msk.bf16.mxu1 %vm8281_vm1, %v8280_v54 }
 0x1b0   :  { %v1700_v31 = vpop.f32.mrf.mxu0 }
 0x1b1   :  { %v1741_v40 = vpop.f32.mrf.mxu1 }
 0x1b2   :  { %v1742_v32 = vadd.f32 %v1741_v40, %v1700_v31  ;;  %v1702_v26 = vpop.f32.mrf.mxu0 }
 0x1b3   :  { %v1743_v34 = vpop.f32.mrf.mxu1 }
 0x1b4   :  { %v1703_v35 = vpop.f32.mrf.mxu0 }
 0x1b5   :  { %v1744_v29 = vpop.f32.mrf.mxu1 }
 0x1b6   :  { %v1745_v36 = vadd.f32 %v1744_v29, %v1703_v35  ;;  %v1705_v63 = vpop.f32.mrf.mxu0 }
 0x1b7   :  { %v1746_v37 = vpop.f32.mrf.mxu1 }
 0x1c1   :  { %v1782_v38 = vpop.f32.mrf.mxu0  ;;  %v1823_v10 = vpop.f32.mrf.mxu1 }
 0x1c2   :  { %v1783_v42 = vadd.f32 %v1782_v38, %v1742_v32 }
 0x1c3   :  { %v1784_v4 = vpop.f32.mrf.mxu0  ;;  %v1825_v5 = vpop.f32.mrf.mxu1 }
 0x1c4   :  { %v1824_v11 = vadd.f32 %v1823_v10, %v1783_v42 }
 0x1c5   :  { %v1785_v43 = vpop.f32.mrf.mxu0  ;;  %v1826_v6 = vpop.f32.mrf.mxu1 }
 0x1c6   :  { %v1786_v45 = vadd.f32 %v1785_v43, %v1745_v36 }
 0x1c7   :  { %v1787_v24 = vpop.f32.mrf.mxu0  ;;  %v1828_v12 = vpop.f32.mrf.mxu1 }
 0x1c8   :  { %v1827_v48 = vadd.f32 %v1826_v6, %v1786_v45 }
 0x1d1   :  { %v1864_v47 = vpop.f32.mrf.mxu0  ;;  %v1905_v50 = vpop.f32.mrf.mxu1 }
 0x1d2   :  { %v1865_v30 = vadd.f32 %v1864_v47, %v1824_v11 }
 0x1d3   :  { %v1866_v51 = vpop.f32.mrf.mxu0  ;;  %v1907_v52 = vpop.f32.mrf.mxu1 }
 0x1d4   :  { %v1906_v9 = vadd.f32 %v1905_v50, %v1865_v30 }
 0x1d5   :  { %v1867_v27 = vpop.f32.mrf.mxu0  ;;  %v1908_v55 = vpop.f32.mrf.mxu1 }
 0x1d6   :  { %v1868_v21 = vadd.f32 %v1867_v27, %v1827_v48 }
 0x1d7   :  { %v1869_v53 = vpop.f32.mrf.mxu0  ;;  %v1910_v33 = vpop.f32.mrf.mxu1 }
 0x1d8   :  { %v1909_v22 = vadd.f32 %v1908_v55, %v1868_v21 }
 0x1e1   :  { %v1946_v57 = vpop.f32.mrf.mxu0  ;;  %v1987_v58 = vpop.f32.mrf.mxu1 }
 0x1e2   :  { %v1947_v13 = vadd.f32 %v1946_v57, %v1906_v9 }
 0x1e3   :  { %v1948_v39 = vpop.f32.mrf.mxu0  ;;  %v1989_v44 = vpop.f32.mrf.mxu1 }
 0x1e4   :  { %v1988_v31 = vadd.f32 %v1987_v58, %v1947_v13  ;;  %v9020_v13 = vld [vmem:[%s10021_s4 + $0x18] sm:$0xff]  }
 0x1e5   :  { %v1949_v60 = vpop.f32.mrf.mxu0  ;;  %v1990_v56 = vpop.f32.mrf.mxu1  ;;  %7441 = vmatpush3.bf16.msra.mxu1 %v9020_v13 }
 0x1e6   :  { %v1950_v28 = vadd.f32 %v1949_v60, %v1909_v22  ;;  %7442 = vmatprep.subr.bf16.mxu1 %v8280_v54 }
 0x1e7   :  { %v1951_v61 = vpop.f32.mrf.mxu0  ;;  %v1992_v62 = vpop.f32.mrf.mxu1 }
 0x1e8   :  { %v1991_v32 = vadd.f32 %v1990_v56, %v1950_v28  ;;  %v6853_v62 = vld [vmem:[%s10022_s5] ss:$0 sm:$0xff]  ;;  %v9026_v28 = vld [vmem:[%s10021_s4 + $0x10] sm:$0xff]  }
 0x1e9   :  { %7443 = vmatpush3.bf16.msra.mxu1 %v9026_v28 }
 0x1ea   :  { %7456 = vmatprep.subr.bf16.mxu1 %v8280_v54 }
 0x1ec   :  { %7445 = vmatmul.mubr.bf16.vlgmr.msra.gmra.mxu1 %v8279_v8 }
 0x1ed   :  { %7457 = vmatpush3.bf16.msra.mxu1 %v8968_v25  ;;  %7460 = vmatprep.mubr.msk.bf16.mxu1 %vm8281_vm1, %v8280_v54 }
 0x1ee   :  { %7458 = vmatprep.subr.bf16.mxu1 %v8280_v54 }
 0x1f1   :  { %v2028_v0 = vpop.f32.mrf.mxu0  ;;  %v2069_v59 = vpop.f32.mrf.mxu1  ;;  %7459 = vmatpush3.bf16.msra.mxu1 %v8980_v23 }
 0x1f2   :  { %v2029_v26 = vadd.f32 %v2028_v0, %v1988_v31  ;;  %7472 = vmatprep.subr.bf16.mxu1 %v8280_v54 }
 0x1f3   :  { %v2030_v1 = vpop.f32.mrf.mxu0  ;;  %v2071_v41 = vpop.f32.mrf.mxu1 }
 0x1f4   :  { %v2070_v37 = vadd.f32 %v2069_v59, %v2029_v26  ;;  %v9042_v26 = vld [vmem:[%s10020_s3 + $0x18] sm:$0xff]  }
 0x1f5   :  { %v2031_v2 = vpop.f32.mrf.mxu0  ;;  %v2072_v3 = vpop.f32.mrf.mxu1 }
 0x1f6   :  { %v2032_v29 = vadd.f32 %v2031_v2, %v1991_v32 }
 0x1f7   :  { %v2033_v46 = vpop.f32.mrf.mxu0  ;;  %v2074_v14 = vpop.f32.mrf.mxu1 }
 0x1f8   :  { %v2073_v42 = vadd.f32 %v2072_v3, %v2032_v29 }
 0x201   :  { %v2110_v17 = vpop.f32.mrf.mxu0  ;;  %v2151_v18 = vpop.f32.mrf.mxu1 }
 0x202   :  { %v2111_v4 = vadd.f32 %v2110_v17, %v2070_v37 }
 0x203   :  { %v2112_v15 = vpop.f32.mrf.mxu0  ;;  %v2153_v7 = vpop.f32.mrf.mxu1 }
 0x204   :  { %v2152_v43 = vadd.f32 %v2151_v18, %v2111_v4 }
 0x205   :  { %v2113_v19 = vpop.f32.mrf.mxu0  ;;  %v2154_v20 = vpop.f32.mrf.mxu1 }
 0x206   :  { %v2114_v11 = vadd.f32 %v2113_v19, %v2073_v42 }
 0x207   :  { %v2115_v16 = vpop.f32.mrf.mxu0  ;;  %v2156_v49 = vpop.f32.mrf.mxu1 }
 0x208   :  { %v2155_v6 = vadd.f32 %v2154_v20, %v2114_v11 }
 0x211   :  { %v2192_v40 = vpop.f32.mrf.mxu0  ;;  %v2233_v34 = vpop.f32.mrf.mxu1 }
 0x212   :  { %v2193_v45 = vadd.f32 %v2192_v40, %v2152_v43 }
 0x213   :  { %v2194_v35 = vpop.f32.mrf.mxu0  ;;  %v2235_v36 = vpop.f32.mrf.mxu1 }
 0x214   :  { %v2234_v48 = vadd.f32 %v2233_v34, %v2193_v45  ;;  %v9049_v35 = vld [vmem:[%s10020_s3 + $0x10] sm:$0xff]  }
 0x215   :  { %v2195_v63 = vpop.f32.mrf.mxu0  ;;  %v2236_v38 = vpop.f32.mrf.mxu1 }
 0x216   :  { %v2196_v24 = vadd.f32 %v2195_v63, %v2155_v6  ;;  %v9067_v6 = vld [vmem:[%s10022_s5 + $0x1] ss:$0 sm:$0xff] }
 0x217   :  { %v2197_v10 = vpop.f32.mrf.mxu0  ;;  %v2238_v5 = vpop.f32.mrf.mxu1 }
 0x218   :  { %v2237_v50 = vadd.f32 %v2236_v38, %v2196_v24 }
 0x221   :  { %v2274_v12 = vpop.f32.mrf.mxu0  ;;  %v2315_v47 = vpop.f32.mrf.mxu1 }
 0x222   :  { %v2275_v51 = vadd.f32 %v2274_v12, %v2234_v48 }
 0x223   :  { %v2276_v30 = vpop.f32.mrf.mxu0  ;;  %v2317_v9 = vpop.f32.mrf.mxu1 }
 0x224   :  { %v2316_v33 = vadd.f32 %v2315_v47, %v2275_v51 }
 0x225   :  { %v2277_v52 = vpop.f32.mrf.mxu0  ;;  %v2318_v55 = vpop.f32.mrf.mxu1 }
 0x226   :  { %v2278_v27 = vadd.f32 %v2277_v52, %v2237_v50 }
 0x227   :  { %v2279_v53 = vpop.f32.mrf.mxu0  ;;  %v2320_v58 = vpop.f32.mrf.mxu1 }
 0x228   :  { %v2319_v57 = vadd.f32 %v2318_v55, %v2278_v27 }
 0x229   :  { %v2443_v44 = vpop.f32.mrf.mxu1 }
 0x22a   :  { %v2322_v39 = vpack.c.bf16 %v2319_v57, %v2316_v33 }
 0x22b   :  { %v7430_v60 = vpop.f32.mrf.mxu1 }
 0x22c   :  { %7421 = vmatmul.mubr.msk.bf16.vlgmr.msra.gmra.mxu0 %vm427_vm0, %v2322_v39 }
 0x22d   :  { %7433 = vmatpush3.bf16.msra.mxu0 %v8968_v25  ;;  %7436 = vmatprep.mubr.msk.bf16.mxu0 %vm8281_vm1, %v8280_v54  ;;  %v2446_v56 = vpop.f32.mrf.mxu1 }
 0x22e   :  { %7434 = vmatprep.subr.bf16.mxu0 %v8280_v54 }
 0x22f   :  { %v7431_v61 = vpop.f32.mrf.mxu1 }
 0x231   :  { %7435 = vmatpush3.bf16.msra.mxu0 %v8980_v23 }
 0x232   :  { %7448 = vmatprep.subr.bf16.mxu0 %v8280_v54 }
 0x2ac   :  { %v2608_v29 = vpop.f32.mrf.mxu1 }
 0x2ae   :  { %v7446_v36 = vpop.f32.mrf.mxu1 }
 0x2b0   :  { %v2611_v63 = vpop.f32.mrf.mxu1 }
 0x2b2   :  { %v7447_v37 = vpop.f32.mrf.mxu1 }
 0x2ec   :  { %v2383_v0 = vpop.f32.mrf.mxu0 }
 0x2ed   :  { %v9006_v59 = vadd.f32 %v6853_v62, %v2383_v0 }
 0x2ee   :  { %v7422_v1 = vpop.f32.mrf.mxu0 }
 0x2ef   :  { %v2449_v41 = vadd.f32 %v2443_v44, %v9006_v59 }
 0x2f0   :  { %v2386_v2 = vpop.f32.mrf.mxu0 }
 0x2f1   :  { %7979 = vtanh.f32 %v2449_v41  ;;  %v9009_v3 = vadd.f32 %v6853_v62, %v2386_v2  ;;  %v6859_v17 = vmul.f32 -1.442695, %v2449_v41 }
 0x2f2   :  { %v7423_v46 = vpop.f32.mrf.mxu0 }
 0x2f3   :  { %7981 = vpow2.f32 %v6859_v17 }
 0x2fe   :  { %v7980_v14 = vpop.eup %7979 }
 0x2ff   :  { %2459 = vrot.lane.b32.xlu0 %v7980_v14, %s8282_s24 }
 0x300   :  { %v7982_v18 = vpop.eup %7981 }
 0x301   :  { %v2453_v15 = vadd.f32 1.0, %v7982_v18 }
 0x303   :  { %7983 = vrcp.f32 %v2453_v15 }
 0x310   :  { %v7984_v7 = vpop.eup %7983 }
 0x311   :  { %v2457_v16 = vmul.f32 0.0, %v7984_v7 }
 0x371   :  { %v2460_v19 = vpop.permute.xlu0 %2459 }
 0x372   :  { %v2462_v20 = vmul.f32 %v7984_v7, %v2460_v19 }
 0x374   :  { %2464 = vrot.lane.b32.xlu0 %v2462_v20, %s8282_s24 }
 0x3e6   :  { %v2465_v21 = vpop.permute.xlu0 %2464 }
 0x3e7   :  { %v9013_v49 = vadd.f32 %v2465_v21, %v2457_v16 }
 0x3e9   :  { %7985 = vtanh.f32 %v9013_v49  ;;  %v2533_v56 = vrot.slane %v9013_v49, 6  ;;  %v9093_v49 = vld [vmem:[%s10021_s4 + $0x28] sm:$0xff]  }
 0x3f6   :  { %v7986_v22 = vpop.eup %7985 }
 0x3f7   :  { %2470 = vrot.lane.b32.xlu1 %v7986_v22, %s8282_s24 }
 0x469   :  { %v2471_v31 = vpop.permute.xlu1 %2470 }
 0x46a   :  { %v2473_v40 = vmul.f32 %v7984_v7, %v2471_v31  ;;  %v9099_v31 = vld [vmem:[%s10020_s3 + $0x28] sm:$0xff]  }
 0x46c   :  { %v2474_v32 = vpack.c.bf16 %v2473_v40, %v2473_v40  ;;  %v9107_v40 = vld [vmem:[%s10021_s4 + $0x20] sm:$0xff]  }
 0x46e   :  { %2476 = vrot.lane.b32.xlu1 %v2474_v32, %s8283_s0  ;;  %v9117_v32 = vld [vmem:[%s10020_s3 + $0x20] sm:$0xff]  }
 0x4e0   :  { %v2477_v34 = vpop.permute.xlu1 %2476 }
 0x4e1   :  { %7437 = vmatmul.mubr.msk.bf16.vlgmr.msra.gmra.mxu0 %vm427_vm0, %v2477_v34 }
 0x4e2   :  { %7449 = vmatpush3.bf16.msra.mxu0 %v9042_v26  ;;  %7452 = vmatprep.mubr.msk.bf16.mxu0 %vm8281_vm1, %v8280_v54 }
 0x4e3   :  { %7450 = vmatprep.subr.bf16.mxu0 %v8280_v54 }
 0x4e6   :  { %7451 = vmatpush3.bf16.msra.mxu0 %v9049_v35 }
 0x4e7   :  { %7464 = vmatprep.subr.bf16.mxu0 %v8280_v54 }
 0x4e9   :  { %7453 = vmatmul.mubr.msk.bf16.vlgmr.msra.gmra.mxu0 %vm427_vm0, %v2477_v34 }
 0x4ea   :  { %7465 = vmatpush3.bf16.msra.mxu0 %v9020_v13  ;;  %7468 = vmatprep.mubr.msk.bf16.mxu0 %vm8281_vm1, %v8280_v54 }
 0x4eb   :  { %7466 = vmatprep.subr.bf16.mxu0 %v8280_v54 }
 0x4ee   :  { %7467 = vmatpush3.bf16.msra.mxu0 %v9026_v28 }
 0x4ef   :  { %7480 = vmatprep.subr.bf16.mxu0 %v8280_v54 }
 0x5a1   :  { %v2515_v38 = vpop.f32.mrf.mxu0 }
 0x5a2   :  { %v2522_v10 = vrot.slane %v2515_v38, 6 }
 0x5a3   :  { %v7438_v42 = vpop.f32.mrf.mxu0 }
 0x5a4   :  { %v2524_v4 = vadd.f32 %v2522_v10, %v9006_v59 }
 0x5a5   :  { %v2518_v5 = vpop.f32.mrf.mxu0 }
 0x5a6   :  { %7987 = vtanh.f32 %v2524_v4  ;;  %v6861_v51 = vmul.f32 -1.442695, %v2524_v4 }
 0x5a7   :  { %v7439_v11 = vpop.f32.mrf.mxu0 }
 0x5a9   :  { %v2660_v43 = vpop.f32.mrf.mxu0 }
 0x5aa   :  { %v2661_v45 = vadd.f32 %v2660_v43, %v2608_v29 }
 0x5ab   :  { %v7454_v24 = vpop.f32.mrf.mxu0 }
 0x5ac   :  { %v2674_v12 = vadd.f32 %v9067_v6, %v2661_v45 }
 0x5ad   :  { %v2663_v48 = vpop.f32.mrf.mxu0 }
 0x5ae   :  { %7989 = vtanh.f32 %v2674_v12  ;;  %v6877_v9 = vmul.f32 -1.442695, %v2674_v12  ;;  %v9145_v12 = vld [vmem:[%s10022_s5 + $0x2] ss:$0 sm:$0xff] }
 0x5af   :  { %v7455_v47 = vpop.f32.mrf.mxu0  ;;  %7991 = vpow2.f32 %v6861_v51 }
 0x5b0   :  { %7993 = vpow2.f32 %v6877_v9 }
 0x5b3   :  { %v7988_v30 = vpop.eup %7987 }
 0x5b4   :  { %2537 = vrot.lane.b32.xlu0 %v7988_v30, %s8282_s24 }
 0x5bb   :  { %v7990_v50 = vpop.eup %7989 }
 0x5bc   :  { %2684 = vrot.lane.b32.xlu1 %v7990_v50, %s8282_s24  ;;  %v7992_v52 = vpop.eup %7991 }
 0x5bd   :  { %v2528_v27 = vadd.f32 1.0, %v7992_v52  ;;  %v7994_v55 = vpop.eup %7993 }
 0x5be   :  { %v2678_v53 = vadd.f32 1.0, %v7994_v55 }
 0x5bf   :  { %7995 = vrcp.f32 %v2528_v27 }
 0x5c0   :  { %7997 = vrcp.f32 %v2678_v53 }
 0x5cc   :  { %v7996_v33 = vpop.eup %7995 }
 0x5cd   :  { %v7998_v39 = vpop.eup %7997  ;;  %v2535_v61 = vmul.f32 %v7996_v33, %v2533_v56 }
 0x5ce   :  { %v2682_v1 = vmul.f32 0.0, %v7998_v39 }
 0x626   :  { %v2538_v57 = vpop.permute.xlu0 %2537 }
 0x627   :  { %v2540_v58 = vmul.f32 %v7996_v33, %v2538_v57 }
 0x629   :  { %2542 = vrot.lane.b32.xlu0 %v2540_v58, %s8282_s24 }
 0x62e   :  { %v2685_v44 = vpop.permute.xlu1 %2684 }
 0x62f   :  { %v2687_v60 = vmul.f32 %v7998_v39, %v2685_v44 }
 0x631   :  { %2689 = vrot.lane.b32.xlu1 %v2687_v60, %s8282_s24 }
 0x69b   :  { %v2543_v62 = vpop.permute.xlu0 %2542 }
 0x69c   :  { %v9075_v0 = vadd.f32 %v2543_v62, %v2535_v61 }
 0x69e   :  { %7999 = vtanh.f32 %v9075_v0 }
 0x6a3   :  { %v2690_v41 = vpop.permute.xlu1 %2689 }
 0x6a4   :  { %v9078_v2 = vadd.f32 %v2690_v41, %v2682_v1 }
 0x6a6   :  { %8001 = vtanh.f32 %v9078_v2 }
 0x6ab   :  { %v8000_v46 = vpop.eup %7999 }
 0x6ac   :  { %2548 = vrot.lane.b32.xlu0 %v8000_v46, %s8282_s24 }
 0x6b3   :  { %v8002_v14 = vpop.eup %8001 }
 0x6b4   :  { %2695 = vrot.lane.b32.xlu1 %v8002_v14, %s8282_s24 }
 0x71e   :  { %v2549_v17 = vpop.permute.xlu0 %2548 }
 0x71f   :  { %v2551_v18 = vmul.f32 %v7996_v33, %v2549_v17 }
 0x721   :  { %v2699_v15 = vpack.c.bf16 %v2551_v18, %v2551_v18 }
 0x723   :  { %v2701_v7 = vrot.slane %v2699_v15, 1 }
 0x725   :  { %2702 = vrot.lane.b32.xlu0 %v2701_v7, %s8283_s0 }
 0x726   :  { %v2696_v19 = vpop.permute.xlu1 %2695 }
 0x727   :  { %v2698_v20 = vmul.f32 %v7998_v39, %v2696_v19 }
 0x729   :  { %v2778_v16 = vpack.c.bf16 %v2698_v20, %v2698_v20 }
 0x72b   :  { %2780 = vrot.lane.b32.xlu1 %v2778_v16, %s8283_s0  ;;  %v2759_v16 = vrot.slane %v9075_v0, 6 }
 0x797   :  { %v2703_v21 = vpop.permute.xlu0 %2702 }
 0x798   :  { %7461 = vmatmul.mubr.msk.bf16.vlgmr.msra.gmra.mxu1 %vm427_vm0, %v2703_v21 }
 0x799   :  { %7473 = vmatpush3.bf16.msra.mxu1 %v9042_v26  ;;  %7476 = vmatprep.mubr.msk.bf16.mxu1 %vm8281_vm1, %v8280_v54 }
 0x79a   :  { %7474 = vmatprep.subr.bf16.mxu1 %v8280_v54 }
 0x79d   :  { %7475 = vmatpush3.bf16.msra.mxu1 %v9049_v35  ;;  %v2781_v22 = vpop.permute.xlu1 %2780 }
 0x79e   :  { %7469 = vmatmul.mubr.msk.bf16.vlgmr.msra.gmra.mxu0 %vm427_vm0, %v2781_v22  ;;  %7488 = vmatprep.subr.bf16.mxu1 %v8280_v54 }
 0x79f   :  { %7481 = vmatpush3.bf16.msra.mxu0 %v9093_v49  ;;  %7484 = vmatprep.mubr.msk.bf16.mxu0 %vm8281_vm1, %v8280_v54 }
 0x7a0   :  { %7477 = vmatmul.mubr.msk.bf16.vlgmr.msra.gmra.mxu1 %vm427_vm0, %v2703_v21  ;;  %7482 = vmatprep.subr.bf16.mxu0 %v8280_v54 }
 0x7a1   :  { %7489 = vmatpush3.bf16.msra.mxu1 %v9099_v31  ;;  %7492 = vmatprep.mubr.msk.bf16.mxu1 %vm8281_vm1, %v8280_v54 }
 0x7a2   :  { %7490 = vmatprep.subr.bf16.mxu1 %v8280_v54 }
 0x7a3   :  { %7483 = vmatpush3.bf16.msra.mxu0 %v9107_v40 }
 0x7a4   :  { %7496 = vmatprep.subr.bf16.mxu0 %v8280_v54 }
 0x7a5   :  { %7491 = vmatpush3.bf16.msra.mxu1 %v9117_v32 }
 0x7a6   :  { %7485 = vmatmul.mubr.bf16.vlgmr.msra.gmra.mxu0 %v8279_v8  ;;  %7504 = vmatprep.subr.bf16.mxu1 %v8280_v54 }
 0x7a7   :  { %7497 = vmatpush3.bf16.msra.mxu0 %v8968_v25  ;;  %7500 = vmatprep.mubr.msk.bf16.mxu0 %vm8281_vm1, %v8280_v54 }
 0x7a8   :  { %7493 = vmatmul.mubr.msk.bf16.vlgmr.msra.gmra.mxu1 %vm427_vm0, %v2781_v22  ;;  %7498 = vmatprep.subr.bf16.mxu0 %v8280_v54 }
 0x7a9   :  { %7505 = vmatpush3.bf16.msra.mxu1 %v9020_v13  ;;  %7508 = vmatprep.mubr.msk.bf16.mxu1 %vm8281_vm1, %v8280_v54 }
 0x7aa   :  { %7506 = vmatprep.subr.bf16.mxu1 %v8280_v54 }
 0x7ab   :  { %7499 = vmatpush3.bf16.msra.mxu0 %v8980_v23 }
 0x7ac   :  { %7512 = vmatprep.subr.bf16.mxu0 %v8280_v54 }
 0x7ad   :  { %7507 = vmatpush3.bf16.msra.mxu1 %v9026_v28 }
 0x7ae   :  { %7520 = vmatprep.subr.bf16.mxu1 %v8280_v54 }
 0x858   :  { %v2741_v25 = vpop.f32.mrf.mxu1 }
 0x859   :  { %v2748_v34 = vrot.slane %v2741_v25, 4 }
 0x85a   :  { %v7462_v29 = vpop.f32.mrf.mxu1 }
 0x85b   :  { %v2750_v36 = vadd.f32 %v2748_v34, %v9006_v59 }
 0x85c   :  { %v2744_v63 = vpop.f32.mrf.mxu1 }
 0x85d   :  { %8003 = vtanh.f32 %v2750_v36  ;;  %v6879_v57 = vmul.f32 -1.442695, %v2750_v36 }
 0x85e   :  { %v7463_v13 = vpop.f32.mrf.mxu1  ;;  %v2819_v37 = vpop.f32.mrf.mxu0 }
 0x860   :  { %v7470_v38 = vpop.f32.mrf.mxu0  ;;  %v2859_v10 = vpop.f32.mrf.mxu1 }
 0x861   :  { %v2860_v42 = vadd.f32 %v2859_v10, %v2819_v37 }
 0x862   :  { %v2822_v4 = vpop.f32.mrf.mxu0  ;;  %v7478_v23 = vpop.f32.mrf.mxu1 }
 0x863   :  { %v2865_v5 = vadd.f32 %v9067_v6, %v2860_v42 }
 0x864   :  { %v7471_v11 = vpop.f32.mrf.mxu0  ;;  %v2862_v28 = vpop.f32.mrf.mxu1 }
 0x865   :  { %8005 = vtanh.f32 %v2865_v5  ;;  %v6882_v58 = vmul.f32 -1.442695, %v2865_v5 }
 0x866   :  { %v7479_v43 = vpop.f32.mrf.mxu1  ;;  %v2946_v45 = vpop.f32.mrf.mxu0 }
 0x868   :  { %v2998_v24 = vpop.f32.mrf.mxu1  ;;  %v7486_v48 = vpop.f32.mrf.mxu0 }
 0x869   :  { %v2999_v47 = vadd.f32 %v2998_v24, %v2946_v45 }
 0x86a   :  { %v8004_v30 = vpop.eup %8003  ;;  %v7494_v50 = vpop.f32.mrf.mxu1 }
 0x86b   :  { %v2949_v51 = vpop.f32.mrf.mxu0  ;;  %v3012_v9 = vadd.f32 %v9145_v12, %v2999_v47  ;;  %2763 = vrot.lane.b32.xlu0 %v8004_v30, %s8282_s24 }
 0x86c   :  { %v3001_v52 = vpop.f32.mrf.mxu1 }
 0x86d   :  { %v7487_v27 = vpop.f32.mrf.mxu0  ;;  %8007 = vtanh.f32 %v3012_v9  ;;  %v6898_v39 = vmul.f32 -1.442695, %v3012_v9 }
 0x86e   :  { %v7495_v55 = vpop.f32.mrf.mxu1  ;;  %8009 = vpow2.f32 %v6879_v57 }
 0x86f   :  { %8011 = vpow2.f32 %v6882_v58 }
 0x870   :  { %8013 = vpow2.f32 %v6898_v39 }
 0x872   :  { %v8006_v53 = vpop.eup %8005 }
 0x873   :  { %2875 = vrot.lane.b32.xlu1 %v8006_v53, %s8282_s24 }
 0x87a   :  { %v8008_v33 = vpop.eup %8007 }
 0x87b   :  { %3022 = vrot.lane.b32.xlu0 %v8008_v33, %s8282_s24  ;;  %v8010_v44 = vpop.eup %8009 }
 0x87c   :  { %v2754_v60 = vadd.f32 1.0, %v8010_v44  ;;  %v8012_v56 = vpop.eup %8011 }
 0x87d   :  { %v2869_v61 = vadd.f32 1.0, %v8012_v56  ;;  %v8014_v62 = vpop.eup %8013 }
 0x87e   :  { %8015 = vrcp.f32 %v2754_v60  ;;  %v3016_v1 = vadd.f32 1.0, %v8014_v62 }
 0x87f   :  { %8017 = vrcp.f32 %v2869_v61 }
 0x880   :  { %8019 = vrcp.f32 %v3016_v1 }
 0x88b   :  { %v8016_v41 = vpop.eup %8015 }
 0x88c   :  { %v8018_v17 = vpop.eup %8017  ;;  %v2761_v21 = vmul.f32 %v8016_v41, %v2759_v16 }
 0x88d   :  { %v8020_v7 = vpop.eup %8019  ;;  %v2873_v34 = vmul.f32 %v8018_v17, %v9078_v2 }
 0x88e   :  { %v3020_v63 = vmul.f32 0.0, %v8020_v7 }
 0x8dd   :  { %v2764_v46 = vpop.permute.xlu0 %2763 }
 0x8de   :  { %v2766_v14 = vmul.f32 %v8016_v41, %v2764_v46 }
 0x8e0   :  { %2768 = vrot.lane.b32.xlu1 %v2766_v14, %s8282_s24 }
 0x8e5   :  { %v2876_v18 = vpop.permute.xlu1 %2875 }
 0x8e6   :  { %v2878_v15 = vmul.f32 %v8018_v17, %v2876_v18 }
 0x8e8   :  { %2880 = vrot.lane.b32.xlu0 %v2878_v15, %s8282_s24 }
 0x8ed   :  { %v3023_v19 = vpop.permute.xlu0 %3022 }
 0x8ee   :  { %v3025_v20 = vmul.f32 %v8020_v7, %v3023_v19 }
 0x8f0   :  { %3027 = vrot.lane.b32.xlu1 %v3025_v20, %s8282_s24  ;;  %v9227_v20 = vld [vmem:[%s10022_s5 + $0x3] ss:$0 sm:$0xff] }
 0x952   :  { %v2769_v22 = vpop.permute.xlu1 %2768 }
 0x953   :  { %v9155_v25 = vadd.f32 %v2769_v22, %v2761_v21 }
 0x955   :  { %8021 = vtanh.f32 %v9155_v25 }
 0x95a   :  { %v2881_v29 = vpop.permute.xlu0 %2880 }
 0x95b   :  { %v9159_v36 = vadd.f32 %v2881_v29, %v2873_v34 }
 0x95d   :  { %8023 = vtanh.f32 %v9159_v36 }
 0x962   :  { %v8022_v13 = vpop.eup %8021  ;;  %v3028_v37 = vpop.permute.xlu1 %3027 }
 0x963   :  { %v9162_v38 = vadd.f32 %v3028_v37, %v3020_v63  ;;  %2774 = vrot.lane.b32.xlu0 %v8022_v13, %s8282_s24 }
 0x965   :  { %8025 = vtanh.f32 %v9162_v38 }
 0x96a   :  { %v8024_v0 = vpop.eup %8023 }
 0x96b   :  { %2886 = vrot.lane.b32.xlu1 %v8024_v0, %s8282_s24 }
 0x972   :  { %v8026_v10 = vpop.eup %8025 }
 0x973   :  { %3033 = vrot.lane.b32.xlu0 %v8026_v10, %s8282_s24 }
 0x9d5   :  { %v2775_v2 = vpop.permute.xlu0 %2774 }
 0x9d6   :  { %v2777_v42 = vmul.f32 %v8016_v41, %v2775_v2 }
 0x9d8   :  { %v3037_v4 = vpack.c.bf16 %v2777_v42, %v2777_v42 }
 0x9da   :  { %v3039_v23 = vrot.slane %v3037_v4, 2 }
 0x9dc   :  { %3040 = vrot.lane.b32.xlu1 %v3039_v23, %s8283_s0 }
 0x9dd   :  { %v2887_v5 = vpop.permute.xlu1 %2886 }
 0x9de   :  { %v2889_v11 = vmul.f32 %v8018_v17, %v2887_v5 }
 0x9e0   :  { %v3116_v28 = vpack.c.bf16 %v2889_v11, %v2889_v11 }
 0x9e2   :  { %3118 = vrot.lane.b32.xlu0 %v3116_v28, %s8283_s0 }
 0x9e5   :  { %v3034_v43 = vpop.permute.xlu0 %3033 }
 0x9e6   :  { %v3036_v45 = vmul.f32 %v8020_v7, %v3034_v43 }
 0x9e8   :  { %v3228_v24 = vpack.c.bf16 %v3036_v45, %v3036_v45 }
 0x9ea   :  { %3230 = vrot.lane.b32.xlu1 %v3228_v24, %s8283_s0 }
 0xa4e   :  { %v3041_v48 = vpop.permute.xlu1 %3040 }
 0xa4f   :  { %7501 = vmatmul.mubr.msk.bf16.vlgmr.msra.gmra.mxu0 %vm427_vm0, %v3041_v48 }
 0xa50   :  { %7513 = vmatpush3.bf16.msra.mxu0 %v9042_v26  ;;  %7516 = vmatprep.mubr.msk.bf16.mxu0 %vm8281_vm1, %v8280_v54  ;;  %v7895_v26 = vld [vmem:[%s10021_s4 + $0x38] sm:$0xff]  }
 0xa51   :  { %7514 = vmatprep.subr.bf16.mxu0 %v8280_v54 }
 0xa54   :  { %7515 = vmatpush3.bf16.msra.mxu0 %v9049_v35  ;;  %v3119_v47 = vpop.permute.xlu0 %3118 }
 0xa55   :  { %7509 = vmatmul.mubr.msk.bf16.vlgmr.msra.gmra.mxu1 %vm427_vm0, %v3119_v47  ;;  %7528 = vmatprep.subr.bf16.mxu0 %v8280_v54 }
 0xa56   :  { %7521 = vmatpush3.bf16.msra.mxu1 %v9093_v49  ;;  %7524 = vmatprep.mubr.msk.bf16.mxu1 %vm8281_vm1, %v8280_v54  ;;  %v7896_v49 = vld [vmem:[%s10020_s3 + $0x38] sm:$0xff]  }
 0xa57   :  { %7517 = vmatmul.mubr.msk.bf16.vlgmr.msra.gmra.mxu0 %vm427_vm0, %v3041_v48  ;;  %7522 = vmatprep.subr.bf16.mxu1 %v8280_v54 }
 0xa58   :  { %7529 = vmatpush3.bf16.msra.mxu0 %v9099_v31  ;;  %7532 = vmatprep.mubr.msk.bf16.mxu0 %vm8281_vm1, %v8280_v54  ;;  %v7897_v31 = vld [vmem:[%s10021_s4 + $0x30] sm:$0xff]  }
 0xa59   :  { %7530 = vmatprep.subr.bf16.mxu0 %v8280_v54 }
 0xa5a   :  { %7523 = vmatpush3.bf16.msra.mxu1 %v9107_v40  ;;  %v7898_v40 = vld [vmem:[%s10020_s3 + $0x30] sm:$0xff]  }
 0xa5b   :  { %7536 = vmatprep.subr.bf16.mxu1 %v8280_v54 }
 0xa5c   :  { %7531 = vmatpush3.bf16.msra.mxu0 %v9117_v32  ;;  %v3231_v35 = vpop.permute.xlu1 %3230 }
 0xa5d   :  { %7525 = vmatmul.mubr.msk.bf16.vlgmr.msra.gmra.mxu1 %vm427_vm0, %v3231_v35  ;;  %7544 = vmatprep.subr.bf16.mxu0 %v8280_v54 }
 0xa5e   :  { %7537 = vmatpush3.bf16.msra.mxu1 %v7895_v26  ;;  %7540 = vmatprep.mubr.msk.bf16.mxu1 %vm8281_vm1, %v8280_v54 }
 0xa5f   :  { %7533 = vmatmul.mubr.msk.bf16.vlgmr.msra.gmra.mxu0 %vm427_vm0, %v3119_v47  ;;  %7538 = vmatprep.subr.bf16.mxu1 %v8280_v54 }
 0xa60   :  { %7545 = vmatpush3.bf16.msra.mxu0 %v7896_v49  ;;  %7548 = vmatprep.mubr.msk.bf16.mxu0 %vm8281_vm1, %v8280_v54 }
 0xa61   :  { %7546 = vmatprep.subr.bf16.mxu0 %v8280_v54 }
 0xa62   :  { %7539 = vmatpush3.bf16.msra.mxu1 %v7897_v31 }
 0xa63   :  { %7552 = vmatprep.subr.bf16.mxu1 %v8280_v54 }
 0xa64   :  { %7547 = vmatpush3.bf16.msra.mxu0 %v7898_v40 }
 0xa65   :  { %7541 = vmatmul.mubr.bf16.vlgmr.msra.gmra.mxu1 %v8279_v8  ;;  %7560 = vmatprep.subr.bf16.mxu0 %v8280_v54 }
 0xa66   :  { %7556 = vmatprep.mubr.msk.bf16.mxu1 %vm8281_vm1, %v8280_v54 }
 0xa67   :  { %7549 = vmatmul.mubr.msk.bf16.vlgmr.msra.gmra.mxu0 %vm427_vm0, %v3231_v35 }
 0xa68   :  { %7564 = vmatprep.mubr.msk.bf16.mxu0 %vm8281_vm1, %v8280_v54 }
 0xb0f   :  { %v3079_v32 = vpop.f32.mrf.mxu0 }
 0xb10   :  { %v3086_v30 = vrot.slane %v3079_v32, 2 }
 0xb11   :  { %v7502_v50 = vpop.f32.mrf.mxu0 }
 0xb12   :  { %v3088_v51 = vadd.f32 %v3086_v30, %v9006_v59 }
 0xb13   :  { %v3082_v9 = vpop.f32.mrf.mxu0 }
 0xb14   :  { %8027 = vtanh.f32 %v3088_v51  ;;  %v6900_v42 = vmul.f32 -1.442695, %v3088_v51 }
 0xb15   :  { %v7503_v52 = vpop.f32.mrf.mxu0  ;;  %v3157_v27 = vpop.f32.mrf.mxu1 }
 0xb17   :  { %v7510_v8 = vpop.f32.mrf.mxu1  ;;  %v3197_v55 = vpop.f32.mrf.mxu0 }
 0xb18   :  { %v3198_v53 = vadd.f32 %v3197_v55, %v3157_v27  ;;  %v3097_v55 = vrot.slane %v9155_v25, 6 }
 0xb19   :  { %v3160_v33 = vpop.f32.mrf.mxu1  ;;  %v7518_v57 = vpop.f32.mrf.mxu0 }
 0xb1a   :  { %v3203_v58 = vadd.f32 %v9067_v6, %v3198_v53 }
 0xb1b   :  { %v7511_v39 = vpop.f32.mrf.mxu1  ;;  %v3200_v44 = vpop.f32.mrf.mxu0 }
 0xb1c   :  { %8029 = vtanh.f32 %v3203_v58  ;;  %v6903_v4 = vmul.f32 -1.442695, %v3203_v58 }
 0xb1d   :  { %v7519_v60 = vpop.f32.mrf.mxu0  ;;  %v3269_v56 = vpop.f32.mrf.mxu1 }
 0xb1f   :  { %v7526_v61 = vpop.f32.mrf.mxu1  ;;  %v3309_v62 = vpop.f32.mrf.mxu0 }
 0xb20   :  { %v3310_v1 = vadd.f32 %v3309_v62, %v3269_v56 }
 0xb21   :  { %v8028_v59 = vpop.eup %8027  ;;  %v3272_v41 = vpop.f32.mrf.mxu1 }
 0xb22   :  { %v7534_v46 = vpop.f32.mrf.mxu0  ;;  %v3315_v14 = vadd.f32 %v9145_v12, %v3310_v1  ;;  %3101 = vrot.lane.b32.xlu0 %v8028_v59, %s8282_s24 }
 0xb23   :  { %v7527_v17 = vpop.f32.mrf.mxu1  ;;  %v7901_v46 = vld [vmem:[%s10021_s4 + $0x18] sm:$0xff]  }
 0xb24   :  { %v3312_v18 = vpop.f32.mrf.mxu0  ;;  %8031 = vtanh.f32 %v3315_v14  ;;  %v6906_v23 = vmul.f32 -1.442695, %v3315_v14  ;;  %v7900_v14 = vld [vmem:[%s10021_s4] sm:$0xff]   ;;  %7561 = vmatpush3.bf16.msra.mxu0 %v7901_v46 }
 0xb25   :  { %v3396_v7 = vpop.f32.mrf.mxu1  ;;  %7562 = vmatprep.subr.bf16.mxu0 %v8280_v54  ;;  %v7903_v18 = vld [vmem:[%s10021_s4 + $0x10] sm:$0xff]  }
 0xb26   :  { %v7535_v15 = vpop.f32.mrf.mxu0 }
 0xb27   :  { %v7542_v16 = vpop.f32.mrf.mxu1 }
 0xb28   :  { %v3448_v19 = vpop.f32.mrf.mxu0  ;;  %7563 = vmatpush3.bf16.msra.mxu0 %v7903_v18 }
 0xb29   :  { %v3449_v21 = vadd.f32 %v3448_v19, %v3396_v7  ;;  %v8030_v22 = vpop.eup %8029  ;;  %v3399_v29 = vpop.f32.mrf.mxu1  ;;  %7576 = vmatprep.subr.bf16.mxu0 %v8280_v54 }
 0xb2a   :  { %v7550_v34 = vpop.f32.mrf.mxu0  ;;  %3213 = vrot.lane.b32.xlu1 %v8030_v22, %s8282_s24 }
 0xb2b   :  { %v3462_v63 = vadd.f32 %v9227_v20, %v3449_v21  ;;  %v7543_v37 = vpop.f32.mrf.mxu1 }
 0xb2c   :  { %v3451_v13 = vpop.f32.mrf.mxu0 }
 0xb2d   :  { %8033 = vtanh.f32 %v3462_v63  ;;  %v6922_v28 = vmul.f32 -1.442695, %v3462_v63 }
 0xb2e   :  { %v7551_v0 = vpop.f32.mrf.mxu0  ;;  %8035 = vpow2.f32 %v6900_v42 }
 0xb2f   :  { %8037 = vpow2.f32 %v6903_v4  ;;  %v7904_v4 = vld [vmem:[%s10020_s3 + $0x10] sm:$0xff]  }
 0xb30   :  { %8039 = vpow2.f32 %v6906_v23  ;;  %v7905_v23 = vld [vmem:[%s10021_s4 + $0x28] sm:$0xff]  }
 0xb31   :  { %v8032_v10 = vpop.eup %8031 }
 0xb32   :  { %3325 = vrot.lane.b32.xlu0 %v8032_v10, %s8282_s24 }
 0xb3a   :  { %v8034_v2 = vpop.eup %8033 }
 0xb3b   :  { %3472 = vrot.lane.b32.xlu1 %v8034_v2, %s8282_s24  ;;  %v8036_v5 = vpop.eup %8035  ;;  %v7902_v2 = vld [vmem:[%s10020_s3 + $0x18] sm:$0xff]  }
 0xb3c   :  { %v3092_v11 = vadd.f32 1.0, %v8036_v5  ;;  %v8038_v43 = vpop.eup %8037 }
 0xb3d   :  { %v3207_v45 = vadd.f32 1.0, %v8038_v43  ;;  %v8040_v24 = vpop.eup %8039  ;;  %v7908_v43 = vld [vmem:[%s10020_s3 + $0x20] sm:$0xff]  }
 0xb3e   :  { %8041 = vrcp.f32 %v3092_v11  ;;  %v3319_v48 = vadd.f32 1.0, %v8040_v24  ;;  %v7906_v11 = vld [vmem:[%s10020_s3 + $0x28] sm:$0xff]  }
 0xb3f   :  { %8043 = vpow2.f32 %v6922_v28  ;;  %v7907_v28 = vld [vmem:[%s10021_s4 + $0x20] sm:$0xff]  }
 0xb40   :  { %8045 = vrcp.f32 %v3207_v45  ;;  %v7909_v45 = vld [vmem:[%s10021_s4 + $0x38] sm:$0xff]  }
 0xb41   :  { %8047 = vrcp.f32 %v3319_v48  ;;  %v7910_v48 = vld [vmem:[%s10020_s3 + $0x38] sm:$0xff]  }
 0xb4b   :  { %v8042_v47 = vpop.eup %8041 }
 0xb4c   :  { %v8044_v49 = vpop.eup %8043  ;;  %v3099_v53 = vmul.f32 %v8042_v47, %v3097_v55 }
 0xb4d   :  { %v3466_v31 = vadd.f32 1.0, %v8044_v49  ;;  %v8046_v40 = vpop.eup %8045 }
 0xb4e   :  { %v8048_v50 = vpop.eup %8047  ;;  %v3211_v58 = vmul.f32 %v8046_v40, %v9159_v36 }
 0xb4f   :  { %8049 = vrcp.f32 %v3466_v31  ;;  %v3323_v60 = vmul.f32 %v8048_v50, %v9162_v38  ;;  %v7899_v38 = vld [vmem:[%s10021_s4 + $0x8] sm:$0xff]  }
 0xb50   :  { %7553 = vmatpush3.bf16.msra.mxu1 %v7899_v38 }
 0xb51   :  { %7554 = vmatprep.subr.bf16.mxu1 %v8280_v54 }
 0xb54   :  { %7555 = vmatpush3.bf16.msra.mxu1 %v7900_v14 }
 0xb55   :  { %7568 = vmatprep.subr.bf16.mxu1 %v8280_v54 }
 0xb5c   :  { %v8050_v52 = vpop.eup %8049 }
 0xb5d   :  { %v3470_v25 = vmul.f32 0.0, %v8050_v52 }
 0xb94   :  { %v3102_v26 = vpop.permute.xlu0 %3101 }
 0xb95   :  { %v3104_v35 = vmul.f32 %v8042_v47, %v3102_v26  ;;  %v7912_v26 = vld [vmem:[%s10020_s3 + $0x30] sm:$0xff]  }
 0xb97   :  { %3106 = vrot.lane.b32.xlu0 %v3104_v35, %s8282_s24 }
 0xb9c   :  { %v3214_v32 = vpop.permute.xlu1 %3213 }
 0xb9d   :  { %v3216_v30 = vmul.f32 %v8046_v40, %v3214_v32 }
 0xb9f   :  { %3218 = vrot.lane.b32.xlu1 %v3216_v30, %s8282_s24 }
 0xba4   :  { %v3326_v51 = vpop.permute.xlu0 %3325 }
 0xba5   :  { %v3328_v9 = vmul.f32 %v8048_v50, %v3326_v51 }
 0xba7   :  { %3330 = vrot.lane.b32.xlu0 %v3328_v9, %s8282_s24 }
 0xbad   :  { %v3473_v27 = vpop.permute.xlu1 %3472 }
 0xbae   :  { %v3475_v8 = vmul.f32 %v8050_v52, %v3473_v27 }
 0xbb0   :  { %3477 = vrot.lane.b32.xlu1 %v3475_v8, %s8282_s24 }
 0xc09   :  { %v3107_v33 = vpop.permute.xlu0 %3106 }
 0xc0a   :  { %v9238_v57 = vadd.f32 %v3107_v33, %v3099_v53 }
 0xc0c   :  { %8051 = vtanh.f32 %v9238_v57 }
 0xc11   :  { %v3219_v39 = vpop.permute.xlu1 %3218 }
 0xc12   :  { %v9242_v44 = vadd.f32 %v3219_v39, %v3211_v58 }
 0xc14   :  { %8053 = vtanh.f32 %v9242_v44 }
 0xc19   :  { %v8052_v56 = vpop.eup %8051  ;;  %v3331_v61 = vpop.permute.xlu0 %3330 }
 0xc1a   :  { %v9246_v62 = vadd.f32 %v3331_v61, %v3323_v60  ;;  %3112 = vrot.lane.b32.xlu0 %v8052_v56, %s8282_s24 }
 0xc1c   :  { %8055 = vtanh.f32 %v9246_v62 }
 0xc21   :  { %v8054_v1 = vpop.eup %8053 }
 0xc22   :  { %v3478_v59 = vpop.permute.xlu1 %3477  ;;  %3224 = vrot.lane.b32.xlu1 %v8054_v1, %s8282_s24 }
 0xc23   :  { %v9250_v41 = vadd.f32 %v3478_v59, %v3470_v25 }
 0xc25   :  { %8057 = vtanh.f32 %v9250_v41 }
 0xc29   :  { %v8056_v36 = vpop.eup %8055 }
 0xc2a   :  { %3336 = vrot.lane.b32.xlu0 %v8056_v36, %s8282_s24 }
 0xc32   :  { %v8058_v17 = vpop.eup %8057 }
 0xc33   :  { %3483 = vrot.lane.b32.xlu1 %v8058_v17, %s8282_s24 }
 0xc8c   :  { %v3113_v15 = vpop.permute.xlu0 %3112 }
 0xc8d   :  { %v3115_v7 = vmul.f32 %v8042_v47, %v3113_v15  ;;  %v7911_v47 = vld [vmem:[%s10021_s4 + $0x30] sm:$0xff]  }
 0xc8f   :  { %v3493_v19 = vpack.c.bf16 %v3115_v7, %v3115_v7 }
 0xc91   :  { %v3499_v16 = vrot.slane %v3493_v19, 3 }
 0xc93   :  { %3500 = vrot.lane.b32.xlu0 %v3499_v16, %s8283_s0 }
 0xc94   :  { %v3225_v21 = vpop.permute.xlu1 %3224 }
 0xc95   :  { %v3227_v22 = vmul.f32 %v8046_v40, %v3225_v21 }
 0xc97   :  { %v3589_v34 = vpack.c.bf16 %v3227_v22, %v3227_v22 }
 0xc99   :  { %3595 = vrot.lane.b32.xlu1 %v3589_v34, %s8283_s0 }
 0xc9c   :  { %v3337_v29 = vpop.permute.xlu0 %3336 }
 0xc9d   :  { %v3339_v63 = vmul.f32 %v8048_v50, %v3337_v29 }
 0xc9f   :  { %v3740_v13 = vpack.c.bf16 %v3339_v63, %v3339_v63 }
 0xca1   :  { %3746 = vrot.lane.b32.xlu0 %v3740_v13, %s8283_s0 }
 0xca5   :  { %v3484_v37 = vpop.permute.xlu1 %3483 }
 0xca6   :  { %v9275_v0 = vmul.f32 %v8050_v52, %v3484_v37 }
 0xca8   :  { %v3891_v10 = vpack.c.bf16 %v9275_v0, %v9275_v0 }
 0xcaa   :  { %3897 = vrot.lane.b32.xlu1 %v3891_v10, %s8283_s0 }
 0xd05   :  { %v3501_v42 = vpop.permute.xlu0 %3500 }
 0xd06   :  { %7557 = vmatmul.mubr.msk.bf16.vlgmr.msra.gmra.mxu1 %vm427_vm0, %v3501_v42 }
 0xd07   :  { %7569 = vmatpush3.bf16.msra.mxu1 %v7902_v2  ;;  %7572 = vmatprep.mubr.msk.bf16.mxu1 %vm8281_vm1, %v8280_v54 }
 0xd08   :  { %7570 = vmatprep.subr.bf16.mxu1 %v8280_v54 }
 0xd0b   :  { %7571 = vmatpush3.bf16.msra.mxu1 %v7904_v4  ;;  %v3596_v5 = vpop.permute.xlu1 %3595 }
 0xd0c   :  { %7565 = vmatmul.mubr.msk.bf16.vlgmr.msra.gmra.mxu0 %vm427_vm0, %v3596_v5  ;;  %7584 = vmatprep.subr.bf16.mxu1 %v8280_v54 }
 0xd0d   :  { %7577 = vmatpush3.bf16.msra.mxu0 %v7905_v23  ;;  %7580 = vmatprep.mubr.msk.bf16.mxu0 %vm8281_vm1, %v8280_v54 }
 0xd0e   :  { %7573 = vmatmul.mubr.msk.bf16.vlgmr.msra.gmra.mxu1 %vm427_vm0, %v3501_v42  ;;  %7578 = vmatprep.subr.bf16.mxu0 %v8280_v54 }
 0xd0f   :  { %7585 = vmatpush3.bf16.msra.mxu1 %v7906_v11  ;;  %7588 = vmatprep.mubr.msk.bf16.mxu1 %vm8281_vm1, %v8280_v54 }
 0xd10   :  { %7586 = vmatprep.subr.bf16.mxu1 %v8280_v54 }
 0xd11   :  { %7579 = vmatpush3.bf16.msra.mxu0 %v7907_v28 }
 0xd12   :  { %7592 = vmatprep.subr.bf16.mxu0 %v8280_v54 }
 0xd13   :  { %7587 = vmatpush3.bf16.msra.mxu1 %v7908_v43  ;;  %v3747_v24 = vpop.permute.xlu0 %3746 }
 0xd14   :  { %7581 = vmatmul.mubr.msk.bf16.vlgmr.msra.gmra.mxu0 %vm427_vm0, %v3747_v24  ;;  %7600 = vmatprep.subr.bf16.mxu1 %v8280_v54 }
 0xd15   :  { %7593 = vmatpush3.bf16.msra.mxu0 %v7909_v45  ;;  %7596 = vmatprep.mubr.msk.bf16.mxu0 %vm8281_vm1, %v8280_v54 }
 0xd16   :  { %7589 = vmatmul.mubr.msk.bf16.vlgmr.msra.gmra.mxu1 %vm427_vm0, %v3596_v5  ;;  %7594 = vmatprep.subr.bf16.mxu0 %v8280_v54 }
 0xd17   :  { %7601 = vmatpush3.bf16.msra.mxu1 %v7910_v48  ;;  %7604 = vmatprep.mubr.msk.bf16.mxu1 %vm8281_vm1, %v8280_v54 }
 0xd18   :  { %7602 = vmatprep.subr.bf16.mxu1 %v8280_v54 }
 0xd19   :  { %7595 = vmatpush3.bf16.msra.mxu0 %v7911_v47 }
 0xd1a   :  { %7608 = vmatprep.subr.bf16.mxu0 %v8280_v54 }
 0xd1b   :  { %7603 = vmatpush3.bf16.msra.mxu1 %v7912_v26 }
 0xd1c   :  { %v3898_v35 = vpop.permute.xlu1 %3897  ;;  %7616 = vmatprep.subr.bf16.mxu1 %v8280_v54 }
 0xd1d   :  { %7597 = vmatmul.mubr.msk.bf16.vlgmr.msra.gmra.mxu0 %vm427_vm0, %v3898_v35 }
 0xd1e   :  { %7612 = vmatprep.mubr.msk.bf16.mxu0 %vm8281_vm1, %v8280_v54  ;;  %7605 = vmatmul.mubr.msk.bf16.vlgmr.msra.gmra.mxu1 %vm427_vm0, %v3747_v24 }
 0xd1f   :  { %7620 = vmatprep.mubr.msk.bf16.mxu1 %vm8281_vm1, %v8280_v54 }
 0xdc6   :  { %v3551_v49 = vpop.f32.mrf.mxu1 }
 0xdc7   :  { %v3557_v31 = vadd.f32 %v3551_v49, %v9009_v3 }
 0xdc8   :  { %v7558_v40 = vpop.f32.mrf.mxu1 }
 0xdc9   :  { %8059 = vtanh.f32 %v3557_v31  ;;  %v6926_v13 = vmul.f32 -1.442695, %v3557_v31 }
 0xdca   :  { %v3554_v32 = vpop.f32.mrf.mxu1 }
 0xdcc   :  { %v7559_v30 = vpop.f32.mrf.mxu1  ;;  %v3646_v50 = vpop.f32.mrf.mxu0 }
 0xdce   :  { %v7566_v51 = vpop.f32.mrf.mxu0  ;;  %v3698_v9 = vpop.f32.mrf.mxu1 }
 0xdcf   :  { %v3699_v52 = vadd.f32 %v3698_v9, %v3646_v50  ;;  %v3566_v9 = vrot.slane %v9238_v57, 6 }
 0xdd0   :  { %v3649_v27 = vpop.f32.mrf.mxu0  ;;  %v7574_v8 = vpop.f32.mrf.mxu1 }
 0xdd1   :  { %v3711_v55 = vadd.f32 %v9067_v6, %v3699_v52 }
 0xdd2   :  { %v7567_v53 = vpop.f32.mrf.mxu0  ;;  %v3701_v33 = vpop.f32.mrf.mxu1 }
 0xdd3   :  { %8061 = vtanh.f32 %v3711_v55  ;;  %v6943_v37 = vmul.f32 -1.442695, %v3711_v55 }
 0xdd4   :  { %v7575_v58 = vpop.f32.mrf.mxu1  ;;  %v3797_v39 = vpop.f32.mrf.mxu0 }
 0xdd6   :  { %v8060_v60 = vpop.eup %8059  ;;  %v7582_v56 = vpop.f32.mrf.mxu0 }
 0xdd7   :  { %v3849_v61 = vpop.f32.mrf.mxu1  ;;  %3570 = vrot.lane.b32.xlu0 %v8060_v60, %s8282_s24 }
 0xdd8   :  { %v3850_v25 = vadd.f32 %v3849_v61, %v3797_v39  ;;  %v3800_v1 = vpop.f32.mrf.mxu0 }
 0xdd9   :  { %v7590_v59 = vpop.f32.mrf.mxu1  ;;  %v7913_v1 = vld [vmem:[%s10021_s4 + $0x8] sm:$0xff]  }
 0xdda   :  { %v3862_v36 = vadd.f32 %v9145_v12, %v3850_v25  ;;  %v7583_v38 = vpop.f32.mrf.mxu0  ;;  %7609 = vmatpush3.bf16.msra.mxu0 %v7913_v1 }
 0xddb   :  { %v3852_v46 = vpop.f32.mrf.mxu1  ;;  %7610 = vmatprep.subr.bf16.mxu0 %v8280_v54  ;;  %v7918_v38 = vld [vmem:[%s10021_s4 + $0x10] sm:$0xff]  }
 0xddc   :  { %8063 = vtanh.f32 %v3862_v36  ;;  %v6960_v2 = vmul.f32 -1.442695, %v3862_v36  ;;  %v7916_v36 = vld [vmem:[%s10021_s4 + $0x18] sm:$0xff]  }
 0xddd   :  { %v7591_v14 = vpop.f32.mrf.mxu1  ;;  %v3948_v6 = vpop.f32.mrf.mxu0  ;;  %7617 = vmatpush3.bf16.msra.mxu1 %v7916_v36 }
 0xdde   :  { %7618 = vmatprep.subr.bf16.mxu1 %v8280_v54 }
 0xddf   :  { %v7598_v17 = vpop.f32.mrf.mxu0  ;;  %v4000_v18 = vpop.f32.mrf.mxu1 }
 0xde0   :  { %v4001_v15 = vadd.f32 %v4000_v18, %v3948_v6  ;;  %v8062_v7 = vpop.eup %8061 }
 0xde1   :  { %v3951_v19 = vpop.f32.mrf.mxu0  ;;  %v7606_v16 = vpop.f32.mrf.mxu1  ;;  %3721 = vrot.lane.b32.xlu1 %v8062_v7, %s8282_s24  ;;  %7619 = vmatpush3.bf16.msra.mxu1 %v7918_v38 }
 0xde2   :  { %v4013_v21 = vadd.f32 %v9227_v20, %v4001_v15  ;;  %7632 = vmatprep.subr.bf16.mxu1 %v8280_v54 }
 0xde3   :  { %v7599_v22 = vpop.f32.mrf.mxu0  ;;  %v4003_v34 = vpop.f32.mrf.mxu1 }
 0xde4   :  { %8065 = vtanh.f32 %v4013_v21  ;;  %v6977_v4 = vmul.f32 -1.442695, %v4013_v21 }
 0xde5   :  { %v7607_v29 = vpop.f32.mrf.mxu1  ;;  %8067 = vpow2.f32 %v6926_v13  ;;  %v7919_v13 = vld [vmem:[%s10020_s3 + $0x28] sm:$0xff]  }
 0xde6   :  { %8069 = vpow2.f32 %v6943_v37  ;;  %v7915_v29 = vld [vmem:[%s10020_s3 + $0x18] sm:$0xff]   ;;  %v7920_v37 = vld [vmem:[%s10021_s4 + $0x28] sm:$0xff]  }
 0xde7   :  { %8071 = vpow2.f32 %v6960_v2  ;;  %v7921_v2 = vld [vmem:[%s10020_s3 + $0x20] sm:$0xff]  }
 0xde9   :  { %v8064_v12 = vpop.eup %8063 }
 0xdea   :  { %3872 = vrot.lane.b32.xlu0 %v8064_v12, %s8282_s24 }
 0xdf1   :  { %v8066_v63 = vpop.eup %8065 }
 0xdf2   :  { %4023 = vrot.lane.b32.xlu1 %v8066_v63, %s8282_s24  ;;  %v8068_v10 = vpop.eup %8067  ;;  %v7917_v63 = vld [vmem:[%s10020_s3 + $0x10] sm:$0xff]  }
 0xdf3   :  { %v3561_v42 = vadd.f32 1.0, %v8068_v10  ;;  %v8070_v23 = vpop.eup %8069 }
 0xdf4   :  { %v3715_v5 = vadd.f32 1.0, %v8070_v23  ;;  %v8072_v11 = vpop.eup %8071  ;;  %v7924_v23 = vld [vmem:[%s10021_s4 + $0x38] sm:$0xff]  }
 0xdf5   :  { %8073 = vrcp.f32 %v3561_v42  ;;  %v3866_v24 = vadd.f32 1.0, %v8072_v11  ;;  %v7922_v42 = vld [vmem:[%s10021_s4 + $0x20] sm:$0xff]  }
 0xdf6   :  { %8075 = vpow2.f32 %v6977_v4  ;;  %v7923_v4 = vld [vmem:[%s10020_s3 + $0x38] sm:$0xff]  }
 0xdf7   :  { %8077 = vrcp.f32 %v3715_v5  ;;  %v7925_v5 = vld [vmem:[%s10020_s3 + $0x30] sm:$0xff]  }
 0xdf8   :  { %8079 = vrcp.f32 %v3866_v24 }
 0xe02   :  { %v8074_v28 = vpop.eup %8073 }
 0xe03   :  { %v8076_v48 = vpop.eup %8075  ;;  %v3568_v52 = vmul.f32 %v8074_v28, %v3566_v9 }
 0xe04   :  { %v4017_v47 = vadd.f32 1.0, %v8076_v48  ;;  %v8078_v26 = vpop.eup %8077 }
 0xe05   :  { %v8080_v31 = vpop.eup %8079  ;;  %v3719_v55 = vmul.f32 %v8078_v26, %v9242_v44 }
 0xe06   :  { %8081 = vrcp.f32 %v4017_v47  ;;  %v3870_v39 = vmul.f32 %v8080_v31, %v9246_v62 }
 0xe13   :  { %v8082_v30 = vpop.eup %8081 }
 0xe14   :  { %v4021_v56 = vmul.f32 %v8082_v30, %v9250_v41  ;;  %v7914_v41 = vld [vmem:[%s10021_s4] sm:$0xff]  }
 0xe15   :  { %7611 = vmatpush3.bf16.msra.mxu0 %v7914_v41 }
 0xe16   :  { %7624 = vmatprep.subr.bf16.mxu0 %v8280_v54 }
 0xe49   :  { %v3571_v43 = vpop.permute.xlu0 %3570 }
 0xe4a   :  { %v3573_v45 = vmul.f32 %v8074_v28, %v3571_v43 }
 0xe4c   :  { %3575 = vrot.lane.b32.xlu0 %v3573_v45, %s8282_s24 }
 0xe53   :  { %v3722_v35 = vpop.permute.xlu1 %3721 }
 0xe54   :  { %v3724_v49 = vmul.f32 %v8078_v26, %v3722_v35 }
 0xe56   :  { %3726 = vrot.lane.b32.xlu1 %v3724_v49, %s8282_s24 }
 0xe5c   :  { %v3873_v40 = vpop.permute.xlu0 %3872 }
 0xe5d   :  { %v3875_v32 = vmul.f32 %v8080_v31, %v3873_v40  ;;  %v9462_v40 = vld [vmem:[%s10022_s5 + $0x1] ss:$0 sm:$0xff] }
 0xe5f   :  { %3877 = vrot.lane.b32.xlu0 %v3875_v32, %s8282_s24 }
 0xe64   :  { %v4024_v50 = vpop.permute.xlu1 %4023 }
 0xe65   :  { %v4026_v51 = vmul.f32 %v8082_v30, %v4024_v50 }
 0xe67   :  { %4028 = vrot.lane.b32.xlu1 %v4026_v51, %s8282_s24 }
 0xebe   :  { %v3576_v27 = vpop.permute.xlu0 %3575 }
 0xebf   :  { %v9354_v8 = vadd.f32 %v3576_v27, %v3568_v52 }
 0xec1   :  { %8083 = vtanh.f32 %v9354_v8 }
 0xec8   :  { %v3727_v53 = vpop.permute.xlu1 %3726 }
 0xec9   :  { %v9358_v33 = vadd.f32 %v3727_v53, %v3719_v55 }
 0xecb   :  { %8085 = vtanh.f32 %v9358_v33 }
 0xece   :  { %v8084_v58 = vpop.eup %8083 }
 0xecf   :  { %3581 = vrot.lane.b32.xlu0 %v8084_v58, %s8282_s24 }
 0xed1   :  { %v3878_v60 = vpop.permute.xlu0 %3877 }
 0xed2   :  { %v9363_v57 = vadd.f32 %v3878_v60, %v3870_v39 }
 0xed4   :  { %8087 = vtanh.f32 %v9363_v57 }
 0xed8   :  { %v8086_v61 = vpop.eup %8085 }
 0xed9   :  { %v4029_v25 = vpop.permute.xlu1 %4028  ;;  %3732 = vrot.lane.b32.xlu1 %v8086_v61, %s8282_s24 }
 0xeda   :  { %v9367_v44 = vadd.f32 %v4029_v25, %v4021_v56  ;;  %v9468_v56 = vld [vmem:[%s10022_s5 + $0x2] ss:$0 sm:$0xff] }
 0xedc   :  { %8089 = vtanh.f32 %v9367_v44 }
 0xee1   :  { %v8088_v62 = vpop.eup %8087 }
 0xee2   :  { %3883 = vrot.lane.b32.xlu0 %v8088_v62, %s8282_s24 }
 0xee9   :  { %v8090_v59 = vpop.eup %8089 }
 0xeea   :  { %4034 = vrot.lane.b32.xlu1 %v8090_v59, %s8282_s24 }
 0xf41   :  { %v3582_v46 = vpop.permute.xlu0 %3581 }
 0xf42   :  { %v3584_v14 = vmul.f32 %v8074_v28, %v3582_v46  ;;  %v7926_v28 = vld [vmem:[%s10021_s4 + $0x30] sm:$0xff]  }
 0xf44   :  { %v4043_v6 = vpack.c.bf16 %v3584_v14, %v3584_v14 }
 0xf46   :  { %4049 = vrot.lane.b32.xlu0 %v4043_v6, %s8283_s0 }
 0xf4b   :  { %v3733_v17 = vpop.permute.xlu1 %3732 }
 0xf4c   :  { %v3735_v18 = vmul.f32 %v8078_v26, %v3733_v17 }
 0xf4e   :  { %v4141_v15 = vpack.c.bf16 %v3735_v18, %v3735_v18 }
 0xf50   :  { %4147 = vrot.lane.b32.xlu1 %v4141_v15, %s8283_s0 }
 0xf54   :  { %v3884_v7 = vpop.permute.xlu0 %3883 }
 0xf55   :  { %v3886_v19 = vmul.f32 %v8080_v31, %v3884_v7 }
 0xf57   :  { %v4292_v16 = vpack.c.bf16 %v3886_v19, %v3886_v19 }
 0xf59   :  { %4298 = vrot.lane.b32.xlu0 %v4292_v16, %s8283_s0 }
 0xf5c   :  { %v4035_v21 = vpop.permute.xlu1 %4034 }
 0xf5d   :  { %v9392_v22 = vmul.f32 %v8082_v30, %v4035_v21 }
 0xf5f   :  { %v4443_v34 = vpack.c.bf16 %v9392_v22, %v9392_v22 }
 0xf61   :  { %4449 = vrot.lane.b32.xlu1 %v4443_v34, %s8283_s0 }
 0xfb8   :  { %v4050_v12 = vpop.permute.xlu0 %4049 }
 0xfb9   :  { %7613 = vmatmul.mubr.msk.bf16.vlgmr.msra.gmra.mxu0 %vm427_vm0, %v4050_v12 }
 0xfba   :  { %7625 = vmatpush3.bf16.msra.mxu0 %v7915_v29  ;;  %7628 = vmatprep.mubr.msk.bf16.mxu0 %vm8281_vm1, %v8280_v54 }
 0xfbb   :  { %7626 = vmatprep.subr.bf16.mxu0 %v8280_v54 }
 0xfbe   :  { %7627 = vmatpush3.bf16.msra.mxu0 %v7917_v63 }
 0xfbf   :  { %7640 = vmatprep.subr.bf16.mxu0 %v8280_v54 }
 0xfc1   :  { %7629 = vmatmul.mubr.msk.bf16.vlgmr.msra.gmra.mxu0 %vm427_vm0, %v4050_v12 }
 0xfc2   :  { %7641 = vmatpush3.bf16.msra.mxu0 %v7919_v13  ;;  %v4148_v10 = vpop.permute.xlu1 %4147  ;;  %7644 = vmatprep.mubr.msk.bf16.mxu0 %vm8281_vm1, %v8280_v54 }
 0xfc3   :  { %7621 = vmatmul.mubr.msk.bf16.vlgmr.msra.gmra.mxu1 %vm427_vm0, %v4148_v10  ;;  %7642 = vmatprep.subr.bf16.mxu0 %v8280_v54 }
 0xfc4   :  { %7633 = vmatpush3.bf16.msra.mxu1 %v7920_v37  ;;  %7636 = vmatprep.mubr.msk.bf16.mxu1 %vm8281_vm1, %v8280_v54 }
 0xfc5   :  { %7634 = vmatprep.subr.bf16.mxu1 %v8280_v54 }
 0xfc6   :  { %7643 = vmatpush3.bf16.msra.mxu0 %v7921_v2 }
 0xfc7   :  { %7656 = vmatprep.subr.bf16.mxu0 %v8280_v54 }
 0xfc8   :  { %7635 = vmatpush3.bf16.msra.mxu1 %v7922_v42 }
 0xfc9   :  { %7645 = vmatmul.mubr.msk.bf16.vlgmr.msra.gmra.mxu0 %vm427_vm0, %v4148_v10  ;;  %7648 = vmatprep.subr.bf16.mxu1 %v8280_v54 }
 0xfca   :  { %7657 = vmatpush3.bf16.msra.mxu0 %v7923_v4  ;;  %7660 = vmatprep.mubr.msk.bf16.mxu0 %vm8281_vm1, %v8280_v54 }
 0xfcb   :  { %v4299_v11 = vpop.permute.xlu0 %4298  ;;  %7658 = vmatprep.subr.bf16.mxu0 %v8280_v54 }
 0xfcc   :  { %7637 = vmatmul.mubr.msk.bf16.vlgmr.msra.gmra.mxu1 %vm427_vm0, %v4299_v11 }
 0xfcd   :  { %7649 = vmatpush3.bf16.msra.mxu1 %v7924_v23  ;;  %7652 = vmatprep.mubr.msk.bf16.mxu1 %vm8281_vm1, %v8280_v54 }
 0xfce   :  { %7659 = vmatpush3.bf16.msra.mxu0 %v7925_v5  ;;  %7650 = vmatprep.subr.bf16.mxu1 %v8280_v54 }
 0xfcf   :  { %7672 = vmatprep.subr.bf16.mxu0 %v8280_v54 }
 0xfd1   :  { %7651 = vmatpush3.bf16.msra.mxu1 %v7926_v28  ;;  %7661 = vmatmul.mubr.msk.bf16.vlgmr.msra.gmra.mxu0 %vm427_vm0, %v4299_v11 }
 0xfd2   :  { %7664 = vmatprep.subr.bf16.mxu1 %v8280_v54  ;;  %7676 = vmatprep.mubr.msk.bf16.mxu0 %vm8281_vm1, %v8280_v54 }
 0xfd3   :  { %v4450_v43 = vpop.permute.xlu1 %4449 }
 0xfd4   :  { %7653 = vmatmul.mubr.msk.bf16.vlgmr.msra.gmra.mxu1 %vm427_vm0, %v4450_v43 }
 0xfd5   :  { %7668 = vmatprep.mubr.msk.bf16.mxu1 %vm8281_vm1, %v8280_v54 }
0x1079   :  { %v4100_v45 = vpop.f32.mrf.mxu0 }
0x107a   :  { %v4107_v24 = vrot.slane %v4100_v45, 6 }
0x107b   :  { %v7614_v48 = vpop.f32.mrf.mxu0 }
0x107c   :  { %v4109_v47 = vadd.f32 %v4107_v24, %v9009_v3 }
0x107d   :  { %v4103_v26 = vpop.f32.mrf.mxu0 }
0x107e   :  { %8091 = vtanh.f32 %v4109_v47  ;;  %v6981_v12 = vmul.f32 -1.442695, %v4109_v47 }
0x107f   :  { %v7615_v35 = vpop.f32.mrf.mxu0 }
0x1081   :  { %v4250_v49 = vpop.f32.mrf.mxu0 }
0x1083   :  { %v4198_v31 = vpop.f32.mrf.mxu1  ;;  %v7630_v32 = vpop.f32.mrf.mxu0 }
0x1084   :  { %v4251_v30 = vadd.f32 %v4250_v49, %v4198_v31 }
0x1085   :  { %v7622_v50 = vpop.f32.mrf.mxu1  ;;  %v4253_v51 = vpop.f32.mrf.mxu0 }
0x1086   :  { %v4263_v9 = vadd.f32 %v9462_v40, %v4251_v30  ;;  %v4118_v50 = vrot.slane %v9354_v8, 6 }
0x1087   :  { %v4201_v52 = vpop.f32.mrf.mxu1  ;;  %v7631_v27 = vpop.f32.mrf.mxu0 }
0x1088   :  { %8093 = vtanh.f32 %v4263_v9  ;;  %v6998_v63 = vmul.f32 -1.442695, %v4263_v9 }
0x1089   :  { %v7623_v55 = vpop.f32.mrf.mxu1  ;;  %v4401_v53 = vpop.f32.mrf.mxu0 }
0x108b   :  { %v8092_v58 = vpop.eup %8091  ;;  %v7646_v39 = vpop.f32.mrf.mxu0 }
0x108c   :  { %v4349_v60 = vpop.f32.mrf.mxu1  ;;  %4122 = vrot.lane.b32.xlu0 %v8092_v58, %s8282_s24 }
0x108d   :  { %v4402_v61 = vadd.f32 %v4401_v53, %v4349_v60  ;;  %v4404_v25 = vpop.f32.mrf.mxu0 }
0x108e   :  { %v7638_v1 = vpop.f32.mrf.mxu1 }
0x108f   :  { %v4414_v62 = vadd.f32 %v9468_v56, %v4402_v61  ;;  %v7647_v41 = vpop.f32.mrf.mxu0 }
0x1090   :  { %v4352_v59 = vpop.f32.mrf.mxu1  ;;  %v7928_v41 = vld [vmem:[%s10021_s4] sm:$0xff]  }
0x1091   :  { %8095 = vtanh.f32 %v4414_v62  ;;  %v4552_v36 = vpop.f32.mrf.mxu0  ;;  %v7015_v37 = vmul.f32 -1.442695, %v4414_v62  ;;  %v7929_v59 = vld [vmem:[%s10021_s4 + $0x18] sm:$0xff]  }
0x1092   :  { %v7639_v38 = vpop.f32.mrf.mxu1  ;;  %7673 = vmatpush3.bf16.msra.mxu0 %v7929_v59 }
0x1093   :  { %v7662_v46 = vpop.f32.mrf.mxu0  ;;  %7674 = vmatprep.subr.bf16.mxu0 %v8280_v54 }
0x1094   :  { %v4500_v14 = vpop.f32.mrf.mxu1 }
0x1095   :  { %v8094_v6 = vpop.eup %8093  ;;  %v4553_v17 = vadd.f32 %v4552_v36, %v4500_v14  ;;  %v4555_v18 = vpop.f32.mrf.mxu0  ;;  %v7931_v36 = vld [vmem:[%s10021_s4 + $0x10] sm:$0xff]  }
0x1096   :  { %v7654_v15 = vpop.f32.mrf.mxu1  ;;  %4273 = vrot.lane.b32.xlu1 %v8094_v6, %s8282_s24  ;;  %7675 = vmatpush3.bf16.msra.mxu0 %v7931_v36 }
0x1097   :  { %v4565_v7 = vadd.f32 %v9227_v20, %v4553_v17  ;;  %v7663_v19 = vpop.f32.mrf.mxu0  ;;  %7688 = vmatprep.subr.bf16.mxu0 %v8280_v54 }
0x1098   :  { %v4503_v16 = vpop.f32.mrf.mxu1 }
0x1099   :  { %8097 = vtanh.f32 %v4565_v7  ;;  %v7032_v2 = vmul.f32 -1.442695, %v4565_v7 }
0x109a   :  { %v7655_v21 = vpop.f32.mrf.mxu1  ;;  %8099 = vpow2.f32 %v6981_v12  ;;  %v7930_v12 = vld [vmem:[%s10020_s3 + $0x18] sm:$0xff]  }
0x109b   :  { %8101 = vpow2.f32 %v6998_v63 }
0x109c   :  { %8103 = vpow2.f32 %v7015_v37  ;;  %v7933_v37 = vld [vmem:[%s10021_s4 + $0x28] sm:$0xff]  }
0x109e   :  { %v8096_v34 = vpop.eup %8095 }
0x109f   :  { %4424 = vrot.lane.b32.xlu0 %v8096_v34, %s8282_s24 }
0x10a6   :  { %v8098_v29 = vpop.eup %8097 }
0x10a7   :  { %4575 = vrot.lane.b32.xlu1 %v8098_v29, %s8282_s24  ;;  %v8100_v13 = vpop.eup %8099 }
0x10a8   :  { %v4113_v10 = vadd.f32 1.0, %v8100_v13  ;;  %v8102_v20 = vpop.eup %8101  ;;  %v7932_v13 = vld [vmem:[%s10020_s3 + $0x10] sm:$0xff]  }
0x10a9   :  { %v4267_v42 = vadd.f32 1.0, %v8102_v20  ;;  %v8104_v4 = vpop.eup %8103 }
0x10aa   :  { %8105 = vrcp.f32 %v4113_v10  ;;  %v4418_v28 = vadd.f32 1.0, %v8104_v4  ;;  %v7934_v10 = vld [vmem:[%s10020_s3 + $0x28] sm:$0xff]   ;;  %v7938_v4 = vld [vmem:[%s10020_s3 + $0x38] sm:$0xff]  }
0x10ab   :  { %8107 = vpow2.f32 %v7032_v2  ;;  %v7935_v2 = vld [vmem:[%s10021_s4 + $0x20] sm:$0xff]  }
0x10ac   :  { %8109 = vrcp.f32 %v4267_v42  ;;  %v7936_v42 = vld [vmem:[%s10020_s3 + $0x20] sm:$0xff]  }
0x10ad   :  { %8111 = vrcp.f32 %v4418_v28  ;;  %v7939_v28 = vld [vmem:[%s10021_s4 + $0x30] sm:$0xff]  }
0x10b7   :  { %v8106_v23 = vpop.eup %8105 }
0x10b8   :  { %v8108_v43 = vpop.eup %8107  ;;  %v4120_v51 = vmul.f32 %v8106_v23, %v4118_v50 }
0x10b9   :  { %v8110_v45 = vpop.eup %8109  ;;  %v4569_v24 = vadd.f32 1.0, %v8108_v43 }
0x10ba   :  { %v8112_v26 = vpop.eup %8111  ;;  %v4271_v27 = vmul.f32 %v8110_v45, %v9358_v33 }
0x10bb   :  { %8113 = vrcp.f32 %v4569_v24  ;;  %v4422_v39 = vmul.f32 %v8112_v26, %v9363_v57  ;;  %v7927_v57 = vld [vmem:[%s10021_s4 + $0x8] sm:$0xff]  }
0x10bc   :  { %7665 = vmatpush3.bf16.msra.mxu1 %v7927_v57 }
0x10bd   :  { %7666 = vmatprep.subr.bf16.mxu1 %v8280_v54 }
0x10c0   :  { %7667 = vmatpush3.bf16.msra.mxu1 %v7928_v41 }
0x10c1   :  { %7680 = vmatprep.subr.bf16.mxu1 %v8280_v54 }
0x10c8   :  { %v8114_v31 = vpop.eup %8113 }
0x10c9   :  { %v4573_v25 = vmul.f32 %v8114_v31, %v9367_v44 }
0x10fe   :  { %v4123_v5 = vpop.permute.xlu0 %4122 }
0x10ff   :  { %v4125_v11 = vmul.f32 %v8106_v23, %v4123_v5 }
0x1101   :  { %4127 = vrot.lane.b32.xlu0 %v4125_v11, %s8282_s24  ;;  %v7940_v11 = vld [vmem:[%s10020_s3 + $0x30] sm:$0xff]  }
0x1108   :  { %v4274_v48 = vpop.permute.xlu1 %4273 }
0x1109   :  { %v4276_v47 = vmul.f32 %v8110_v45, %v4274_v48 }
0x110b   :  { %4278 = vrot.lane.b32.xlu1 %v4276_v47, %s8282_s24 }
0x1111   :  { %v4425_v35 = vpop.permute.xlu0 %4424 }
0x1112   :  { %v4427_v49 = vmul.f32 %v8112_v26, %v4425_v35 }
0x1114   :  { %4429 = vrot.lane.b32.xlu0 %v4427_v49, %s8282_s24 }
0x1119   :  { %v4576_v32 = vpop.permute.xlu1 %4575 }
0x111a   :  { %v4578_v30 = vmul.f32 %v8114_v31, %v4576_v32 }
0x111c   :  { %4580 = vrot.lane.b32.xlu1 %v4578_v30, %s8282_s24 }
0x1173   :  { %v4128_v9 = vpop.permute.xlu0 %4127 }
0x1174   :  { %v9481_v52 = vadd.f32 %v4128_v9, %v4120_v51 }
0x1176   :  { %8115 = vtanh.f32 %v9481_v52 }
0x117d   :  { %v4279_v55 = vpop.permute.xlu1 %4278 }
0x117e   :  { %v9485_v53 = vadd.f32 %v4279_v55, %v4271_v27 }
0x1180   :  { %8117 = vtanh.f32 %v9485_v53 }
0x1183   :  { %v8116_v58 = vpop.eup %8115 }
0x1184   :  { %4133 = vrot.lane.b32.xlu0 %v8116_v58, %s8282_s24 }
0x1186   :  { %v4430_v60 = vpop.permute.xlu0 %4429 }
0x1187   :  { %v9490_v8 = vadd.f32 %v4430_v60, %v4422_v39 }
0x1189   :  { %8119 = vtanh.f32 %v9490_v8 }
0x118d   :  { %v8118_v61 = vpop.eup %8117 }
0x118e   :  { %v4581_v1 = vpop.permute.xlu1 %4580  ;;  %4284 = vrot.lane.b32.xlu1 %v8118_v61, %s8282_s24 }
0x118f   :  { %v9495_v33 = vadd.f32 %v4581_v1, %v4573_v25 }
0x1191   :  { %8121 = vtanh.f32 %v9495_v33 }
0x1196   :  { %v8120_v62 = vpop.eup %8119 }
0x1197   :  { %4435 = vrot.lane.b32.xlu0 %v8120_v62, %s8282_s24 }
0x119e   :  { %v8122_v44 = vpop.eup %8121 }
0x119f   :  { %4586 = vrot.lane.b32.xlu1 %v8122_v44, %s8282_s24 }
0x11f6   :  { %v4134_v38 = vpop.permute.xlu0 %4133 }
0x11f7   :  { %v4136_v46 = vmul.f32 %v8106_v23, %v4134_v38  ;;  %v7937_v23 = vld [vmem:[%s10021_s4 + $0x38] sm:$0xff]  }
0x11f9   :  { %v4595_v14 = vpack.c.bf16 %v4136_v46, %v4136_v46 }
0x11fb   :  { %v4601_v6 = vrot.slane %v4595_v14, 1  ;;  %v9592_v14 = vld [vmem:[%s10022_s5 + $0x3] ss:$0 sm:$0xff] }
0x11fd   :  { %4602 = vrot.lane.b32.xlu0 %v4601_v6, %s8283_s0 }
0x1200   :  { %v4285_v17 = vpop.permute.xlu1 %4284 }
0x1201   :  { %v4287_v18 = vmul.f32 %v8110_v45, %v4285_v17 }
0x1203   :  { %v4694_v15 = vpack.c.bf16 %v4287_v18, %v4287_v18 }
0x1205   :  { %4700 = vrot.lane.b32.xlu1 %v4694_v15, %s8283_s0 }
0x1209   :  { %v4436_v7 = vpop.permute.xlu0 %4435 }
0x120a   :  { %v4438_v19 = vmul.f32 %v8112_v26, %v4436_v7 }
0x120c   :  { %v4845_v16 = vpack.c.bf16 %v4438_v19, %v4438_v19 }
0x120e   :  { %4851 = vrot.lane.b32.xlu0 %v4845_v16, %s8283_s0 }
0x1211   :  { %v4587_v21 = vpop.permute.xlu1 %4586 }
0x1212   :  { %v9519_v34 = vmul.f32 %v8114_v31, %v4587_v21 }
0x1214   :  { %v4996_v29 = vpack.c.bf16 %v9519_v34, %v9519_v34 }
0x1216   :  { %5002 = vrot.lane.b32.xlu1 %v4996_v29, %s8283_s0 }
0x126f   :  { %v4603_v63 = vpop.permute.xlu0 %4602 }
0x1270   :  { %7669 = vmatmul.mubr.msk.bf16.vlgmr.msra.gmra.mxu1 %vm427_vm0, %v4603_v63 }
0x1271   :  { %7681 = vmatpush3.bf16.msra.mxu1 %v7930_v12  ;;  %7684 = vmatprep.mubr.msk.bf16.mxu1 %vm8281_vm1, %v8280_v54 }
0x1272   :  { %7682 = vmatprep.subr.bf16.mxu1 %v8280_v54 }
0x1275   :  { %7683 = vmatpush3.bf16.msra.mxu1 %v7932_v13 }
0x1276   :  { %7696 = vmatprep.subr.bf16.mxu1 %v8280_v54 }
0x1277   :  { %v4701_v20 = vpop.permute.xlu1 %4700 }
0x1278   :  { %7677 = vmatmul.mubr.msk.bf16.vlgmr.msra.gmra.mxu0 %vm427_vm0, %v4701_v20  ;;  %7685 = vmatmul.mubr.msk.bf16.vlgmr.msra.gmra.mxu1 %vm427_vm0, %v4603_v63 }
0x1279   :  { %7689 = vmatpush3.bf16.msra.mxu0 %v7933_v37  ;;  %7697 = vmatpush3.bf16.msra.mxu1 %v7934_v10 }
0x127a   :  { %7690 = vmatprep.subr.bf16.mxu0 %v8280_v54  ;;  %7698 = vmatprep.subr.bf16.mxu1 %v8280_v54 }
0x127b   :  { %7700 = vmatprep.mubr.msk.bf16.mxu1 %vm8281_vm1, %v8280_v54  ;;  %7692 = vmatprep.mubr.msk.bf16.mxu0 %vm8281_vm1, %v8280_v54 }
0x127d   :  { %7691 = vmatpush3.bf16.msra.mxu0 %v7935_v2  ;;  %7699 = vmatpush3.bf16.msra.mxu1 %v7936_v42 }
0x127e   :  { %7704 = vmatprep.subr.bf16.mxu0 %v8280_v54  ;;  %7712 = vmatprep.subr.bf16.mxu1 %v8280_v54 }
0x1280   :  { %v4852_v5 = vpop.permute.xlu0 %4851  ;;  %7701 = vmatmul.mubr.msk.bf16.vlgmr.msra.gmra.mxu1 %vm427_vm0, %v4701_v20 }
0x1281   :  { %7693 = vmatmul.mubr.msk.bf16.vlgmr.msra.gmra.mxu0 %vm427_vm0, %v4852_v5  ;;  %7713 = vmatpush3.bf16.msra.mxu1 %v7938_v4 }
0x1282   :  { %7705 = vmatpush3.bf16.msra.mxu0 %v7937_v23  ;;  %7714 = vmatprep.subr.bf16.mxu1 %v8280_v54 }
0x1283   :  { %7706 = vmatprep.subr.bf16.mxu0 %v8280_v54  ;;  %7708 = vmatprep.mubr.msk.bf16.mxu0 %vm8281_vm1, %v8280_v54 }
0x1284   :  { %7716 = vmatprep.mubr.msk.bf16.mxu1 %vm8281_vm1, %v8280_v54 }
0x1285   :  { %7715 = vmatpush3.bf16.msra.mxu1 %v7940_v11 }
0x1286   :  { %7707 = vmatpush3.bf16.msra.mxu0 %v7939_v28  ;;  %7728 = vmatprep.subr.bf16.mxu1 %v8280_v54 }
0x1287   :  { %7720 = vmatprep.subr.bf16.mxu0 %v8280_v54 }
0x1288   :  { %v5003_v43 = vpop.permute.xlu1 %5002  ;;  %7717 = vmatmul.mubr.msk.bf16.vlgmr.msra.gmra.mxu1 %vm427_vm0, %v4852_v5 }
0x1289   :  { %7709 = vmatmul.mubr.msk.bf16.vlgmr.msra.gmra.mxu0 %vm427_vm0, %v5003_v43  ;;  %7732 = vmatprep.mubr.msk.bf16.mxu1 %vm8281_vm1, %v8280_v54 }
0x128a   :  { %7724 = vmatprep.mubr.msk.bf16.mxu0 %vm8281_vm1, %v8280_v54 }
0x1330   :  { %v4653_v45 = vpop.f32.mrf.mxu1 }
0x1331   :  { %v4660_v24 = vrot.slane %v4653_v45, 4 }
0x1332   :  { %v7670_v48 = vpop.f32.mrf.mxu1 }
0x1333   :  { %v4662_v47 = vadd.f32 %v4660_v24, %v9009_v3 }
0x1334   :  { %v4656_v26 = vpop.f32.mrf.mxu1 }
0x1335   :  { %8123 = vtanh.f32 %v4662_v47  ;;  %v7036_v13 = vmul.f32 -1.442695, %v4662_v47 }
0x1336   :  { %v7671_v35 = vpop.f32.mrf.mxu1 }
0x1338   :  { %v4751_v49 = vpop.f32.mrf.mxu0  ;;  %v4803_v31 = vpop.f32.mrf.mxu1 }
0x1339   :  { %v4804_v32 = vadd.f32 %v4803_v31, %v4751_v49 }
0x133a   :  { %v7678_v30 = vpop.f32.mrf.mxu0  ;;  %v7686_v50 = vpop.f32.mrf.mxu1 }
0x133b   :  { %v4816_v51 = vadd.f32 %v9462_v40, %v4804_v32 }
0x133c   :  { %v4754_v9 = vpop.f32.mrf.mxu0  ;;  %v4806_v27 = vpop.f32.mrf.mxu1 }
0x133d   :  { %8125 = vtanh.f32 %v4816_v51  ;;  %v7053_v37 = vmul.f32 -1.442695, %v4816_v51  ;;  %v4671_v9 = vrot.slane %v9481_v52, 6 }
0x133e   :  { %v7679_v55 = vpop.f32.mrf.mxu0  ;;  %v7687_v58 = vpop.f32.mrf.mxu1 }
0x1340   :  { %v4954_v39 = vpop.f32.mrf.mxu1 }
0x1341   :  { %v4902_v60 = vpop.f32.mrf.mxu0 }
0x1342   :  { %v8124_v61 = vpop.eup %8123  ;;  %v4955_v25 = vadd.f32 %v4954_v39, %v4902_v60  ;;  %v7702_v1 = vpop.f32.mrf.mxu1 }
0x1343   :  { %v7694_v62 = vpop.f32.mrf.mxu0  ;;  %4675 = vrot.lane.b32.xlu0 %v8124_v61, %s8282_s24 }
0x1344   :  { %v4967_v57 = vadd.f32 %v9468_v56, %v4955_v25  ;;  %v4957_v41 = vpop.f32.mrf.mxu1 }
0x1345   :  { %v4905_v44 = vpop.f32.mrf.mxu0 }
0x1346   :  { %8127 = vtanh.f32 %v4967_v57  ;;  %v7703_v59 = vpop.f32.mrf.mxu1  ;;  %v7070_v20 = vmul.f32 -1.442695, %v4967_v57 }
0x1347   :  { %v7695_v36 = vpop.f32.mrf.mxu0 }
0x1348   :  { %v5105_v38 = vpop.f32.mrf.mxu1  ;;  %v7943_v36 = vld [vmem:[%s10021_s4 + $0x18] sm:$0xff]  }
0x1349   :  { %v5053_v46 = vpop.f32.mrf.mxu0  ;;  %7729 = vmatpush3.bf16.msra.mxu1 %v7943_v36 }
0x134a   :  { %v8126_v6 = vpop.eup %8125  ;;  %v5106_v17 = vadd.f32 %v5105_v38, %v5053_v46  ;;  %v7718_v18 = vpop.f32.mrf.mxu1  ;;  %7730 = vmatprep.subr.bf16.mxu1 %v8280_v54  ;;  %v7945_v46 = vld [vmem:[%s10021_s4 + $0x10] sm:$0xff]  }
0x134b   :  { %v7710_v15 = vpop.f32.mrf.mxu0  ;;  %4826 = vrot.lane.b32.xlu1 %v8126_v6, %s8282_s24 }
0x134c   :  { %v5118_v7 = vadd.f32 %v9592_v14, %v5106_v17  ;;  %v5108_v19 = vpop.f32.mrf.mxu1 }
0x134d   :  { %v5056_v16 = vpop.f32.mrf.mxu0  ;;  %7731 = vmatpush3.bf16.msra.mxu1 %v7945_v46 }
0x134e   :  { %8129 = vtanh.f32 %v5118_v7  ;;  %v7719_v21 = vpop.f32.mrf.mxu1  ;;  %v7087_v4 = vmul.f32 -1.442695, %v5118_v7  ;;  %7744 = vmatprep.subr.bf16.mxu1 %v8280_v54 }
0x134f   :  { %v7711_v29 = vpop.f32.mrf.mxu0  ;;  %8131 = vpow2.f32 %v7036_v13 }
0x1350   :  { %8133 = vpow2.f32 %v7053_v37 }
0x1351   :  { %8135 = vpow2.f32 %v7070_v20 }
0x1353   :  { %v8128_v12 = vpop.eup %8127 }
0x1354   :  { %4977 = vrot.lane.b32.xlu0 %v8128_v12, %s8282_s24 }
0x135b   :  { %v8130_v63 = vpop.eup %8129 }
0x135c   :  { %5128 = vrot.lane.b32.xlu1 %v8130_v63, %s8282_s24  ;;  %v8132_v10 = vpop.eup %8131 }
0x135d   :  { %v4666_v2 = vadd.f32 1.0, %v8132_v10  ;;  %v8134_v42 = vpop.eup %8133  ;;  %v7944_v10 = vld [vmem:[%s10020_s3 + $0x18] sm:$0xff]  }
0x135e   :  { %v4820_v23 = vadd.f32 1.0, %v8134_v42  ;;  %v8136_v5 = vpop.eup %8135  ;;  %v7947_v42 = vld [vmem:[%s10021_s4 + $0x28] sm:$0xff]  }
0x135f   :  { %8137 = vrcp.f32 %v4666_v2  ;;  %v4971_v28 = vadd.f32 1.0, %v8136_v5  ;;  %v7946_v2 = vld [vmem:[%s10020_s3 + $0x10] sm:$0xff]   ;;  %v7949_v5 = vld [vmem:[%s10021_s4 + $0x20] sm:$0xff]  }
0x1360   :  { %8139 = vpow2.f32 %v7087_v4 }
0x1361   :  { %8141 = vrcp.f32 %v4820_v23  ;;  %v7948_v23 = vld [vmem:[%s10020_s3 + $0x28] sm:$0xff]  }
0x1362   :  { %8143 = vrcp.f32 %v4971_v28  ;;  %v7951_v28 = vld [vmem:[%s10021_s4 + $0x38] sm:$0xff]  }
0x136c   :  { %v8138_v11 = vpop.eup %8137 }
0x136d   :  { %v8140_v24 = vpop.eup %8139  ;;  %v4673_v27 = vmul.f32 %v8138_v11, %v4671_v9 }
0x136e   :  { %v8142_v48 = vpop.eup %8141  ;;  %v5122_v47 = vadd.f32 1.0, %v8140_v24  ;;  %v7953_v24 = vld [vmem:[%s10021_s4 + $0x30] sm:$0xff]  }
0x136f   :  { %v8144_v49 = vpop.eup %8143  ;;  %v4824_v39 = vmul.f32 %v8142_v48, %v9485_v53 }
0x1370   :  { %8145 = vrcp.f32 %v5122_v47  ;;  %v4975_v1 = vmul.f32 %v8144_v49, %v9490_v8  ;;  %v7941_v8 = vld [vmem:[%s10021_s4 + $0x8] sm:$0xff]  }
0x1371   :  { %7721 = vmatpush3.bf16.msra.mxu0 %v7941_v8 }
0x1372   :  { %7722 = vmatprep.subr.bf16.mxu0 %v8280_v54 }
0x137d   :  { %v8146_v30 = vpop.eup %8145 }
0x137e   :  { %v5126_v41 = vmul.f32 %v8146_v30, %v9495_v33  ;;  %v7942_v33 = vld [vmem:[%s10021_s4] sm:$0xff]  }
0x137f   :  { %7723 = vmatpush3.bf16.msra.mxu0 %v7942_v33 }
0x1380   :  { %7736 = vmatprep.subr.bf16.mxu0 %v8280_v54 }
0x13b5   :  { %v4676_v43 = vpop.permute.xlu0 %4675 }
0x13b6   :  { %v4678_v45 = vmul.f32 %v8138_v11, %v4676_v43  ;;  %v7952_v43 = vld [vmem:[%s10020_s3 + $0x38] sm:$0xff]  }
0x13b8   :  { %4680 = vrot.lane.b32.xlu0 %v4678_v45, %s8282_s24 }
0x13bd   :  { %v4827_v26 = vpop.permute.xlu1 %4826 }
0x13be   :  { %v4829_v35 = vmul.f32 %v8142_v48, %v4827_v26 }
0x13c0   :  { %4831 = vrot.lane.b32.xlu1 %v4829_v35, %s8282_s24 }
0x13c6   :  { %v4978_v31 = vpop.permute.xlu0 %4977 }
0x13c7   :  { %v4980_v32 = vmul.f32 %v8144_v49, %v4978_v31 }
0x13c9   :  { %4982 = vrot.lane.b32.xlu0 %v4980_v32, %s8282_s24 }
0x13ce   :  { %v5129_v50 = vpop.permute.xlu1 %5128 }
0x13cf   :  { %v5131_v51 = vmul.f32 %v8146_v30, %v5129_v50 }
0x13d1   :  { %5133 = vrot.lane.b32.xlu1 %v5131_v51, %s8282_s24 }
0x142a   :  { %v4681_v55 = vpop.permute.xlu0 %4680 }
0x142b   :  { %v9603_v58 = vadd.f32 %v4681_v55, %v4673_v27 }
0x142d   :  { %8147 = vtanh.f32 %v9603_v58 }
0x1432   :  { %v4832_v60 = vpop.permute.xlu1 %4831 }
0x1433   :  { %v9607_v61 = vadd.f32 %v4832_v60, %v4824_v39 }
0x1435   :  { %8149 = vtanh.f32 %v9607_v61 }
0x143a   :  { %v8148_v25 = vpop.eup %8147 }
0x143b   :  { %v4983_v62 = vpop.permute.xlu0 %4982  ;;  %4686 = vrot.lane.b32.xlu0 %v8148_v25, %s8282_s24 }
0x143c   :  { %v9612_v52 = vadd.f32 %v4983_v62, %v4975_v1 }
0x143e   :  { %8151 = vtanh.f32 %v9612_v52 }
0x1442   :  { %v8150_v57 = vpop.eup %8149 }
0x1443   :  { %v5134_v44 = vpop.permute.xlu1 %5133  ;;  %4837 = vrot.lane.b32.xlu1 %v8150_v57, %s8282_s24 }
0x1444   :  { %v9617_v53 = vadd.f32 %v5134_v44, %v5126_v41 }
0x1446   :  { %8153 = vtanh.f32 %v9617_v53 }
0x144b   :  { %v8152_v59 = vpop.eup %8151 }
0x144c   :  { %4988 = vrot.lane.b32.xlu0 %v8152_v59, %s8282_s24 }
0x1453   :  { %v8154_v38 = vpop.eup %8153 }
0x1454   :  { %5139 = vrot.lane.b32.xlu1 %v8154_v38, %s8282_s24 }
0x14ad   :  { %v4687_v6 = vpop.permute.xlu0 %4686 }
0x14ae   :  { %v4689_v17 = vmul.f32 %v8138_v11, %v4687_v6  ;;  %v7950_v11 = vld [vmem:[%s10020_s3 + $0x20] sm:$0xff]  }
0x14b0   :  { %v5148_v18 = vpack.c.bf16 %v4689_v17, %v4689_v17 }
0x14b2   :  { %v5154_v15 = vrot.slane %v5148_v18, 2 }
0x14b4   :  { %5155 = vrot.lane.b32.xlu0 %v5154_v15, %s8283_s0 }
0x14b5   :  { %v4838_v7 = vpop.permute.xlu1 %4837 }
0x14b6   :  { %v4840_v19 = vmul.f32 %v8142_v48, %v4838_v7  ;;  %v7954_v48 = vld [vmem:[%s10020_s3 + $0x30] sm:$0xff]  }
0x14b8   :  { %v5258_v16 = vpack.c.bf16 %v4840_v19, %v4840_v19 }
0x14ba   :  { %5264 = vrot.lane.b32.xlu1 %v5258_v16, %s8283_s0 }
0x14be   :  { %v4989_v21 = vpop.permute.xlu0 %4988 }
0x14bf   :  { %v4991_v29 = vmul.f32 %v8144_v49, %v4989_v21 }
0x14c1   :  { %v5409_v12 = vpack.c.bf16 %v4991_v29, %v4991_v29 }
0x14c3   :  { %5415 = vrot.lane.b32.xlu0 %v5409_v12, %s8283_s0 }
0x14c6   :  { %v5140_v63 = vpop.permute.xlu1 %5139 }
0x14c7   :  { %v9641_v13 = vmul.f32 %v8146_v30, %v5140_v63 }
0x14c9   :  { %v5560_v37 = vpack.c.bf16 %v9641_v13, %v9641_v13 }
0x14cb   :  { %5566 = vrot.lane.b32.xlu1 %v5560_v37, %s8283_s0 }
0x1526   :  { %v5156_v20 = vpop.permute.xlu0 %5155 }
0x1527   :  { %7725 = vmatmul.mubr.msk.bf16.vlgmr.msra.gmra.mxu0 %vm427_vm0, %v5156_v20 }
0x1528   :  { %7737 = vmatpush3.bf16.msra.mxu0 %v7944_v10  ;;  %7740 = vmatprep.mubr.msk.bf16.mxu0 %vm8281_vm1, %v8280_v54 }
0x1529   :  { %7738 = vmatprep.subr.bf16.mxu0 %v8280_v54 }
0x152c   :  { %7739 = vmatpush3.bf16.msra.mxu0 %v7946_v2  ;;  %v5265_v4 = vpop.permute.xlu1 %5264 }
0x152d   :  { %7733 = vmatmul.mubr.msk.bf16.vlgmr.msra.gmra.mxu1 %vm427_vm0, %v5265_v4  ;;  %7752 = vmatprep.subr.bf16.mxu0 %v8280_v54 }
0x152e   :  { %7745 = vmatpush3.bf16.msra.mxu1 %v7947_v42  ;;  %7748 = vmatprep.mubr.msk.bf16.mxu1 %vm8281_vm1, %v8280_v54 }
0x152f   :  { %7741 = vmatmul.mubr.msk.bf16.vlgmr.msra.gmra.mxu0 %vm427_vm0, %v5156_v20  ;;  %7746 = vmatprep.subr.bf16.mxu1 %v8280_v54 }
0x1530   :  { %7753 = vmatpush3.bf16.msra.mxu0 %v7948_v23  ;;  %7756 = vmatprep.mubr.msk.bf16.mxu0 %vm8281_vm1, %v8280_v54 }
0x1531   :  { %7754 = vmatprep.subr.bf16.mxu0 %v8280_v54 }
0x1532   :  { %7747 = vmatpush3.bf16.msra.mxu1 %v7949_v5 }
0x1533   :  { %7760 = vmatprep.subr.bf16.mxu1 %v8280_v54 }
0x1534   :  { %7755 = vmatpush3.bf16.msra.mxu0 %v7950_v11 }
0x1535   :  { %v5416_v45 = vpop.permute.xlu0 %5415  ;;  %7768 = vmatprep.subr.bf16.mxu0 %v8280_v54 }
0x1536   :  { %7749 = vmatmul.mubr.msk.bf16.vlgmr.msra.gmra.mxu1 %vm427_vm0, %v5416_v45 }
0x1537   :  { %7761 = vmatpush3.bf16.msra.mxu1 %v7951_v28  ;;  %7757 = vmatmul.mubr.msk.bf16.vlgmr.msra.gmra.mxu0 %vm427_vm0, %v5265_v4 }
0x1538   :  { %7769 = vmatpush3.bf16.msra.mxu0 %v7952_v43  ;;  %7762 = vmatprep.subr.bf16.mxu1 %v8280_v54 }
0x1539   :  { %7770 = vmatprep.subr.bf16.mxu0 %v8280_v54  ;;  %7764 = vmatprep.mubr.msk.bf16.mxu1 %vm8281_vm1, %v8280_v54 }
0x153a   :  { %7772 = vmatprep.mubr.msk.bf16.mxu0 %vm8281_vm1, %v8280_v54 }
0x153b   :  { %7763 = vmatpush3.bf16.msra.mxu1 %v7953_v24 }
0x153c   :  { %7771 = vmatpush3.bf16.msra.mxu0 %v7954_v48  ;;  %7776 = vmatprep.subr.bf16.mxu1 %v8280_v54 }
0x153d   :  { %v5567_v47 = vpop.permute.xlu1 %5566  ;;  %7784 = vmatprep.subr.bf16.mxu0 %v8280_v54 }
0x153e   :  { %7765 = vmatmul.mubr.msk.bf16.vlgmr.msra.gmra.mxu1 %vm427_vm0, %v5567_v47 }
0x153f   :  { %7773 = vmatmul.mubr.msk.bf16.vlgmr.msra.gmra.mxu0 %vm427_vm0, %v5416_v45  ;;  %7780 = vmatprep.mubr.msk.bf16.mxu1 %vm8281_vm1, %v8280_v54 }
0x1540   :  { %7788 = vmatprep.mubr.msk.bf16.mxu0 %vm8281_vm1, %v8280_v54 }
0x15e7   :  { %v5206_v26 = vpop.f32.mrf.mxu0 }
0x15e8   :  { %v5213_v35 = vrot.slane %v5206_v26, 2 }
0x15e9   :  { %v7726_v49 = vpop.f32.mrf.mxu0 }
0x15ea   :  { %v5215_v31 = vadd.f32 %v5213_v35, %v9009_v3 }
0x15eb   :  { %v5209_v32 = vpop.f32.mrf.mxu0 }
0x15ec   :  { %8155 = vtanh.f32 %v5215_v31  ;;  %v7091_v10 = vmul.f32 -1.442695, %v5215_v31 }
0x15ed   :  { %v7727_v30 = vpop.f32.mrf.mxu0  ;;  %v5315_v50 = vpop.f32.mrf.mxu1 }
0x15ef   :  { %v7734_v51 = vpop.f32.mrf.mxu1  ;;  %v5367_v9 = vpop.f32.mrf.mxu0 }
0x15f0   :  { %v5368_v27 = vadd.f32 %v5367_v9, %v5315_v50 }
0x15f1   :  { %v5318_v55 = vpop.f32.mrf.mxu1  ;;  %v7742_v39 = vpop.f32.mrf.mxu0 }
0x15f2   :  { %v5380_v60 = vadd.f32 %v9462_v40, %v5368_v27  ;;  %v5224_v55 = vrot.slane %v9603_v58, 6 }
0x15f3   :  { %v7735_v25 = vpop.f32.mrf.mxu1  ;;  %v5370_v1 = vpop.f32.mrf.mxu0 }
0x15f4   :  { %8157 = vtanh.f32 %v5380_v60  ;;  %v7108_v20 = vmul.f32 -1.442695, %v5380_v60 }
0x15f5   :  { %v7743_v62 = vpop.f32.mrf.mxu0 }
0x15f6   :  { %v5466_v57 = vpop.f32.mrf.mxu1 }
0x15f7   :  { %v5518_v41 = vpop.f32.mrf.mxu0 }
0x15f8   :  { %v7750_v44 = vpop.f32.mrf.mxu1  ;;  %v5519_v59 = vadd.f32 %v5518_v41, %v5466_v57 }
0x15f9   :  { %v8156_v3 = vpop.eup %8155  ;;  %v7758_v8 = vpop.f32.mrf.mxu0 }
0x15fa   :  { %v5531_v36 = vadd.f32 %v9468_v56, %v5519_v59  ;;  %v5469_v33 = vpop.f32.mrf.mxu1  ;;  %5228 = vrot.lane.b32.xlu0 %v8156_v3, %s8282_s24 }
0x15fb   :  { %v5521_v38 = vpop.f32.mrf.mxu0 }
0x15fc   :  { %8159 = vtanh.f32 %v5531_v36  ;;  %v7751_v46 = vpop.f32.mrf.mxu1  ;;  %v7125_v2 = vmul.f32 -1.442695, %v5531_v36  ;;  %v7957_v38 = vld [vmem:[%s10021_s4 + $0x18] sm:$0xff]  }
0x15fd   :  { %v7759_v6 = vpop.f32.mrf.mxu0  ;;  %7777 = vmatpush3.bf16.msra.mxu1 %v7957_v38 }
0x15fe   :  { %v5617_v40 = vpop.f32.mrf.mxu1  ;;  %7778 = vmatprep.subr.bf16.mxu1 %v8280_v54  ;;  %v7959_v6 = vld [vmem:[%s10021_s4 + $0x10] sm:$0xff]  }
0x15ff   :  { %v5669_v17 = vpop.f32.mrf.mxu0 }
0x1600   :  { %v7766_v18 = vpop.f32.mrf.mxu1  ;;  %v5670_v15 = vadd.f32 %v5669_v17, %v5617_v40 }
0x1601   :  { %v8158_v7 = vpop.eup %8157  ;;  %v7774_v19 = vpop.f32.mrf.mxu0  ;;  %7779 = vmatpush3.bf16.msra.mxu1 %v7959_v6 }
0x1602   :  { %v5682_v16 = vadd.f32 %v9592_v14, %v5670_v15  ;;  %v5620_v21 = vpop.f32.mrf.mxu1  ;;  %5390 = vrot.lane.b32.xlu1 %v8158_v7, %s8282_s24  ;;  %7792 = vmatprep.subr.bf16.mxu1 %v8280_v54 }
0x1603   :  { %v5672_v29 = vpop.f32.mrf.mxu0 }
0x1604   :  { %8161 = vtanh.f32 %v5682_v16  ;;  %v7767_v56 = vpop.f32.mrf.mxu1  ;;  %v7142_v23 = vmul.f32 -1.442695, %v5682_v16 }
0x1605   :  { %v7775_v12 = vpop.f32.mrf.mxu0  ;;  %8163 = vpow2.f32 %v7091_v10  ;;  %v7958_v10 = vld [vmem:[%s10020_s3 + $0x28] sm:$0xff]  }
0x1606   :  { %8165 = vpow2.f32 %v7108_v20 }
0x1607   :  { %8167 = vpow2.f32 %v7125_v2  ;;  %v7960_v2 = vld [vmem:[%s10020_s3 + $0x20] sm:$0xff]  }
0x1609   :  { %v8160_v63 = vpop.eup %8159 }
0x160a   :  { %5541 = vrot.lane.b32.xlu0 %v8160_v63, %s8282_s24 }
0x1611   :  { %v8162_v37 = vpop.eup %8161 }
0x1612   :  { %5692 = vrot.lane.b32.xlu1 %v8162_v37, %s8282_s24  ;;  %v8164_v42 = vpop.eup %8163 }
0x1613   :  { %v5219_v4 = vadd.f32 1.0, %v8164_v42  ;;  %v8166_v5 = vpop.eup %8165  ;;  %v7961_v42 = vld [vmem:[%s10021_s4 + $0x28] sm:$0xff]  }
0x1614   :  { %v5384_v11 = vadd.f32 1.0, %v8166_v5  ;;  %v8168_v28 = vpop.eup %8167  ;;  %v7963_v5 = vld [vmem:[%s10021_s4 + $0x20] sm:$0xff]  }
0x1615   :  { %8169 = vrcp.f32 %v5219_v4  ;;  %v5535_v43 = vadd.f32 1.0, %v8168_v28  ;;  %v7965_v28 = vld [vmem:[%s10021_s4 + $0x38] sm:$0xff]  }
0x1616   :  { %8171 = vpow2.f32 %v7142_v23  ;;  %v7962_v23 = vld [vmem:[%s10020_s3 + $0x38] sm:$0xff]  }
0x1617   :  { %8173 = vrcp.f32 %v5384_v11  ;;  %v7964_v11 = vld [vmem:[%s10020_s3 + $0x30] sm:$0xff]  }
0x1618   :  { %8175 = vrcp.f32 %v5535_v43 }
0x1622   :  { %v8170_v45 = vpop.eup %8169 }
0x1623   :  { %v8172_v47 = vpop.eup %8171  ;;  %v5226_v39 = vmul.f32 %v8170_v45, %v5224_v55 }
0x1624   :  { %v5686_v26 = vadd.f32 1.0, %v8172_v47  ;;  %v8174_v35 = vpop.eup %8173 }
0x1625   :  { %v8176_v32 = vpop.eup %8175  ;;  %v5388_v1 = vmul.f32 %v8174_v35, %v9607_v61 }
0x1626   :  { %8177 = vrcp.f32 %v5686_v26  ;;  %v5539_v41 = vmul.f32 %v8176_v32, %v9612_v52  ;;  %v7955_v52 = vld [vmem:[%s10020_s3 + $0x18] sm:$0xff]  }
0x1627   :  { %7785 = vmatpush3.bf16.msra.mxu0 %v7955_v52 }
0x1628   :  { %7786 = vmatprep.subr.bf16.mxu0 %v8280_v54 }
0x1633   :  { %v8178_v51 = vpop.eup %8177 }
0x1634   :  { %v5690_v58 = vmul.f32 %v8178_v51, %v9617_v53  ;;  %v7956_v53 = vld [vmem:[%s10020_s3 + $0x10] sm:$0xff]  }
0x1635   :  { %7787 = vmatpush3.bf16.msra.mxu0 %v7956_v53 }
0x1636   :  { %7800 = vmatprep.subr.bf16.mxu0 %v8280_v54 }
0x166c   :  { %v5229_v24 = vpop.permute.xlu0 %5228 }
0x166d   :  { %v5231_v48 = vmul.f32 %v8170_v45, %v5229_v24 }
0x166f   :  { %5233 = vrot.lane.b32.xlu0 %v5231_v48, %s8282_s24 }
0x1674   :  { %v5391_v49 = vpop.permute.xlu1 %5390 }
0x1675   :  { %v5393_v31 = vmul.f32 %v8174_v35, %v5391_v49  ;;  %v7158_v49 = vld [vmem:[%s10022_s5 + $0x1] ss:$0 sm:$0xff] }
0x1677   :  { %5395 = vrot.lane.b32.xlu1 %v5393_v31, %s8282_s24 }
0x167c   :  { %v5542_v30 = vpop.permute.xlu0 %5541 }
0x167d   :  { %v5544_v50 = vmul.f32 %v8176_v32, %v5542_v30 }
0x167f   :  { %5546 = vrot.lane.b32.xlu0 %v5544_v50, %s8282_s24 }
0x1684   :  { %v5693_v9 = vpop.permute.xlu1 %5692 }
0x1685   :  { %v5695_v27 = vmul.f32 %v8178_v51, %v5693_v9 }
0x1687   :  { %5697 = vrot.lane.b32.xlu1 %v5695_v27, %s8282_s24 }
0x16e1   :  { %v5234_v60 = vpop.permute.xlu0 %5233 }
0x16e2   :  { %v9720_v25 = vadd.f32 %v5234_v60, %v5226_v39 }
0x16e4   :  { %8179 = vtanh.f32 %v9720_v25 }
0x16e9   :  { %v5396_v62 = vpop.permute.xlu1 %5395 }
0x16ea   :  { %v9724_v57 = vadd.f32 %v5396_v62, %v5388_v1  ;;  %v9823_v1 = vld [vmem:[%s10022_s5 + $0x2] ss:$0 sm:$0xff] }
0x16ec   :  { %8181 = vtanh.f32 %v9724_v57 }
0x16f1   :  { %v8180_v44 = vpop.eup %8179  ;;  %v5547_v59 = vpop.permute.xlu0 %5546 }
0x16f2   :  { %v9728_v3 = vadd.f32 %v5547_v59, %v5539_v41  ;;  %5239 = vrot.lane.b32.xlu0 %v8180_v44, %s8282_s24 }
0x16f4   :  { %8183 = vtanh.f32 %v9728_v3 }
0x16f9   :  { %v8182_v8 = vpop.eup %8181  ;;  %v5698_v36 = vpop.permute.xlu1 %5697 }
0x16fa   :  { %v9733_v61 = vadd.f32 %v5698_v36, %v5690_v58  ;;  %5401 = vrot.lane.b32.xlu1 %v8182_v8, %s8282_s24 }
0x16fc   :  { %8185 = vtanh.f32 %v9733_v61 }
0x1701   :  { %v8184_v33 = vpop.eup %8183 }
0x1702   :  { %5552 = vrot.lane.b32.xlu0 %v8184_v33, %s8282_s24 }
0x1709   :  { %v8186_v46 = vpop.eup %8185 }
0x170a   :  { %5703 = vrot.lane.b32.xlu1 %v8186_v46, %s8282_s24 }
0x1764   :  { %v5240_v40 = vpop.permute.xlu0 %5239 }
0x1765   :  { %v9755_v17 = vmul.f32 %v8170_v45, %v5240_v40  ;;  %v7966_v45 = vld [vmem:[%s10021_s4 + $0x30] sm:$0xff]  }
0x1767   :  { %v5712_v18 = vpack.c.bf16 %v9755_v17, %v9755_v17 }
0x1769   :  { %v5781_v15 = vrot.slane %v5712_v18, 3 }
0x176b   :  { %5782 = vrot.lane.b32.xlu1 %v5781_v15, %s8283_s0 }
0x176c   :  { %v5402_v7 = vpop.permute.xlu1 %5401 }
0x176d   :  { %v5404_v19 = vmul.f32 %v8174_v35, %v5402_v7 }
0x176f   :  { %v5717_v16 = vpack.c.bf16 %v5404_v19, %v5404_v19 }
0x1771   :  { %5723 = vrot.lane.b32.xlu0 %v5717_v16, %s8283_s0 }
0x1774   :  { %v5553_v21 = vpop.permute.xlu0 %5552 }
0x1775   :  { %v5555_v29 = vmul.f32 %v8176_v32, %v5553_v21 }
0x1777   :  { %v5887_v56 = vpack.c.bf16 %v5555_v29, %v5555_v29 }
0x1779   :  { %5893 = vrot.lane.b32.xlu0 %v5887_v56, %s8283_s0 }
0x177c   :  { %v5704_v12 = vpop.permute.xlu1 %5703 }
0x177d   :  { %v9762_v63 = vmul.f32 %v8178_v51, %v5704_v12 }
0x177f   :  { %v6038_v37 = vpack.c.bf16 %v9762_v63, %v9762_v63 }
0x1781   :  { %6044 = vrot.lane.b32.xlu1 %v6038_v37, %s8283_s0 }
0x17dd   :  { %v5783_v20 = vpop.permute.xlu1 %5782 }
0x17de   :  { %7789 = vmatmul.mubr.msk.bf16.vlgmr.msra.gmra.mxu0 %vm427_vm0, %v5783_v20 }
0x17df   :  { %7801 = vmatpush3.bf16.msra.mxu0 %v7958_v10  ;;  %7804 = vmatprep.mubr.msk.bf16.mxu0 %vm8281_vm1, %v8280_v54 }
0x17e0   :  { %7802 = vmatprep.subr.bf16.mxu0 %v8280_v54 }
0x17e3   :  { %v5724_v4 = vpop.permute.xlu0 %5723  ;;  %7803 = vmatpush3.bf16.msra.mxu0 %v7960_v2 }
0x17e4   :  { %7781 = vmatmul.mubr.msk.bf16.vlgmr.msra.gmra.mxu1 %vm427_vm0, %v5724_v4  ;;  %7816 = vmatprep.subr.bf16.mxu0 %v8280_v54 }
0x17e5   :  { %7793 = vmatpush3.bf16.msra.mxu1 %v7961_v42  ;;  %7796 = vmatprep.mubr.msk.bf16.mxu1 %vm8281_vm1, %v8280_v54 }
0x17e6   :  { %7805 = vmatmul.mubr.msk.bf16.vlgmr.msra.gmra.mxu0 %vm427_vm0, %v5724_v4  ;;  %7794 = vmatprep.subr.bf16.mxu1 %v8280_v54 }
0x17e7   :  { %7817 = vmatpush3.bf16.msra.mxu0 %v7962_v23  ;;  %7820 = vmatprep.mubr.msk.bf16.mxu0 %vm8281_vm1, %v8280_v54 }
0x17e8   :  { %7818 = vmatprep.subr.bf16.mxu0 %v8280_v54 }
0x17e9   :  { %7795 = vmatpush3.bf16.msra.mxu1 %v7963_v5 }
0x17ea   :  { %7808 = vmatprep.subr.bf16.mxu1 %v8280_v54 }
0x17eb   :  { %v5894_v43 = vpop.permute.xlu0 %5893  ;;  %7819 = vmatpush3.bf16.msra.mxu0 %v7964_v11 }
0x17ec   :  { %7797 = vmatmul.mubr.msk.bf16.vlgmr.msra.gmra.mxu1 %vm427_vm0, %v5894_v43  ;;  %7832 = vmatprep.subr.bf16.mxu0 %v8280_v54 }
0x17ed   :  { %7809 = vmatpush3.bf16.msra.mxu1 %v7965_v28  ;;  %7812 = vmatprep.mubr.msk.bf16.mxu1 %vm8281_vm1, %v8280_v54 }
0x17ee   :  { %7821 = vmatmul.mubr.msk.bf16.vlgmr.msra.gmra.mxu0 %vm427_vm0, %v5894_v43  ;;  %7810 = vmatprep.subr.bf16.mxu1 %v8280_v54 }
0x17ef   :  { %7836 = vmatprep.mubr.msk.bf16.mxu0 %vm8281_vm1, %v8280_v54 }
0x17f1   :  { %7811 = vmatpush3.bf16.msra.mxu1 %v7966_v45 }
0x17f2   :  { %7824 = vmatprep.subr.bf16.mxu1 %v8280_v54 }
0x17f3   :  { %v6045_v24 = vpop.permute.xlu1 %6044 }
0x17f4   :  { %7813 = vmatmul.mubr.msk.bf16.vlgmr.msra.gmra.mxu1 %vm427_vm0, %v6045_v24 }
0x17f5   :  { %7828 = vmatprep.mubr.msk.bf16.mxu1 %vm8281_vm1, %v8280_v54 }
0x189e   :  { %v5833_v48 = vpop.f32.mrf.mxu0 }
0x18a0   :  { %v7790_v47 = vpop.f32.mrf.mxu0 }
0x18a2   :  { %v5836_v26 = vpop.f32.mrf.mxu0 }
0x18a4   :  { %v5774_v35 = vpop.f32.mrf.mxu1  ;;  %v7791_v31 = vpop.f32.mrf.mxu0 }
0x18a5   :  { %v5834_v32 = vadd.f32 %v5833_v48, %v5774_v35 }
0x18a6   :  { %v7782_v30 = vpop.f32.mrf.mxu1  ;;  %v5996_v50 = vpop.f32.mrf.mxu0 }
0x18a7   :  { %v5846_v51 = vadd.f32 %v7158_v49, %v5834_v32 }
0x18a8   :  { %v5777_v9 = vpop.f32.mrf.mxu1  ;;  %v7806_v27 = vpop.f32.mrf.mxu0 }
0x18a9   :  { %8187 = vtanh.f32 %v5846_v51  ;;  %v7159_v21 = vmul.f32 -1.442695, %v5846_v51 }
0x18aa   :  { %v7783_v55 = vpop.f32.mrf.mxu1  ;;  %v5999_v39 = vpop.f32.mrf.mxu0 }
0x18ab   :  { %v7969_v55 = vld [vmem:[%s10021_s4 + $0x28] sm:$0xff]   ;;  %v7971_v39 = vld [vmem:[%s10021_s4 + $0x20] sm:$0xff]  }
0x18ac   :  { %v5944_v60 = vpop.f32.mrf.mxu1  ;;  %v7807_v62 = vpop.f32.mrf.mxu0  ;;  %7825 = vmatpush3.bf16.msra.mxu1 %v7969_v55 }
0x18ad   :  { %v5997_v41 = vadd.f32 %v5996_v50, %v5944_v60  ;;  %7826 = vmatprep.subr.bf16.mxu1 %v8280_v54 }
0x18ae   :  { %v7798_v44 = vpop.f32.mrf.mxu1  ;;  %v6147_v59 = vpop.f32.mrf.mxu0 }
0x18af   :  { %v6009_v58 = vadd.f32 %v9823_v1, %v5997_v41 }
0x18b0   :  { %v5947_v8 = vpop.f32.mrf.mxu1  ;;  %v7822_v36 = vpop.f32.mrf.mxu0  ;;  %7827 = vmatpush3.bf16.msra.mxu1 %v7971_v39 }
0x18b1   :  { %8189 = vtanh.f32 %v6009_v58  ;;  %v7176_v29 = vmul.f32 -1.442695, %v6009_v58  ;;  %7840 = vmatprep.subr.bf16.mxu1 %v8280_v54 }
0x18b2   :  { %v7799_v33 = vpop.f32.mrf.mxu1  ;;  %v6150_v52 = vpop.f32.mrf.mxu0 }
0x18b3   :  { %v7970_v52 = vld [vmem:[%s10020_s3 + $0x38] sm:$0xff]  }
0x18b4   :  { %v6095_v38 = vpop.f32.mrf.mxu1  ;;  %v7823_v53 = vpop.f32.mrf.mxu0 }
0x18b5   :  { %v6148_v46 = vadd.f32 %v6147_v59, %v6095_v38  ;;  %v7972_v53 = vld [vmem:[%s10020_s3 + $0x30] sm:$0xff]  }
0x18b6   :  { %v8188_v6 = vpop.eup %8187  ;;  %v7814_v40 = vpop.f32.mrf.mxu1 }
0x18b7   :  { %v6160_v18 = vadd.f32 %v9592_v14, %v6148_v46  ;;  %5856 = vrot.lane.b32.xlu0 %v8188_v6, %s8282_s24  ;;  %v7973_v46 = vld [vmem:[%s10021_s4 + $0x38] sm:$0xff]   ;;  %v7974_v40 = vld [vmem:[%s10021_s4 + $0x30] sm:$0xff]  }
0x18b8   :  { %v6098_v15 = vpop.f32.mrf.mxu1 }
0x18b9   :  { %8191 = vtanh.f32 %v6160_v18  ;;  %v7193_v56 = vmul.f32 -1.442695, %v6160_v18 }
0x18ba   :  { %v7815_v7 = vpop.f32.mrf.mxu1  ;;  %8193 = vpow2.f32 %v7159_v21 }
0x18bb   :  { %8195 = vpow2.f32 %v7176_v29 }
0x18bc   :  { %8197 = vpow2.f32 %v7193_v56 }
0x18be   :  { %v8190_v19 = vpop.eup %8189 }
0x18bf   :  { %6019 = vrot.lane.b32.xlu1 %v8190_v19, %s8282_s24 }
0x18c6   :  { %v8192_v16 = vpop.eup %8191 }
0x18c7   :  { %6170 = vrot.lane.b32.xlu0 %v8192_v16, %s8282_s24  ;;  %v8194_v12 = vpop.eup %8193 }
0x18c8   :  { %v5850_v37 = vadd.f32 1.0, %v8194_v12  ;;  %v8196_v10 = vpop.eup %8195 }
0x18c9   :  { %v6013_v20 = vadd.f32 1.0, %v8196_v10  ;;  %v8198_v2 = vpop.eup %8197 }
0x18ca   :  { %8199 = vrcp.f32 %v5850_v37  ;;  %v6164_v42 = vadd.f32 1.0, %v8198_v2 }
0x18cb   :  { %8201 = vrcp.f32 %v6013_v20 }
0x18cc   :  { %8203 = vrcp.f32 %v6164_v42 }
0x18d7   :  { %v8200_v4 = vpop.eup %8199 }
0x18d8   :  { %v8202_v11 = vpop.eup %8201  ;;  %v5854_v47 = vmul.f32 %v8200_v4, %v9724_v57 }
0x18d9   :  { %v8204_v45 = vpop.eup %8203  ;;  %v6017_v49 = vmul.f32 %v8202_v11, %v9728_v3  ;;  %v7967_v3 = vld [vmem:[%s10020_s3 + $0x28] sm:$0xff]  }
0x18da   :  { %v6168_v30 = vmul.f32 %v8204_v45, %v9733_v61  ;;  %7833 = vmatpush3.bf16.msra.mxu0 %v7967_v3  ;;  %v7968_v61 = vld [vmem:[%s10020_s3 + $0x20] sm:$0xff]  }
0x18db   :  { %7834 = vmatprep.subr.bf16.mxu0 %v8280_v54 }
0x18de   :  { %7835 = vmatpush3.bf16.msra.mxu0 %v7968_v61 }
0x18df   :  { %7848 = vmatprep.subr.bf16.mxu0 %v8280_v54 }
0x1929   :  { %v5857_v23 = vpop.permute.xlu0 %5856 }
0x192a   :  { %v5859_v5 = vmul.f32 %v8200_v4, %v5857_v23 }
0x192c   :  { %5861 = vrot.lane.b32.xlu1 %v5859_v5, %s8282_s24 }
0x1931   :  { %v6020_v28 = vpop.permute.xlu1 %6019 }
0x1932   :  { %v6022_v43 = vmul.f32 %v8202_v11, %v6020_v28 }
0x1934   :  { %6024 = vrot.lane.b32.xlu0 %v6022_v43, %s8282_s24 }
0x1939   :  { %v6171_v24 = vpop.permute.xlu0 %6170 }
0x193a   :  { %v6173_v48 = vmul.f32 %v8204_v45, %v6171_v24 }
0x193c   :  { %6175 = vrot.lane.b32.xlu1 %v6173_v48, %s8282_s24 }
0x199e   :  { %v5862_v26 = vpop.permute.xlu1 %5861 }
0x199f   :  { %v9834_v35 = vadd.f32 %v5862_v26, %v5854_v47 }
0x19a1   :  { %8205 = vtanh.f32 %v9834_v35 }
0x19a6   :  { %v6025_v31 = vpop.permute.xlu0 %6024 }
0x19a7   :  { %v9838_v32 = vadd.f32 %v6025_v31, %v6017_v49 }
0x19a9   :  { %8207 = vtanh.f32 %v9838_v32 }
0x19ae   :  { %v8206_v50 = vpop.eup %8205  ;;  %v6176_v51 = vpop.permute.xlu1 %6175 }
0x19af   :  { %v9842_v9 = vadd.f32 %v6176_v51, %v6168_v30  ;;  %5867 = vrot.lane.b32.xlu0 %v8206_v50, %s8282_s24 }
0x19b1   :  { %8209 = vtanh.f32 %v9842_v9 }
0x19b6   :  { %v8208_v57 = vpop.eup %8207 }
0x19b7   :  { %6030 = vrot.lane.b32.xlu1 %v8208_v57, %s8282_s24 }
0x19be   :  { %v8210_v27 = vpop.eup %8209 }
0x19bf   :  { %6181 = vrot.lane.b32.xlu0 %v8210_v27, %s8282_s24 }
0x1a21   :  { %v5868_v60 = vpop.permute.xlu0 %5867 }
0x1a22   :  { %v9864_v62 = vmul.f32 %v8200_v4, %v5868_v60 }
0x1a24   :  { %v6190_v41 = vpack.c.bf16 %v9864_v62, %v9864_v62 }
0x1a26   :  { %6259 = vrot.lane.b32.xlu0 %v6190_v41, %s8283_s0 }
0x1a29   :  { %v6031_v44 = vpop.permute.xlu1 %6030 }
0x1a2a   :  { %v6033_v59 = vmul.f32 %v8202_v11, %v6031_v44 }
0x1a2c   :  { %v6195_v58 = vpack.c.bf16 %v6033_v59, %v6033_v59 }
0x1a2e   :  { %6201 = vrot.lane.b32.xlu1 %v6195_v58, %s8283_s0  ;;  %v7975_v58 = vld [vmem:[%s10020_s3 + $0x38] sm:$0xff]  }
0x1a31   :  { %v6182_v8 = vpop.permute.xlu0 %6181 }
0x1a32   :  { %v9870_v36 = vmul.f32 %v8204_v45, %v6182_v8 }
0x1a34   :  { %v6364_v33 = vpack.c.bf16 %v9870_v36, %v9870_v36 }
0x1a36   :  { %6370 = vrot.lane.b32.xlu1 %v6364_v33, %s8283_s0  ;;  %v7978_v33 = vld [vmem:[%s10021_s4 + $0x30] sm:$0xff]  }
0x1a98   :  { %v6260_v38 = vpop.permute.xlu0 %6259 }
0x1a99   :  { %7837 = vmatmul.mubr.msk.bf16.vlgmr.msra.gmra.mxu0 %vm427_vm0, %v6260_v38 }
0x1a9a   :  { %7849 = vmatpush3.bf16.msra.mxu0 %v7970_v52  ;;  %7852 = vmatprep.mubr.msk.bf16.mxu0 %vm8281_vm1, %v8280_v54 }
0x1a9b   :  { %7850 = vmatprep.subr.bf16.mxu0 %v8280_v54 }
0x1a9e   :  { %7851 = vmatpush3.bf16.msra.mxu0 %v7972_v53 }
0x1a9f   :  { %7864 = vmatprep.subr.bf16.mxu0 %v8280_v54 }
0x1aa0   :  { %v6202_v6 = vpop.permute.xlu1 %6201 }
0x1aa1   :  { %7829 = vmatmul.mubr.msk.bf16.vlgmr.msra.gmra.mxu1 %vm427_vm0, %v6202_v6  ;;  %7853 = vmatmul.mubr.msk.bf16.vlgmr.msra.gmra.mxu0 %vm427_vm0, %v6202_v6 }
0x1aa2   :  { %7841 = vmatpush3.bf16.msra.mxu1 %v7973_v46  ;;  %7844 = vmatprep.mubr.msk.bf16.mxu1 %vm8281_vm1, %v8280_v54 }
0x1aa3   :  { %7842 = vmatprep.subr.bf16.mxu1 %v8280_v54  ;;  %7868 = vmatprep.mubr.msk.bf16.mxu0 %vm8281_vm1, %v8280_v54 }
0x1aa4   :  { %7865 = vmatpush3.bf16.msra.mxu0 %v7975_v58 }
0x1aa5   :  { %7866 = vmatprep.subr.bf16.mxu0 %v8280_v54 }
0x1aa6   :  { %7843 = vmatpush3.bf16.msra.mxu1 %v7974_v40 }
0x1aa7   :  { %7856 = vmatprep.subr.bf16.mxu1 %v8280_v54 }
0x1aa8   :  { %v6371_v18 = vpop.permute.xlu1 %6370 }
0x1aa9   :  { %7845 = vmatmul.mubr.msk.bf16.vlgmr.msra.gmra.mxu1 %vm427_vm0, %v6371_v18 }
0x1aaa   :  { %7860 = vmatprep.mubr.msk.bf16.mxu1 %vm8281_vm1, %v8280_v54 }
0x1b59   :  { %v6310_v15 = vpop.f32.mrf.mxu0 }
0x1b5b   :  { %v7838_v7 = vpop.f32.mrf.mxu0 }
0x1b5d   :  { %v6313_v19 = vpop.f32.mrf.mxu0 }
0x1b5f   :  { %v7839_v16 = vpop.f32.mrf.mxu0 }
0x1b61   :  { %v6252_v21 = vpop.f32.mrf.mxu1  ;;  %v6473_v29 = vpop.f32.mrf.mxu0 }
0x1b62   :  { %v6311_v56 = vadd.f32 %v6310_v15, %v6252_v21 }
0x1b63   :  { %v7830_v12 = vpop.f32.mrf.mxu1  ;;  %v7854_v37 = vpop.f32.mrf.mxu0 }
0x1b64   :  { %v6323_v10 = vadd.f32 %v9823_v1, %v6311_v56 }
0x1b65   :  { %v6255_v20 = vpop.f32.mrf.mxu1  ;;  %v6476_v2 = vpop.f32.mrf.mxu0 }
0x1b66   :  { %8211 = vtanh.f32 %v6323_v10  ;;  %v7210_v1 = vmul.f32 -1.442695, %v6323_v10 }
0x1b67   :  { %v7831_v42 = vpop.f32.mrf.mxu1  ;;  %v7855_v4 = vpop.f32.mrf.mxu0 }
0x1b69   :  { %v6421_v23 = vpop.f32.mrf.mxu1 }
0x1b6a   :  { %v6474_v5 = vadd.f32 %v6473_v29, %v6421_v23  ;;  %v7243_v29 = vld [vmem:[%s10022_s5 + $0x3] ss:$0 sm:$0xff] }
0x1b6b   :  { %v7846_v11 = vpop.f32.mrf.mxu1 }
0x1b6c   :  { %v6486_v28 = vadd.f32 %v9592_v14, %v6474_v5 }
0x1b6d   :  { %v6424_v43 = vpop.f32.mrf.mxu1 }
0x1b6e   :  { %8213 = vtanh.f32 %v6486_v28  ;;  %v7227_v47 = vmul.f32 -1.442695, %v6486_v28 }
0x1b6f   :  { %v7847_v45 = vpop.f32.mrf.mxu1  ;;  %8215 = vpow2.f32 %v7210_v1 }
0x1b70   :  { %8217 = vpow2.f32 %v7227_v47 }
0x1b73   :  { %v8212_v24 = vpop.eup %8211 }
0x1b74   :  { %6333 = vrot.lane.b32.xlu0 %v8212_v24, %s8282_s24 }
0x1b7b   :  { %v8214_v48 = vpop.eup %8213 }
0x1b7c   :  { %6496 = vrot.lane.b32.xlu1 %v8214_v48, %s8282_s24  ;;  %v8216_v26 = vpop.eup %8215 }
0x1b7d   :  { %v6327_v49 = vadd.f32 1.0, %v8216_v26  ;;  %v8218_v31 = vpop.eup %8217 }
0x1b7e   :  { %v6490_v30 = vadd.f32 1.0, %v8218_v31 }
0x1b7f   :  { %8219 = vrcp.f32 %v6327_v49 }
0x1b80   :  { %8221 = vrcp.f32 %v6490_v30 }
0x1b8c   :  { %v8220_v14 = vpop.eup %8219 }
0x1b8d   :  { %v8222_v57 = vpop.eup %8221  ;;  %v6331_v27 = vmul.f32 %v8220_v14, %v9838_v32  ;;  %v7976_v32 = vld [vmem:[%s10020_s3 + $0x30] sm:$0xff]  }
0x1b8e   :  { %v6494_v60 = vmul.f32 %v8222_v57, %v9842_v9  ;;  %7867 = vmatpush3.bf16.msra.mxu0 %v7976_v32  ;;  %v7977_v9 = vld [vmem:[%s10021_s4 + $0x38] sm:$0xff]  }
0x1b8f   :  { %7857 = vmatpush3.bf16.msra.mxu1 %v7977_v9 }
0x1b90   :  { %7858 = vmatprep.subr.bf16.mxu1 %v8280_v54 }
0x1b93   :  { %7859 = vmatpush3.bf16.msra.mxu1 %v7978_v33 }
0x1be6   :  { %v6334_v50 = vpop.permute.xlu0 %6333 }
0x1be7   :  { %v6336_v51 = vmul.f32 %v8220_v14, %v6334_v50 }
0x1be9   :  { %6338 = vrot.lane.b32.xlu0 %v6336_v51, %s8282_s24 }
0x1bee   :  { %v6497_v3 = vpop.permute.xlu1 %6496 }
0x1bef   :  { %v6499_v61 = vmul.f32 %v8222_v57, %v6497_v3 }
0x1bf1   :  { %6501 = vrot.lane.b32.xlu1 %v6499_v61, %s8282_s24 }
0x1c5b   :  { %v6339_v55 = vpop.permute.xlu0 %6338 }
0x1c5c   :  { %v9910_v39 = vadd.f32 %v6339_v55, %v6331_v27 }
0x1c5e   :  { %8223 = vtanh.f32 %v9910_v39 }
0x1c63   :  { %v6502_v41 = vpop.permute.xlu1 %6501 }
0x1c64   :  { %v6504_v44 = vadd.f32 %v6502_v41, %v6494_v60 }
0x1c66   :  { %8225 = vtanh.f32 %v6504_v44 }
0x1c6b   :  { %v8224_v59 = vpop.eup %8223 }
0x1c6c   :  { %6344 = vrot.lane.b32.xlu0 %v8224_v59, %s8282_s24 }
0x1c73   :  { %v8226_v8 = vpop.eup %8225 }
0x1c74   :  { %6507 = vrot.lane.b32.xlu1 %v8226_v8, %s8282_s24 }
0x1cde   :  { %v6345_v52 = vpop.permute.xlu0 %6344 }
0x1cdf   :  { %v6347_v38 = vmul.f32 %v8220_v14, %v6345_v52 }
0x1ce1   :  { %v6516_v53 = vpack.c.bf16 %v6347_v38, %v6347_v38 }
0x1ce3   :  { %6585 = vrot.lane.b32.xlu1 %v6516_v53, %s8283_s0 }
0x1ce6   :  { %v6508_v46 = vpop.permute.xlu1 %6507 }
0x1ce7   :  { %v9931_v6 = vmul.f32 %v8222_v57, %v6508_v46 }
0x1ce9   :  { %v6521_v40 = vpack.c.bf16 %v9931_v6, %v9931_v6 }
0x1ceb   :  { %6527 = vrot.lane.b32.xlu0 %v6521_v40, %s8283_s0 }
0x1d55   :  { %v6586_v18 = vpop.permute.xlu1 %6585 }
0x1d56   :  { %7869 = vmatmul.mubr.msk.bf16.vlgmr.msra.gmra.mxu0 %vm427_vm0, %v6586_v18 }
0x1d5d   :  { %v6528_v15 = vpop.permute.xlu0 %6527 }
0x1d5e   :  { %7861 = vmatmul.mubr.msk.bf16.vlgmr.msra.gmra.mxu1 %vm427_vm0, %v6528_v15 }
0x1e16   :  { %v6636_v54 = vpop.f32.mrf.mxu0 }
0x1e18   :  { %v7870_v7 = vpop.f32.mrf.mxu0 }
0x1e1a   :  { %v6639_v19 = vpop.f32.mrf.mxu0 }
0x1e1c   :  { %v7871_v16 = vpop.f32.mrf.mxu0 }
0x1e1e   :  { %v6578_v21 = vpop.f32.mrf.mxu1 }
0x1e1f   :  { %v6637_v56 = vadd.f32 %v6636_v54, %v6578_v21 }
0x1e20   :  { %v7862_v12 = vpop.f32.mrf.mxu1 }
0x1e21   :  { %v6649_v37 = vadd.f32 %v7243_v29, %v6637_v56 }
0x1e22   :  { %v6581_v10 = vpop.f32.mrf.mxu1 }
0x1e23   :  { %8227 = vtanh.f32 %v6649_v37  ;;  %v7244_v42 = vmul.f32 -1.442695, %v6649_v37 }
0x1e24   :  { %v7863_v20 = vpop.f32.mrf.mxu1 }
0x1e25   :  { %8229 = vpow2.f32 %v7244_v42 }
0x1e30   :  { %v8228_v2 = vpop.eup %8227 }
0x1e31   :  { %6659 = vrot.lane.b32.xlu0 %v8228_v2, %s8282_s24 }
0x1e32   :  { %v8230_v4 = vpop.eup %8229 }
0x1e33   :  { %v6653_v23 = vadd.f32 1.0, %v8230_v4 }
0x1e35   :  { %8231 = vrcp.f32 %v6653_v23 }
0x1e42   :  { %v8232_v5 = vpop.eup %8231 }
0x1e43   :  { %v6657_v43 = vmul.f32 %v8232_v5, %v6504_v44 }
0x1ea3   :  { %v6660_v11 = vpop.permute.xlu0 %6659 }
0x1ea4   :  { %v6662_v28 = vmul.f32 %v8232_v5, %v6660_v11 }
0x1ea6   :  { %6664 = vrot.lane.b32.xlu1 %v6662_v28, %s8282_s24 }
0x1eaa   :  { %5244 = vrot.lane.b32.xlu1 %v9755_v17, %s8283_s0 }
0x1eae   :  { %5872 = vrot.lane.b32.xlu1 %v9864_v62, %s8283_s0 }
0x1eb2   :  { %6349 = vrot.lane.b32.xlu1 %v6347_v38, %s8283_s0 }
0x1eb6   :  { %3488 = vrot.lane.b32.xlu1 %v9275_v0, %s8283_s0 }
0x1eba   :  { %4591 = vrot.lane.b32.xlu1 %v9519_v34, %s8283_s0 }
0x1ebe   :  { %5708 = vrot.lane.b32.xlu1 %v9762_v63, %s8283_s0 }
0x1f18   :  { %v6665_v45 = vpop.permute.xlu1 %6664 }
0x1f19   :  { %v6667_v24 = vadd.f32 %v6665_v45, %v6657_v43 }
0x1f1b   :  { %8233 = vtanh.f32 %v6667_v24 }
0x1f1c   :  { %v5245_v17 = vpop.permute.xlu1 %5244 }
0x1f1d   :  { %5248 = vst.msk [vmem:[#allocation2 - $0x6] sm:$0xc0] %vm5247_vm2, %v5245_v17 }
0x1f20   :  { %v5873_v62 = vpop.permute.xlu1 %5872 }
0x1f21   :  { %5876 = vst.msk [vmem:[#allocation2 + $0x2] sm:$0x3] %vm3491_vm3, %v5873_v62 }
0x1f24   :  { %v6350_v48 = vpop.permute.xlu1 %6349 }
0x1f25   :  { %6353 = vst.msk [vmem:[#allocation2 + $0x4] sm:$0x3] %vm3491_vm3, %v6350_v48 }
0x1f28   :  { %v8234_v0 = vpop.eup %8233  ;;  %v3489_v34 = vpop.permute.xlu1 %3488 }
0x1f29   :  { %3492 = vst.msk [vmem:[%s10023_s6] sm:$0x3] %vm3491_vm3, %v3489_v34  ;;  %6670 = vrot.lane.b32.xlu0 %v8234_v0, %s8282_s24 }
0x1f2c   :  { %v4592_v63 = vpop.permute.xlu1 %4591 }
0x1f2d   :  { %4594 = vst.msk [vmem:[%s10023_s6 + $0x4] sm:$0x3] %vm3491_vm3, %v4592_v63  ;;  %5250 = vrot.lane.b32.xlu0 %v9720_v25, %s8284_s20 }
0x1f30   :  { %v5709_v1 = vpop.permute.xlu1 %5708 }
0x1f31   :  { %5711 = vst.msk [vmem:[%s10023_s6 + $0x8] sm:$0x3] %vm3491_vm3, %v5709_v1  ;;  %5878 = vrot.lane.b32.xlu0 %v9834_v35, %s8284_s20 }
0x1f35   :  { %6355 = vrot.lane.b32.xlu0 %v9910_v39, %s8284_s20 }
0x1f39   :  { %6682 = vrot.lane.b32.xlu0 %v6667_v24, %s8284_s20 }
0x1f3d   :  { %4039 = vrot.lane.b32.xlu0 %v9392_v22, %s8283_s0 }
0x1f41   :  { %5144 = vrot.lane.b32.xlu0 %v9641_v13, %s8283_s0 }
0x1f45   :  { %6186 = vrot.lane.b32.xlu0 %v9870_v36, %s8283_s0 }
0x1f9b   :  { %v6671_v25 = vpop.permute.xlu0 %6670 }
0x1f9c   :  { %v6673_v47 = vmul.f32 %v8232_v5, %v6671_v25 }
0x1f9e   :  { %6675 = vrot.lane.b32.xlu1 %v6673_v47, %s8283_s0 }
0x1f9f   :  { %v5251_v26 = vpop.permute.xlu0 %5250 }
0x1fa0   :  { %5253 = vst.msk [vmem:[#allocation4 - $0x6] sm:$0xc0] %vm5247_vm2, %v5251_v26 }
0x1fa2   :  { %6512 = vrot.lane.b32.xlu1 %v9931_v6, %s8283_s0 }
0x1fa3   :  { %v5879_v35 = vpop.permute.xlu0 %5878 }
0x1fa4   :  { %5882 = vst.msk [vmem:[#allocation4 + $0x2] sm:$0x3] %vm3491_vm3, %v5879_v35 }
0x1fa7   :  { %v6356_v22 = vpop.permute.xlu0 %6355 }
0x1fa8   :  { %6359 = vst.msk [vmem:[#allocation4 + $0x4] sm:$0x3] %vm3491_vm3, %v6356_v22 }
0x1fab   :  { %v6683_v13 = vpop.permute.xlu0 %6682 }
0x1fac   :  { %6686 = vst.msk [vmem:[#allocation4 + $0x6] sm:$0x3] %vm3491_vm3, %v6683_v13 }
0x1fad   :  { %8246 = shalt.err (!%p8243_p4)
}
0x1fae   :  { %s8286_s0 = smov 2   ;;  %s8287_s12 = smov [#allocation2]  }
0x1faf   :  { %6712 = dma.vmem_to_hbm [thread:$0]  %s6707_s25, 128, %s10025_s8, [#allocation5], %s8282_s24, %s8282_s24, %s8286_s0   ;;  %v4040_v36 = vpop.permute.xlu0 %4039 }
0x1fb0   :  { %4042 = vst.msk [vmem:[%s10023_s6 + $0x2] sm:$0x3] %vm3491_vm3, %v4040_v36  ;;  %s6694_s8 = sshll.u32 %s8287_s12, 4  ;;  %s6695_s8 = int_to_ptr.vmem [resolvable:$true] %s6694_s8 }
0x1fb1   :  { %s8255_s2 = scalar_lea.vmem %s6695_s8, 128  ;;  %p8260_p6 = scmp.lt.s32.totalorder %s6695_s8, %s6695_s8 }
0x1fb2   :  { %p8256_p5 = scmp.ne.s32.totalorder %s6695_s8, %s8255_s2  ;;  %p8261_p7 = scmp.lt.s32.totalorder %s8255_s2, %s8255_s2 }
0x1fb3   :  { %v5145_v49 = vpop.permute.xlu0 %5144 }
0x1fb4   :  { %5147 = vst.msk [vmem:[%s10023_s6 + $0x6] sm:$0x3] %vm3491_vm3, %v5145_v49  ;;  %p8262_p8 = por %p8261_p7, %p8260_p6 }
0x1fb6   :  { %p8263_p9 = pnand %p8262_p8, %p8256_p5 }
0x1fb7   :  { %v6187_v31 = vpop.permute.xlu0 %6186 }
0x1fb8   :  { %6189 = vst.msk [vmem:[%s10023_s6 + $0xa] sm:$0x3] %vm3491_vm3, %v6187_v31 }
0x2010   :  { %v6676_v30 = vpop.permute.xlu1 %6675 }
0x2011   :  { %6678 = vst.msk [vmem:[%s10023_s6 + $0xe] sm:$0x3] %vm3491_vm3, %v6676_v30  ;;  %6680 = vst.msk [vmem:[#allocation2 + $0x6] sm:$0x3] %vm3491_vm3, %v6676_v30 }
0x2012   :  { %8266 = shalt.err (!%p8263_p9)
}
0x2013   :  { %6700 = dma.vmem_to_hbm [thread:$0]  %s6695_s8, 128, %s10024_s7, [#allocation3], %s8282_s24, %s8282_s24, %s8286_s0  }
0x2014   :  { %v6513_v14 = vpop.permute.xlu1 %6512 }
0x2015   :  { %6515 = vst.msk [vmem:[%s10023_s6 + $0xc] sm:$0x3] %vm3491_vm3, %v6513_v14 }
0x2016   :  { %8275 = dma.done.wait [#allocation3], 128  }
0x2017   :  { %8276 = vsyncadd [#allocation3], 4294967168 }
0x2018   :  { %8277 = dma.done.wait [#allocation5], 128  }
0x2019   :  { %8278 = vsyncadd [#allocation5], 4294967168 }
0x201a   :  { %6721 = vsyncpa [#allocation3], 1 }
0x201b   :  { %6722 = vsyncpa [#allocation5], 1 }

</bundles_post_ra>
